<compile_context>
chip_gen: v7x
topology: tpu7x:2x2x1
jax: 0.10.0
libtpu: 0.0.40
codegen_flags: <defaults>
</compile_context>

<pallas_src>
import functools

import jax
import jax.numpy as jnp
from jax.experimental import pallas as pl
from jax.experimental.pallas import tpu as pltpu


def _round_up(x, m):
    return (x + m - 1) // m * m


# ---------------------------------------------------------------------------
# Pallas kernel: chunked 2-layer GRU recurrence (eval-mode forward).
# ---------------------------------------------------------------------------
def gru_chunk_kernel(x_ref,                      # (TC, BB, Hp)  embedded inputs (bf16/f32)
                     w_ih0_ref, b_ih0_ref,       # (Hp, 3*Hp), (1, 3*Hp)
                     w_hh0_ref, b_hh0_ref,       # (Hp, 3*Hp), (1, 3*Hp)
                     w_ih1_ref, b_ih1_ref,       # (Hp, 3*Hp), (1, 3*Hp)
                     w_hh1_ref, b_hh1_ref,       # (Hp, 3*Hp), (1, 3*Hp)
                     h2_out_ref,                 # (TC, BB, Hp) f32
                     gi0_buf, h1_ref, h2_ref):   # VMEM scratch
    TC, BB, Hp = x_ref.shape
    G = 3 * Hp
    mxu_dtype = w_hh0_ref.dtype

    # New batch block starts -> reset the carried hidden states.
    @pl.when(pl.program_id(1) == 0)
    def _():
        h1_ref[...] = jnp.zeros_like(h1_ref)
        h2_ref[...] = jnp.zeros_like(h2_ref)

    # Chunk-level layer-0 input projection: ONE MXU matmul with M = TC*BB,
    # off the serial per-step path (replaces streaming a 3*Hp-wide gi0 slab).
    x2d = x_ref[...].reshape(TC * BB, Hp)
    gi0_all = jnp.dot(x2d, w_ih0_ref[...], preferred_element_type=jnp.float32)
    gi0_buf[...] = (gi0_all + b_ih0_ref[...]).reshape(TC, BB, G)

    # Hoist constant bias loads out of the (partially unrolled) time loop.
    b_hh0 = b_hh0_ref[...]
    b_ih1 = b_ih1_ref[...]
    b_hh1 = b_hh1_ref[...]

    def step(t, carry):
        # ---- layer 0 ----
        gi0 = gi0_buf[t]                                           # (BB, G) f32
        h1 = h1_ref[...]
        gh0 = jnp.dot(h1.astype(mxu_dtype), w_hh0_ref[...],
                      preferred_element_type=jnp.float32) + b_hh0
        r0 = jax.nn.sigmoid(gi0[:, :Hp] + gh0[:, :Hp])
        z0 = jax.nn.sigmoid(gi0[:, Hp:2 * Hp] + gh0[:, Hp:2 * Hp])
        n0 = jnp.tanh(gi0[:, 2 * Hp:] + r0 * gh0[:, 2 * Hp:])
        h1n = (1.0 - z0) * n0 + z0 * h1

        # ---- layer 1 ----
        h2 = h2_ref[...]
        gi1 = jnp.dot(h1n.astype(mxu_dtype), w_ih1_ref[...],
                      preferred_element_type=jnp.float32) + b_ih1
        gh1 = jnp.dot(h2.astype(mxu_dtype), w_hh1_ref[...],
                      preferred_element_type=jnp.float32) + b_hh1
        r1 = jax.nn.sigmoid(gi1[:, :Hp] + gh1[:, :Hp])
        z1 = jax.nn.sigmoid(gi1[:, Hp:2 * Hp] + gh1[:, Hp:2 * Hp])
        n1 = jnp.tanh(gi1[:, 2 * Hp:] + r1 * gh1[:, 2 * Hp:])
        h2n = (1.0 - z1) * n1 + z1 * h2

        h1_ref[...] = h1n
        h2_ref[...] = h2n
        h2_out_ref[t] = h2n                        # lane-dense (BB, Hp) store
        return carry

    # Fixed partial unroll: keeps cross-step MXU overlap without code bloat.
    jax.lax.fori_loop(0, TC, step, 0, unroll=min(8, TC))


# ---------------------------------------------------------------------------
# Padding helpers (gate blocks r|z|n are padded independently so slices stay
# lane-tile aligned).
# ---------------------------------------------------------------------------
def _pad_gates_last(x, h, hp):
    """Pad last axis (3*h, gate-major r|z|n) to 3*hp, per gate block."""
    lead = x.shape[:-1]
    x3 = x.reshape(lead + (3, h))
    pad = [(0, 0)] * (x3.ndim - 1) + [(0, hp - h)]
    return jnp.pad(x3, pad).reshape(lead + (3 * hp,))


def _pad_gru_weight(w, h, hp):
    """[in, 3h] -> [hp, 3hp]: zero-pad input rows and each gate block."""
    w = _pad_gates_last(w, h, hp)
    return jnp.pad(w, ((0, hp - w.shape[0]), (0, 0)))


# ---------------------------------------------------------------------------
# Forward wrapper.
# ---------------------------------------------------------------------------
def seq_model_forward(aa, params, max_rec_length, *, time_chunk=None,
                      batch_block=None, mxu_dtype=jnp.bfloat16):
    """aa: int32 [B, T] token ids in [0, 21). Returns (logits [B,T',21], angles [B,T',4]).

    batch_block: production batches should use 128 (v5e) / 256 (v6e, v7x) so the
    matmul M dimension fills the MXU; auto-selected (<=256, multiple of 8) when None.
    """
    H = params["w_ih0"].shape[0]
    B, T = aa.shape

    Hp = _round_up(H, 128)                     # lane-dense hidden size
    G = 3 * Hp
    if batch_block is None:
        batch_block = min(_round_up(B, 8), 256)
    BB = _round_up(batch_block, 8)             # sublane-dense batch block
    Bp = _round_up(max(B, BB), BB)
    if time_chunk is None:
        time_chunk = min(32, _round_up(T, 8))
    TC = time_chunk
    Tp = _round_up(T, TC)
    n_bblk, n_tchk = Bp // BB, Tp // TC

    # Embedded inputs, time-major, Hp-wide (NOT the 3*Hp gi0 slab), bf16.
    emb_p = jnp.pad(params["embedding"], ((0, 0), (0, Hp - H)))        # [21, Hp]
    x = emb_p[aa.T]                                                    # [T, B, Hp]
    x = jnp.pad(x, ((0, Tp - T), (0, Bp - B), (0, 0))).astype(mxu_dtype)

    # Lane-aligned, per-gate-padded weights (bf16 MXU operands) / f32 biases.
    w_ih0 = _pad_gru_weight(params["w_ih0"], H, Hp).astype(mxu_dtype)
    w_hh0 = _pad_gru_weight(params["w_hh0"], H, Hp).astype(mxu_dtype)
    w_ih1 = _pad_gru_weight(params["w_ih1"], H, Hp).astype(mxu_dtype)
    w_hh1 = _pad_gru_weight(params["w_hh1"], H, Hp).astype(mxu_dtype)
    b_ih0 = _pad_gates_last(params["b_ih0"], H, Hp)
    b_hh0 = _pad_gates_last(params["b_hh0"], H, Hp)
    b_ih1 = _pad_gates_last(params["b_ih1"], H, Hp)
    b_hh1 = _pad_gates_last(params["b_hh1"], H, Hp)

    def const_spec(shape):
        # Grid-invariant weights (constant index map -> DMA'd once).
        nd = len(shape)
        return pl.BlockSpec(shape, lambda b, c, _nd=nd: (0,) * _nd)

    # Explicit VMEM budget (est. footprint * 2, clamped to [32 MiB, 64 MiB]).
    bpe = jnp.dtype(mxu_dtype).itemsize
    vmem_est = (2 * TC * BB * Hp * bpe          # x blocks (double-buffered)
                + 2 * TC * BB * Hp * 4          # h2 out blocks
                + 2 * (4 * Hp * G * bpe + 4 * G * 4)   # weights + biases
                + TC * BB * G * 4 + 2 * BB * Hp * 4)   # scratch
    vmem_limit = int(min(max(2 * vmem_est, 32 * 1024 * 1024), 64 * 1024 * 1024))

    h2_tm = pl.pallas_call(
        gru_chunk_kernel,
        out_shape=jax.ShapeDtypeStruct((Tp, Bp, Hp), jnp.float32),
        grid=(n_bblk, n_tchk),
        in_specs=[
            pl.BlockSpec((TC, BB, Hp), lambda b, c: (c, b, 0)),   # x chunk
            const_spec((Hp, G)), const_spec((1, G)),              # w_ih0, b_ih0
            const_spec((Hp, G)), const_spec((1, G)),              # w_hh0, b_hh0
            const_spec((Hp, G)), const_spec((1, G)),              # w_ih1, b_ih1
            const_spec((Hp, G)), const_spec((1, G)),              # w_hh1, b_hh1
        ],
        out_specs=pl.BlockSpec((TC, BB, Hp), lambda b, c: (c, b, 0)),
        scratch_shapes=[pltpu.VMEM((TC, BB, G), jnp.float32),     # gi0 per chunk
                        pltpu.VMEM((BB, Hp), jnp.float32),        # h1 carry
                        pltpu.VMEM((BB, Hp), jnp.float32)],       # h2 carry
        compiler_params=pltpu.CompilerParams(
            # Batch blocks are independent (both TCs on v7x when n_bblk >= 2);
            # the time axis is the serial recurrence and stays "arbitrary".
            dimension_semantics=("parallel", "arbitrary"),
            vmem_limit_bytes=vmem_limit),
    )(x, w_ih0, b_ih0, w_hh0, b_hh0, w_ih1, b_ih1, w_hh1, b_hh1)

    # Heads: one fused [H, 25] matmul, applied ONLY to the kept timesteps and
    # the real (unpadded) batch/hidden slice, outside the recurrent loop.
    hs = h2_tm[max_rec_length:T, :B, :H]          # (T', B, H)
    hs = jnp.transpose(hs, (1, 0, 2))             # (B, T', H)
    w_heads = jnp.concatenate([params["w_out"], params["w_ang"]], axis=1)  # [H, 25]
    b_heads = jnp.concatenate([params["b_out"], params["b_ang"]], axis=1)  # [1, 25]
    heads = hs @ w_heads + b_heads
    return heads[..., :21], heads[..., 21:]


# ---------------------------------------------------------------------------
# Parameter init (PyTorch-style shapes, pre-transposed for x @ W).
# ---------------------------------------------------------------------------
def init_params(key, hid_dim):
    H = hid_dim
    k = 1.0 / jnp.sqrt(jnp.float32(H))
    ks = jax.random.split(key, 16)

    def u(kk, shape):
        return jax.random.uniform(kk, shape, jnp.float32, -k, k)

    return {
        "embedding": jax.random.normal(ks[0], (21, H), jnp.float32),
        # GRU layer 0
        "w_ih0": u(ks[1], (H, 3 * H)),
        "w_hh0": u(ks[2], (H, 3 * H)),
        "b_ih0": u(ks[3], (1, 3 * H)),
        "b_hh0": u(ks[4], (1, 3 * H)),
        # GRU layer 1
        "w_ih1": u(ks[5], (H, 3 * H)),
        "w_hh1": u(ks[6], (H, 3 * H)),
        "b_ih1": u(ks[7], (1, 3 * H)),
        "b_hh1": u(ks[8], (1, 3 * H)),
        # heads
        "w_out": u(ks[9], (H, 21)),
        "b_out": u(ks[10], (1, 21)),
        "w_ang": u(ks[11], (H, 4)),
        "b_ang": u(ks[12], (1, 4)),
    }


# ---------------------------------------------------------------------------
# Pure-JAX reference (lax.scan GRU) for correctness checking.
# ---------------------------------------------------------------------------
def _gru_cell_ref(x, h, w_ih, w_hh, b_ih, b_hh, H):
    gi = x @ w_ih + b_ih
    gh = h @ w_hh + b_hh
    r = jax.nn.sigmoid(gi[:, :H] + gh[:, :H])
    z = jax.nn.sigmoid(gi[:, H:2 * H] + gh[:, H:2 * H])
    n = jnp.tanh(gi[:, 2 * H:] + r * gh[:, 2 * H:])
    return (1.0 - z) * n + z * h


def ref_forward(aa, params, max_rec_length):
    H = params["w_ih0"].shape[0]
    emb = params["embedding"][aa]                 # (B, T, H)
    x = jnp.transpose(emb, (1, 0, 2))             # (T, B, H)
    B = x.shape[1]

    def step(carry, x_t):
        h1, h2 = carry
        h1 = _gru_cell_ref(x_t, h1, params["w_ih0"], params["w_hh0"],
                           params["b_ih0"], params["b_hh0"], H)
        h2 = _gru_cell_ref(h1, h2, params["w_ih1"], params["w_hh1"],
                           params["b_ih1"], params["b_hh1"], H)
        return (h1, h2), h2

    h0 = (jnp.zeros((B, H), jnp.float32), jnp.zeros((B, H), jnp.float32))
    _, hs = jax.lax.scan(step, h0, x)             # (T, B, H)
    hs = jnp.transpose(hs, (1, 0, 2))[:, max_rec_length:]
    logits = hs @ params["w_out"] + params["b_out"]
    angles = hs @ params["w_ang"] + params["b_ang"]
    return logits, angles


if __name__ == "__main__":
    B = 2
    HID = 32
    MAX_REC = 8      # small "receptor" length
    PEP = 8          # small "peptide" length
    T = MAX_REC + PEP

    key = jax.random.PRNGKey(0)
    k_param, k_tok = jax.random.split(key)
    params = init_params(k_param, HID)
    aa = jax.random.randint(k_tok, (B, T), 0, 21, dtype=jnp.int32)

    ref_logits, ref_angles = ref_forward(aa, params, MAX_REC)

    # f32 MXU-operand configuration, multi-chunk time axis (tests carry/reset).
    fwd_f32 = jax.jit(functools.partial(
        seq_model_forward, max_rec_length=MAX_REC,
        time_chunk=8, batch_block=8, mxu_dtype=jnp.float32))
    logits32, angles32 = fwd_f32(aa, params)
    jax.block_until_ready((logits32, angles32))
    assert logits32.shape == (B, T - MAX_REC, 21), logits32.shape
    assert angles32.shape == (B, T - MAX_REC, 4), angles32.shape
    assert jnp.allclose(logits32, ref_logits, atol=2e-2, rtol=2e-2)
    assert jnp.allclose(angles32, ref_angles, atol=2e-2, rtol=2e-2)

    # Default (bf16 MXU operands, auto chunk sizes): looser parity tolerance.
    fwd_bf16 = jax.jit(functools.partial(seq_model_forward, max_rec_length=MAX_REC))
    logits, angles = fwd_bf16(aa, params)
    jax.block_until_ready((logits, angles))
    assert logits.shape == (B, T - MAX_REC, 21), logits.shape
    assert angles.shape == (B, T - MAX_REC, 4), angles.shape
    assert jnp.allclose(logits, ref_logits, atol=5e-2, rtol=5e-2)
    assert jnp.allclose(angles, ref_angles, atol=5e-2, rtol=5e-2)

    print("KERNEL_OK")
</pallas_src>

<mosaic_0001>
module attributes {stable_mosaic.version = 11 : i64} {
  func.func @gru_chunk_kernel(%arg0: i32, %arg1: i32, %arg2: memref<8x8x128xf32, #tpu.memory_space<vmem>>, %arg3: memref<128x384xf32, #tpu.memory_space<vmem>>, %arg4: memref<1x384xf32, #tpu.memory_space<vmem>>, %arg5: memref<128x384xf32, #tpu.memory_space<vmem>>, %arg6: memref<1x384xf32, #tpu.memory_space<vmem>>, %arg7: memref<128x384xf32, #tpu.memory_space<vmem>>, %arg8: memref<1x384xf32, #tpu.memory_space<vmem>>, %arg9: memref<128x384xf32, #tpu.memory_space<vmem>>, %arg10: memref<1x384xf32, #tpu.memory_space<vmem>>, %arg11: memref<8x8x128xf32, #tpu.memory_space<vmem>>, %arg12: memref<8x8x384xf32, #tpu.memory_space<vmem>>, %arg13: memref<8x128xf32, #tpu.memory_space<vmem>>, %arg14: memref<8x128xf32, #tpu.memory_space<vmem>>) attributes {dimension_semantics = [#tpu.dimension_semantics<parallel>, #tpu.dimension_semantics<arbitrary>], iteration_bounds = array<i64: 1, 2>, scalar_prefetch = 0 : i64, scratch_operands = 3 : i64, tpu.core_type = #tpu.core_type<tc>, window_params = [{transform_indices = @transform_0, window_bounds = array<i64: 8, 8, 128>}, {pipeline_mode = #tpu.pipeline_mode<synchronous>, transform_indices = @transform_1, window_bounds = array<i64: 128, 384>}, {pipeline_mode = #tpu.pipeline_mode<synchronous>, transform_indices = @transform_2, window_bounds = array<i64: 1, 384>}, {pipeline_mode = #tpu.pipeline_mode<synchronous>, transform_indices = @transform_3, window_bounds = array<i64: 128, 384>}, {pipeline_mode = #tpu.pipeline_mode<synchronous>, transform_indices = @transform_4, window_bounds = array<i64: 1, 384>}, {pipeline_mode = #tpu.pipeline_mode<synchronous>, transform_indices = @transform_5, window_bounds = array<i64: 128, 384>}, {pipeline_mode = #tpu.pipeline_mode<synchronous>, transform_indices = @transform_6, window_bounds = array<i64: 1, 384>}, {pipeline_mode = #tpu.pipeline_mode<synchronous>, transform_indices = @transform_7, window_bounds = array<i64: 128, 384>}, {pipeline_mode = #tpu.pipeline_mode<synchronous>, transform_indices = @transform_8, window_bounds = array<i64: 1, 384>}, {transform_indices = @transform_9, window_bounds = array<i64: 8, 8, 128>}]} {
    %c0_i32 = arith.constant 0 : i32
    %0 = arith.cmpi eq, %arg1, %c0_i32 : i32
    %1 = arith.extui %0 : i1 to i32
    %c0_i32_0 = arith.constant 0 : i32
    %2 = arith.cmpi ne, %1, %c0_i32_0 : i32
    scf.if %2 {
      %cst_233 = arith.constant 0.000000e+00 : f32
      %615 = vector.broadcast %cst_233 : f32 to vector<8x128xf32>
      %c0_234 = arith.constant 0 : index
      %c0_235 = arith.constant 0 : index
      %616 = vector.load %arg13[%c0_234, %c0_235] : memref<8x128xf32, #tpu.memory_space<vmem>>, vector<8x128xf32>
      tpu.vector_store %arg13[%c0_234, %c0_235], %615 {strides = array<i32>} : memref<8x128xf32, #tpu.memory_space<vmem>>, vector<8x128xf32>,
      %cst_236 = arith.constant 0.000000e+00 : f32
      %617 = vector.broadcast %cst_236 : f32 to vector<8x128xf32>
      %c0_237 = arith.constant 0 : index
      %c0_238 = arith.constant 0 : index
      %618 = vector.load %arg14[%c0_237, %c0_238] : memref<8x128xf32, #tpu.memory_space<vmem>>, vector<8x128xf32>
      tpu.vector_store %arg14[%c0_237, %c0_238], %617 {strides = array<i32>} : memref<8x128xf32, #tpu.memory_space<vmem>>, vector<8x128xf32>,
    } else {
    }
    %c0 = arith.constant 0 : index
    %c0_1 = arith.constant 0 : index
    %c0_2 = arith.constant 0 : index
    %3 = vector.load %arg2[%c0, %c0_1, %c0_2] : memref<8x8x128xf32, #tpu.memory_space<vmem>>, vector<8x8x128xf32>
    %4 = vector.shape_cast %3 : vector<8x8x128xf32> to vector<64x128xf32>
    %c0_3 = arith.constant 0 : index
    %c0_4 = arith.constant 0 : index
    %5 = vector.load %arg3[%c0_3, %c0_4] : memref<128x384xf32, #tpu.memory_space<vmem>>, vector<128x384xf32>
    %cst = arith.constant dense<0.000000e+00> : vector<64x384xf32>
    %6 = tpu.matmul %4, %5, %cst {dimension_numbers = #tpu.dot_dimension_numbers<[1], [0], [0], [1], [0, 0, 1, 1], [], []>} : vector<64x128xf32>, vector<128x384xf32>, vector<64x384xf32> -> vector<64x384xf32>
    %c0_5 = arith.constant 0 : index
    %c0_6 = arith.constant 0 : index
    %7 = vector.load %arg4[%c0_5, %c0_6] : memref<1x384xf32, #tpu.memory_space<vmem>>, vector<1x384xf32>
    %8 = vector.broadcast %7 : vector<1x384xf32> to vector<64x384xf32>
    %9 = arith.addf %6, %8 : vector<64x384xf32>
    %10 = vector.shape_cast %9 : vector<64x384xf32> to vector<8x8x384xf32>
    %c0_7 = arith.constant 0 : index
    %c0_8 = arith.constant 0 : index
    %c0_9 = arith.constant 0 : index
    %11 = vector.load %arg12[%c0_7, %c0_8, %c0_9] : memref<8x8x384xf32, #tpu.memory_space<vmem>>, vector<8x8x384xf32>
    tpu.vector_store %arg12[%c0_7, %c0_8, %c0_9], %10 {strides = array<i32>} : memref<8x8x384xf32, #tpu.memory_space<vmem>>, vector<8x8x384xf32>,
    %c0_10 = arith.constant 0 : index
    %c0_11 = arith.constant 0 : index
    %12 = vector.load %arg6[%c0_10, %c0_11] : memref<1x384xf32, #tpu.memory_space<vmem>>, vector<1x384xf32>
    %c0_12 = arith.constant 0 : index
    %c0_13 = arith.constant 0 : index
    %13 = vector.load %arg8[%c0_12, %c0_13] : memref<1x384xf32, #tpu.memory_space<vmem>>, vector<1x384xf32>
    %c0_14 = arith.constant 0 : index
    %c0_15 = arith.constant 0 : index
    %14 = vector.load %arg10[%c0_14, %c0_15] : memref<1x384xf32, #tpu.memory_space<vmem>>, vector<1x384xf32>
    %c0_i32_16 = arith.constant 0 : i32
    %15 = arith.index_cast %c0_i32_16 : i32 to index
    %c0_17 = arith.constant 0 : index
    %c0_18 = arith.constant 0 : index
    %16 = vector.load %arg12[%15, %c0_17, %c0_18] : memref<8x8x384xf32, #tpu.memory_space<vmem>>, vector<1x8x384xf32>
    %17 = vector.shape_cast %16 : vector<1x8x384xf32> to vector<8x384xf32>
    %c0_19 = arith.constant 0 : index
    %c0_20 = arith.constant 0 : index
    %18 = vector.load %arg13[%c0_19, %c0_20] : memref<8x128xf32, #tpu.memory_space<vmem>>, vector<8x128xf32>
    %c0_21 = arith.constant 0 : index
    %c0_22 = arith.constant 0 : index
    %19 = vector.load %arg5[%c0_21, %c0_22] : memref<128x384xf32, #tpu.memory_space<vmem>>, vector<128x384xf32>
    %cst_23 = arith.constant dense<0.000000e+00> : vector<8x384xf32>
    %20 = tpu.matmul %18, %19, %cst_23 {dimension_numbers = #tpu.dot_dimension_numbers<[1], [0], [0], [1], [0, 0, 1, 1], [], []>} : vector<8x128xf32>, vector<128x384xf32>, vector<8x384xf32> -> vector<8x384xf32>
    %21 = vector.broadcast %12 : vector<1x384xf32> to vector<8x384xf32>
    %22 = arith.addf %20, %21 : vector<8x384xf32>
    %23 = vector.extract_strided_slice %17 {offsets = [0, 0], sizes = [8, 128], strides = [1, 1]} : vector<8x384xf32> to vector<8x128xf32>
    %24 = vector.extract_strided_slice %22 {offsets = [0, 0], sizes = [8, 128], strides = [1, 1]} : vector<8x384xf32> to vector<8x128xf32>
    %25 = arith.addf %23, %24 : vector<8x128xf32>
    %26 = arith.negf %25 : vector<8x128xf32>
    %27 = math.exp %26 : vector<8x128xf32>
    %cst_24 = arith.constant 1.000000e+00 : f32
    %28 = vector.broadcast %cst_24 : f32 to vector<8x128xf32>
    %29 = arith.addf %28, %27 : vector<8x128xf32>
    %30 = arith.divf %28, %29 : vector<8x128xf32>
    %31 = vector.extract_strided_slice %17 {offsets = [0, 128], sizes = [8, 128], strides = [1, 1]} : vector<8x384xf32> to vector<8x128xf32>
    %32 = vector.extract_strided_slice %22 {offsets = [0, 128], sizes = [8, 128], strides = [1, 1]} : vector<8x384xf32> to vector<8x128xf32>
    %33 = arith.addf %31, %32 : vector<8x128xf32>
    %34 = arith.negf %33 : vector<8x128xf32>
    %35 = math.exp %34 : vector<8x128xf32>
    %cst_25 = arith.constant 1.000000e+00 : f32
    %36 = vector.broadcast %cst_25 : f32 to vector<8x128xf32>
    %37 = arith.addf %36, %35 : vector<8x128xf32>
    %38 = arith.divf %36, %37 : vector<8x128xf32>
    %39 = vector.extract_strided_slice %17 {offsets = [0, 256], sizes = [8, 128], strides = [1, 1]} : vector<8x384xf32> to vector<8x128xf32>
    %40 = vector.extract_strided_slice %22 {offsets = [0, 256], sizes = [8, 128], strides = [1, 1]} : vector<8x384xf32> to vector<8x128xf32>
    %41 = arith.mulf %30, %40 : vector<8x128xf32>
    %42 = arith.addf %39, %41 : vector<8x128xf32>
    %43 = math.tanh %42 : vector<8x128xf32>
    %cst_26 = arith.constant 1.000000e+00 : f32
    %44 = vector.broadcast %cst_26 : f32 to vector<8x128xf32>
    %45 = arith.subf %44, %38 : vector<8x128xf32>
    %46 = arith.mulf %45, %43 : vector<8x128xf32>
    %47 = arith.mulf %38, %18 : vector<8x128xf32>
    %48 = arith.addf %46, %47 : vector<8x128xf32>
    %c0_27 = arith.constant 0 : index
    %c0_28 = arith.constant 0 : index
    %49 = vector.load %arg14[%c0_27, %c0_28] : memref<8x128xf32, #tpu.memory_space<vmem>>, vector<8x128xf32>
    %c0_29 = arith.constant 0 : index
    %c0_30 = arith.constant 0 : index
    %50 = vector.load %arg7[%c0_29, %c0_30] : memref<128x384xf32, #tpu.memory_space<vmem>>, vector<128x384xf32>
    %cst_31 = arith.constant dense<0.000000e+00> : vector<8x384xf32>
    %51 = tpu.matmul %48, %50, %cst_31 {dimension_numbers = #tpu.dot_dimension_numbers<[1], [0], [0], [1], [0, 0, 1, 1], [], []>} : vector<8x128xf32>, vector<128x384xf32>, vector<8x384xf32> -> vector<8x384xf32>
    %52 = vector.broadcast %13 : vector<1x384xf32> to vector<8x384xf32>
    %53 = arith.addf %51, %52 : vector<8x384xf32>
    %c0_32 = arith.constant 0 : index
    %c0_33 = arith.constant 0 : index
    %54 = vector.load %arg9[%c0_32, %c0_33] : memref<128x384xf32, #tpu.memory_space<vmem>>, vector<128x384xf32>
    %cst_34 = arith.constant dense<0.000000e+00> : vector<8x384xf32>
    %55 = tpu.matmul %49, %54, %cst_34 {dimension_numbers = #tpu.dot_dimension_numbers<[1], [0], [0], [1], [0, 0, 1, 1], [], []>} : vector<8x128xf32>, vector<128x384xf32>, vector<8x384xf32> -> vector<8x384xf32>
    %56 = vector.broadcast %14 : vector<1x384xf32> to vector<8x384xf32>
    %57 = arith.addf %55, %56 : vector<8x384xf32>
    %58 = vector.extract_strided_slice %53 {offsets = [0, 0], sizes = [8, 128], strides = [1, 1]} : vector<8x384xf32> to vector<8x128xf32>
    %59 = vector.extract_strided_slice %57 {offsets = [0, 0], sizes = [8, 128], strides = [1, 1]} : vector<8x384xf32> to vector<8x128xf32>
    %60 = arith.addf %58, %59 : vector<8x128xf32>
    %61 = arith.negf %60 : vector<8x128xf32>
    %62 = math.exp %61 : vector<8x128xf32>
    %cst_35 = arith.constant 1.000000e+00 : f32
    %63 = vector.broadcast %cst_35 : f32 to vector<8x128xf32>
    %64 = arith.addf %63, %62 : vector<8x128xf32>
    %65 = arith.divf %63, %64 : vector<8x128xf32>
    %66 = vector.extract_strided_slice %53 {offsets = [0, 128], sizes = [8, 128], strides = [1, 1]} : vector<8x384xf32> to vector<8x128xf32>
    %67 = vector.extract_strided_slice %57 {offsets = [0, 128], sizes = [8, 128], strides = [1, 1]} : vector<8x384xf32> to vector<8x128xf32>
    %68 = arith.addf %66, %67 : vector<8x128xf32>
    %69 = arith.negf %68 : vector<8x128xf32>
    %70 = math.exp %69 : vector<8x128xf32>
    %cst_36 = arith.constant 1.000000e+00 : f32
    %71 = vector.broadcast %cst_36 : f32 to vector<8x128xf32>
    %72 = arith.addf %71, %70 : vector<8x128xf32>
    %73 = arith.divf %71, %72 : vector<8x128xf32>
    %74 = vector.extract_strided_slice %53 {offsets = [0, 256], sizes = [8, 128], strides = [1, 1]} : vector<8x384xf32> to vector<8x128xf32>
    %75 = vector.extract_strided_slice %57 {offsets = [0, 256], sizes = [8, 128], strides = [1, 1]} : vector<8x384xf32> to vector<8x128xf32>
    %76 = arith.mulf %65, %75 : vector<8x128xf32>
    %77 = arith.addf %74, %76 : vector<8x128xf32>
    %78 = math.tanh %77 : vector<8x128xf32>
    %cst_37 = arith.constant 1.000000e+00 : f32
    %79 = vector.broadcast %cst_37 : f32 to vector<8x128xf32>
    %80 = arith.subf %79, %73 : vector<8x128xf32>
    %81 = arith.mulf %80, %78 : vector<8x128xf32>
    %82 = arith.mulf %73, %49 : vector<8x128xf32>
    %83 = arith.addf %81, %82 : vector<8x128xf32>
    %c0_38 = arith.constant 0 : index
    %c0_39 = arith.constant 0 : index
    %84 = vector.load %arg13[%c0_38, %c0_39] : memref<8x128xf32, #tpu.memory_space<vmem>>, vector<8x128xf32>
    tpu.vector_store %arg13[%c0_38, %c0_39], %48 {strides = array<i32>} : memref<8x128xf32, #tpu.memory_space<vmem>>, vector<8x128xf32>,
    %c0_40 = arith.constant 0 : index
    %c0_41 = arith.constant 0 : index
    %85 = vector.load %arg14[%c0_40, %c0_41] : memref<8x128xf32, #tpu.memory_space<vmem>>, vector<8x128xf32>
    tpu.vector_store %arg14[%c0_40, %c0_41], %83 {strides = array<i32>} : memref<8x128xf32, #tpu.memory_space<vmem>>, vector<8x128xf32>,
    %86 = arith.index_cast %c0_i32_16 : i32 to index
    %c0_42 = arith.constant 0 : index
    %c0_43 = arith.constant 0 : index
    %87 = vector.load %arg11[%86, %c0_42, %c0_43] : memref<8x8x128xf32, #tpu.memory_space<vmem>>, vector<1x8x128xf32>
    %88 = vector.shape_cast %87 : vector<1x8x128xf32> to vector<8x128xf32>
    %89 = vector.shape_cast %83 : vector<8x128xf32> to vector<1x8x128xf32>
    tpu.vector_store %arg11[%86, %c0_42, %c0_43], %89 {strides = array<i32>} : memref<8x8x128xf32, #tpu.memory_space<vmem>>, vector<1x8x128xf32>,
    %c1_i32 = arith.constant 1 : i32
    %90 = arith.index_cast %c1_i32 : i32 to index
    %c0_44 = arith.constant 0 : index
    %c0_45 = arith.constant 0 : index
    %91 = vector.load %arg12[%90, %c0_44, %c0_45] : memref<8x8x384xf32, #tpu.memory_space<vmem>>, vector<1x8x384xf32>
    %92 = vector.shape_cast %91 : vector<1x8x384xf32> to vector<8x384xf32>
    %c0_46 = arith.constant 0 : index
    %c0_47 = arith.constant 0 : index
    %93 = vector.load %arg13[%c0_46, %c0_47] : memref<8x128xf32, #tpu.memory_space<vmem>>, vector<8x128xf32>
    %c0_48 = arith.constant 0 : index
    %c0_49 = arith.constant 0 : index
    %94 = vector.load %arg5[%c0_48, %c0_49] : memref<128x384xf32, #tpu.memory_space<vmem>>, vector<128x384xf32>
    %cst_50 = arith.constant dense<0.000000e+00> : vector<8x384xf32>
    %95 = tpu.matmul %93, %94, %cst_50 {dimension_numbers = #tpu.dot_dimension_numbers<[1], [0], [0], [1], [0, 0, 1, 1], [], []>} : vector<8x128xf32>, vector<128x384xf32>, vector<8x384xf32> -> vector<8x384xf32>
    %96 = vector.broadcast %12 : vector<1x384xf32> to vector<8x384xf32>
    %97 = arith.addf %95, %96 : vector<8x384xf32>
    %98 = vector.extract_strided_slice %92 {offsets = [0, 0], sizes = [8, 128], strides = [1, 1]} : vector<8x384xf32> to vector<8x128xf32>
    %99 = vector.extract_strided_slice %97 {offsets = [0, 0], sizes = [8, 128], strides = [1, 1]} : vector<8x384xf32> to vector<8x128xf32>
    %100 = arith.addf %98, %99 : vector<8x128xf32>
    %101 = arith.negf %100 : vector<8x128xf32>
    %102 = math.exp %101 : vector<8x128xf32>
    %cst_51 = arith.constant 1.000000e+00 : f32
    %103 = vector.broadcast %cst_51 : f32 to vector<8x128xf32>
    %104 = arith.addf %103, %102 : vector<8x128xf32>
    %105 = arith.divf %103, %104 : vector<8x128xf32>
    %106 = vector.extract_strided_slice %92 {offsets = [0, 128], sizes = [8, 128], strides = [1, 1]} : vector<8x384xf32> to vector<8x128xf32>
    %107 = vector.extract_strided_slice %97 {offsets = [0, 128], sizes = [8, 128], strides = [1, 1]} : vector<8x384xf32> to vector<8x128xf32>
    %108 = arith.addf %106, %107 : vector<8x128xf32>
    %109 = arith.negf %108 : vector<8x128xf32>
    %110 = math.exp %109 : vector<8x128xf32>
    %cst_52 = arith.constant 1.000000e+00 : f32
    %111 = vector.broadcast %cst_52 : f32 to vector<8x128xf32>
    %112 = arith.addf %111, %110 : vector<8x128xf32>
    %113 = arith.divf %111, %112 : vector<8x128xf32>
    %114 = vector.extract_strided_slice %92 {offsets = [0, 256], sizes = [8, 128], strides = [1, 1]} : vector<8x384xf32> to vector<8x128xf32>
    %115 = vector.extract_strided_slice %97 {offsets = [0, 256], sizes = [8, 128], strides = [1, 1]} : vector<8x384xf32> to vector<8x128xf32>
    %116 = arith.mulf %105, %115 : vector<8x128xf32>
    %117 = arith.addf %114, %116 : vector<8x128xf32>
    %118 = math.tanh %117 : vector<8x128xf32>
    %cst_53 = arith.constant 1.000000e+00 : f32
    %119 = vector.broadcast %cst_53 : f32 to vector<8x128xf32>
    %120 = arith.subf %119, %113 : vector<8x128xf32>
    %121 = arith.mulf %120, %118 : vector<8x128xf32>
    %122 = arith.mulf %113, %93 : vector<8x128xf32>
    %123 = arith.addf %121, %122 : vector<8x128xf32>
    %c0_54 = arith.constant 0 : index
    %c0_55 = arith.constant 0 : index
    %124 = vector.load %arg14[%c0_54, %c0_55] : memref<8x128xf32, #tpu.memory_space<vmem>>, vector<8x128xf32>
    %c0_56 = arith.constant 0 : index
    %c0_57 = arith.constant 0 : index
    %125 = vector.load %arg7[%c0_56, %c0_57] : memref<128x384xf32, #tpu.memory_space<vmem>>, vector<128x384xf32>
    %cst_58 = arith.constant dense<0.000000e+00> : vector<8x384xf32>
    %126 = tpu.matmul %123, %125, %cst_58 {dimension_numbers = #tpu.dot_dimension_numbers<[1], [0], [0], [1], [0, 0, 1, 1], [], []>} : vector<8x128xf32>, vector<128x384xf32>, vector<8x384xf32> -> vector<8x384xf32>
    %127 = vector.broadcast %13 : vector<1x384xf32> to vector<8x384xf32>
    %128 = arith.addf %126, %127 : vector<8x384xf32>
    %c0_59 = arith.constant 0 : index
    %c0_60 = arith.constant 0 : index
    %129 = vector.load %arg9[%c0_59, %c0_60] : memref<128x384xf32, #tpu.memory_space<vmem>>, vector<128x384xf32>
    %cst_61 = arith.constant dense<0.000000e+00> : vector<8x384xf32>
    %130 = tpu.matmul %124, %129, %cst_61 {dimension_numbers = #tpu.dot_dimension_numbers<[1], [0], [0], [1], [0, 0, 1, 1], [], []>} : vector<8x128xf32>, vector<128x384xf32>, vector<8x384xf32> -> vector<8x384xf32>
    %131 = vector.broadcast %14 : vector<1x384xf32> to vector<8x384xf32>
    %132 = arith.addf %130, %131 : vector<8x384xf32>
    %133 = vector.extract_strided_slice %128 {offsets = [0, 0], sizes = [8, 128], strides = [1, 1]} : vector<8x384xf32> to vector<8x128xf32>
    %134 = vector.extract_strided_slice %132 {offsets = [0, 0], sizes = [8, 128], strides = [1, 1]} : vector<8x384xf32> to vector<8x128xf32>
    %135 = arith.addf %133, %134 : vector<8x128xf32>
    %136 = arith.negf %135 : vector<8x128xf32>
    %137 = math.exp %136 : vector<8x128xf32>
    %cst_62 = arith.constant 1.000000e+00 : f32
    %138 = vector.broadcast %cst_62 : f32 to vector<8x128xf32>
    %139 = arith.addf %138, %137 : vector<8x128xf32>
    %140 = arith.divf %138, %139 : vector<8x128xf32>
    %141 = vector.extract_strided_slice %128 {offsets = [0, 128], sizes = [8, 128], strides = [1, 1]} : vector<8x384xf32> to vector<8x128xf32>
    %142 = vector.extract_strided_slice %132 {offsets = [0, 128], sizes = [8, 128], strides = [1, 1]} : vector<8x384xf32> to vector<8x128xf32>
    %143 = arith.addf %141, %142 : vector<8x128xf32>
    %144 = arith.negf %143 : vector<8x128xf32>
    %145 = math.exp %144 : vector<8x128xf32>
    %cst_63 = arith.constant 1.000000e+00 : f32
    %146 = vector.broadcast %cst_63 : f32 to vector<8x128xf32>
    %147 = arith.addf %146, %145 : vector<8x128xf32>
    %148 = arith.divf %146, %147 : vector<8x128xf32>
    %149 = vector.extract_strided_slice %128 {offsets = [0, 256], sizes = [8, 128], strides = [1, 1]} : vector<8x384xf32> to vector<8x128xf32>
    %150 = vector.extract_strided_slice %132 {offsets = [0, 256], sizes = [8, 128], strides = [1, 1]} : vector<8x384xf32> to vector<8x128xf32>
    %151 = arith.mulf %140, %150 : vector<8x128xf32>
    %152 = arith.addf %149, %151 : vector<8x128xf32>
    %153 = math.tanh %152 : vector<8x128xf32>
    %cst_64 = arith.constant 1.000000e+00 : f32
    %154 = vector.broadcast %cst_64 : f32 to vector<8x128xf32>
    %155 = arith.subf %154, %148 : vector<8x128xf32>
    %156 = arith.mulf %155, %153 : vector<8x128xf32>
    %157 = arith.mulf %148, %124 : vector<8x128xf32>
    %158 = arith.addf %156, %157 : vector<8x128xf32>
    %c0_65 = arith.constant 0 : index
    %c0_66 = arith.constant 0 : index
    %159 = vector.load %arg13[%c0_65, %c0_66] : memref<8x128xf32, #tpu.memory_space<vmem>>, vector<8x128xf32>
    tpu.vector_store %arg13[%c0_65, %c0_66], %123 {strides = array<i32>} : memref<8x128xf32, #tpu.memory_space<vmem>>, vector<8x128xf32>,
    %c0_67 = arith.constant 0 : index
    %c0_68 = arith.constant 0 : index
    %160 = vector.load %arg14[%c0_67, %c0_68] : memref<8x128xf32, #tpu.memory_space<vmem>>, vector<8x128xf32>
    tpu.vector_store %arg14[%c0_67, %c0_68], %158 {strides = array<i32>} : memref<8x128xf32, #tpu.memory_space<vmem>>, vector<8x128xf32>,
    %161 = arith.index_cast %c1_i32 : i32 to index
    %c0_69 = arith.constant 0 : index
    %c0_70 = arith.constant 0 : index
    %162 = vector.load %arg11[%161, %c0_69, %c0_70] : memref<8x8x128xf32, #tpu.memory_space<vmem>>, vector<1x8x128xf32>
    %163 = vector.shape_cast %162 : vector<1x8x128xf32> to vector<8x128xf32>
    %164 = vector.shape_cast %158 : vector<8x128xf32> to vector<1x8x128xf32>
    tpu.vector_store %arg11[%161, %c0_69, %c0_70], %164 {strides = array<i32>} : memref<8x8x128xf32, #tpu.memory_space<vmem>>, vector<1x8x128xf32>,
    %c2_i32 = arith.constant 2 : i32
    %165 = arith.index_cast %c2_i32 : i32 to index
    %c0_71 = arith.constant 0 : index
    %c0_72 = arith.constant 0 : index
    %166 = vector.load %arg12[%165, %c0_71, %c0_72] : memref<8x8x384xf32, #tpu.memory_space<vmem>>, vector<1x8x384xf32>
    %167 = vector.shape_cast %166 : vector<1x8x384xf32> to vector<8x384xf32>
    %c0_73 = arith.constant 0 : index
    %c0_74 = arith.constant 0 : index
    %168 = vector.load %arg13[%c0_73, %c0_74] : memref<8x128xf32, #tpu.memory_space<vmem>>, vector<8x128xf32>
    %c0_75 = arith.constant 0 : index
    %c0_76 = arith.constant 0 : index
    %169 = vector.load %arg5[%c0_75, %c0_76] : memref<128x384xf32, #tpu.memory_space<vmem>>, vector<128x384xf32>
    %cst_77 = arith.constant dense<0.000000e+00> : vector<8x384xf32>
    %170 = tpu.matmul %168, %169, %cst_77 {dimension_numbers = #tpu.dot_dimension_numbers<[1], [0], [0], [1], [0, 0, 1, 1], [], []>} : vector<8x128xf32>, vector<128x384xf32>, vector<8x384xf32> -> vector<8x384xf32>
    %171 = vector.broadcast %12 : vector<1x384xf32> to vector<8x384xf32>
    %172 = arith.addf %170, %171 : vector<8x384xf32>
    %173 = vector.extract_strided_slice %167 {offsets = [0, 0], sizes = [8, 128], strides = [1, 1]} : vector<8x384xf32> to vector<8x128xf32>
    %174 = vector.extract_strided_slice %172 {offsets = [0, 0], sizes = [8, 128], strides = [1, 1]} : vector<8x384xf32> to vector<8x128xf32>
    %175 = arith.addf %173, %174 : vector<8x128xf32>
    %176 = arith.negf %175 : vector<8x128xf32>
    %177 = math.exp %176 : vector<8x128xf32>
    %cst_78 = arith.constant 1.000000e+00 : f32
    %178 = vector.broadcast %cst_78 : f32 to vector<8x128xf32>
    %179 = arith.addf %178, %177 : vector<8x128xf32>
    %180 = arith.divf %178, %179 : vector<8x128xf32>
    %181 = vector.extract_strided_slice %167 {offsets = [0, 128], sizes = [8, 128], strides = [1, 1]} : vector<8x384xf32> to vector<8x128xf32>
    %182 = vector.extract_strided_slice %172 {offsets = [0, 128], sizes = [8, 128], strides = [1, 1]} : vector<8x384xf32> to vector<8x128xf32>
    %183 = arith.addf %181, %182 : vector<8x128xf32>
    %184 = arith.negf %183 : vector<8x128xf32>
    %185 = math.exp %184 : vector<8x128xf32>
    %cst_79 = arith.constant 1.000000e+00 : f32
    %186 = vector.broadcast %cst_79 : f32 to vector<8x128xf32>
    %187 = arith.addf %186, %185 : vector<8x128xf32>
    %188 = arith.divf %186, %187 : vector<8x128xf32>
    %189 = vector.extract_strided_slice %167 {offsets = [0, 256], sizes = [8, 128], strides = [1, 1]} : vector<8x384xf32> to vector<8x128xf32>
    %190 = vector.extract_strided_slice %172 {offsets = [0, 256], sizes = [8, 128], strides = [1, 1]} : vector<8x384xf32> to vector<8x128xf32>
    %191 = arith.mulf %180, %190 : vector<8x128xf32>
    %192 = arith.addf %189, %191 : vector<8x128xf32>
    %193 = math.tanh %192 : vector<8x128xf32>
    %cst_80 = arith.constant 1.000000e+00 : f32
    %194 = vector.broadcast %cst_80 : f32 to vector<8x128xf32>
    %195 = arith.subf %194, %188 : vector<8x128xf32>
    %196 = arith.mulf %195, %193 : vector<8x128xf32>
    %197 = arith.mulf %188, %168 : vector<8x128xf32>
    %198 = arith.addf %196, %197 : vector<8x128xf32>
    %c0_81 = arith.constant 0 : index
    %c0_82 = arith.constant 0 : index
    %199 = vector.load %arg14[%c0_81, %c0_82] : memref<8x128xf32, #tpu.memory_space<vmem>>, vector<8x128xf32>
    %c0_83 = arith.constant 0 : index
    %c0_84 = arith.constant 0 : index
    %200 = vector.load %arg7[%c0_83, %c0_84] : memref<128x384xf32, #tpu.memory_space<vmem>>, vector<128x384xf32>
    %cst_85 = arith.constant dense<0.000000e+00> : vector<8x384xf32>
    %201 = tpu.matmul %198, %200, %cst_85 {dimension_numbers = #tpu.dot_dimension_numbers<[1], [0], [0], [1], [0, 0, 1, 1], [], []>} : vector<8x128xf32>, vector<128x384xf32>, vector<8x384xf32> -> vector<8x384xf32>
    %202 = vector.broadcast %13 : vector<1x384xf32> to vector<8x384xf32>
    %203 = arith.addf %201, %202 : vector<8x384xf32>
    %c0_86 = arith.constant 0 : index
    %c0_87 = arith.constant 0 : index
    %204 = vector.load %arg9[%c0_86, %c0_87] : memref<128x384xf32, #tpu.memory_space<vmem>>, vector<128x384xf32>
    %cst_88 = arith.constant dense<0.000000e+00> : vector<8x384xf32>
    %205 = tpu.matmul %199, %204, %cst_88 {dimension_numbers = #tpu.dot_dimension_numbers<[1], [0], [0], [1], [0, 0, 1, 1], [], []>} : vector<8x128xf32>, vector<128x384xf32>, vector<8x384xf32> -> vector<8x384xf32>
    %206 = vector.broadcast %14 : vector<1x384xf32> to vector<8x384xf32>
    %207 = arith.addf %205, %206 : vector<8x384xf32>
    %208 = vector.extract_strided_slice %203 {offsets = [0, 0], sizes = [8, 128], strides = [1, 1]} : vector<8x384xf32> to vector<8x128xf32>
    %209 = vector.extract_strided_slice %207 {offsets = [0, 0], sizes = [8, 128], strides = [1, 1]} : vector<8x384xf32> to vector<8x128xf32>
    %210 = arith.addf %208, %209 : vector<8x128xf32>
    %211 = arith.negf %210 : vector<8x128xf32>
    %212 = math.exp %211 : vector<8x128xf32>
    %cst_89 = arith.constant 1.000000e+00 : f32
    %213 = vector.broadcast %cst_89 : f32 to vector<8x128xf32>
    %214 = arith.addf %213, %212 : vector<8x128xf32>
    %215 = arith.divf %213, %214 : vector<8x128xf32>
    %216 = vector.extract_strided_slice %203 {offsets = [0, 128], sizes = [8, 128], strides = [1, 1]} : vector<8x384xf32> to vector<8x128xf32>
    %217 = vector.extract_strided_slice %207 {offsets = [0, 128], sizes = [8, 128], strides = [1, 1]} : vector<8x384xf32> to vector<8x128xf32>
    %218 = arith.addf %216, %217 : vector<8x128xf32>
    %219 = arith.negf %218 : vector<8x128xf32>
    %220 = math.exp %219 : vector<8x128xf32>
    %cst_90 = arith.constant 1.000000e+00 : f32
    %221 = vector.broadcast %cst_90 : f32 to vector<8x128xf32>
    %222 = arith.addf %221, %220 : vector<8x128xf32>
    %223 = arith.divf %221, %222 : vector<8x128xf32>
    %224 = vector.extract_strided_slice %203 {offsets = [0, 256], sizes = [8, 128], strides = [1, 1]} : vector<8x384xf32> to vector<8x128xf32>
    %225 = vector.extract_strided_slice %207 {offsets = [0, 256], sizes = [8, 128], strides = [1, 1]} : vector<8x384xf32> to vector<8x128xf32>
    %226 = arith.mulf %215, %225 : vector<8x128xf32>
    %227 = arith.addf %224, %226 : vector<8x128xf32>
    %228 = math.tanh %227 : vector<8x128xf32>
    %cst_91 = arith.constant 1.000000e+00 : f32
    %229 = vector.broadcast %cst_91 : f32 to vector<8x128xf32>
    %230 = arith.subf %229, %223 : vector<8x128xf32>
    %231 = arith.mulf %230, %228 : vector<8x128xf32>
    %232 = arith.mulf %223, %199 : vector<8x128xf32>
    %233 = arith.addf %231, %232 : vector<8x128xf32>
    %c0_92 = arith.constant 0 : index
    %c0_93 = arith.constant 0 : index
    %234 = vector.load %arg13[%c0_92, %c0_93] : memref<8x128xf32, #tpu.memory_space<vmem>>, vector<8x128xf32>
    tpu.vector_store %arg13[%c0_92, %c0_93], %198 {strides = array<i32>} : memref<8x128xf32, #tpu.memory_space<vmem>>, vector<8x128xf32>,
    %c0_94 = arith.constant 0 : index
    %c0_95 = arith.constant 0 : index
    %235 = vector.load %arg14[%c0_94, %c0_95] : memref<8x128xf32, #tpu.memory_space<vmem>>, vector<8x128xf32>
    tpu.vector_store %arg14[%c0_94, %c0_95], %233 {strides = array<i32>} : memref<8x128xf32, #tpu.memory_space<vmem>>, vector<8x128xf32>,
    %236 = arith.index_cast %c2_i32 : i32 to index
    %c0_96 = arith.constant 0 : index
    %c0_97 = arith.constant 0 : index
    %237 = vector.load %arg11[%236, %c0_96, %c0_97] : memref<8x8x128xf32, #tpu.memory_space<vmem>>, vector<1x8x128xf32>
    %238 = vector.shape_cast %237 : vector<1x8x128xf32> to vector<8x128xf32>
    %239 = vector.shape_cast %233 : vector<8x128xf32> to vector<1x8x128xf32>
    tpu.vector_store %arg11[%236, %c0_96, %c0_97], %239 {strides = array<i32>} : memref<8x8x128xf32, #tpu.memory_space<vmem>>, vector<1x8x128xf32>,
    %c3_i32 = arith.constant 3 : i32
    %240 = arith.index_cast %c3_i32 : i32 to index
    %c0_98 = arith.constant 0 : index
    %c0_99 = arith.constant 0 : index
    %241 = vector.load %arg12[%240, %c0_98, %c0_99] : memref<8x8x384xf32, #tpu.memory_space<vmem>>, vector<1x8x384xf32>
    %242 = vector.shape_cast %241 : vector<1x8x384xf32> to vector<8x384xf32>
    %c0_100 = arith.constant 0 : index
    %c0_101 = arith.constant 0 : index
    %243 = vector.load %arg13[%c0_100, %c0_101] : memref<8x128xf32, #tpu.memory_space<vmem>>, vector<8x128xf32>
    %c0_102 = arith.constant 0 : index
    %c0_103 = arith.constant 0 : index
    %244 = vector.load %arg5[%c0_102, %c0_103] : memref<128x384xf32, #tpu.memory_space<vmem>>, vector<128x384xf32>
    %cst_104 = arith.constant dense<0.000000e+00> : vector<8x384xf32>
    %245 = tpu.matmul %243, %244, %cst_104 {dimension_numbers = #tpu.dot_dimension_numbers<[1], [0], [0], [1], [0, 0, 1, 1], [], []>} : vector<8x128xf32>, vector<128x384xf32>, vector<8x384xf32> -> vector<8x384xf32>
    %246 = vector.broadcast %12 : vector<1x384xf32> to vector<8x384xf32>
    %247 = arith.addf %245, %246 : vector<8x384xf32>
    %248 = vector.extract_strided_slice %242 {offsets = [0, 0], sizes = [8, 128], strides = [1, 1]} : vector<8x384xf32> to vector<8x128xf32>
    %249 = vector.extract_strided_slice %247 {offsets = [0, 0], sizes = [8, 128], strides = [1, 1]} : vector<8x384xf32> to vector<8x128xf32>
    %250 = arith.addf %248, %249 : vector<8x128xf32>
    %251 = arith.negf %250 : vector<8x128xf32>
    %252 = math.exp %251 : vector<8x128xf32>
    %cst_105 = arith.constant 1.000000e+00 : f32
    %253 = vector.broadcast %cst_105 : f32 to vector<8x128xf32>
    %254 = arith.addf %253, %252 : vector<8x128xf32>
    %255 = arith.divf %253, %254 : vector<8x128xf32>
    %256 = vector.extract_strided_slice %242 {offsets = [0, 128], sizes = [8, 128], strides = [1, 1]} : vector<8x384xf32> to vector<8x128xf32>
    %257 = vector.extract_strided_slice %247 {offsets = [0, 128], sizes = [8, 128], strides = [1, 1]} : vector<8x384xf32> to vector<8x128xf32>
    %258 = arith.addf %256, %257 : vector<8x128xf32>
    %259 = arith.negf %258 : vector<8x128xf32>
    %260 = math.exp %259 : vector<8x128xf32>
    %cst_106 = arith.constant 1.000000e+00 : f32
    %261 = vector.broadcast %cst_106 : f32 to vector<8x128xf32>
    %262 = arith.addf %261, %260 : vector<8x128xf32>
    %263 = arith.divf %261, %262 : vector<8x128xf32>
    %264 = vector.extract_strided_slice %242 {offsets = [0, 256], sizes = [8, 128], strides = [1, 1]} : vector<8x384xf32> to vector<8x128xf32>
    %265 = vector.extract_strided_slice %247 {offsets = [0, 256], sizes = [8, 128], strides = [1, 1]} : vector<8x384xf32> to vector<8x128xf32>
    %266 = arith.mulf %255, %265 : vector<8x128xf32>
    %267 = arith.addf %264, %266 : vector<8x128xf32>
    %268 = math.tanh %267 : vector<8x128xf32>
    %cst_107 = arith.constant 1.000000e+00 : f32
    %269 = vector.broadcast %cst_107 : f32 to vector<8x128xf32>
    %270 = arith.subf %269, %263 : vector<8x128xf32>
    %271 = arith.mulf %270, %268 : vector<8x128xf32>
    %272 = arith.mulf %263, %243 : vector<8x128xf32>
    %273 = arith.addf %271, %272 : vector<8x128xf32>
    %c0_108 = arith.constant 0 : index
    %c0_109 = arith.constant 0 : index
    %274 = vector.load %arg14[%c0_108, %c0_109] : memref<8x128xf32, #tpu.memory_space<vmem>>, vector<8x128xf32>
    %c0_110 = arith.constant 0 : index
    %c0_111 = arith.constant 0 : index
    %275 = vector.load %arg7[%c0_110, %c0_111] : memref<128x384xf32, #tpu.memory_space<vmem>>, vector<128x384xf32>
    %cst_112 = arith.constant dense<0.000000e+00> : vector<8x384xf32>
    %276 = tpu.matmul %273, %275, %cst_112 {dimension_numbers = #tpu.dot_dimension_numbers<[1], [0], [0], [1], [0, 0, 1, 1], [], []>} : vector<8x128xf32>, vector<128x384xf32>, vector<8x384xf32> -> vector<8x384xf32>
    %277 = vector.broadcast %13 : vector<1x384xf32> to vector<8x384xf32>
    %278 = arith.addf %276, %277 : vector<8x384xf32>
    %c0_113 = arith.constant 0 : index
    %c0_114 = arith.constant 0 : index
    %279 = vector.load %arg9[%c0_113, %c0_114] : memref<128x384xf32, #tpu.memory_space<vmem>>, vector<128x384xf32>
    %cst_115 = arith.constant dense<0.000000e+00> : vector<8x384xf32>
    %280 = tpu.matmul %274, %279, %cst_115 {dimension_numbers = #tpu.dot_dimension_numbers<[1], [0], [0], [1], [0, 0, 1, 1], [], []>} : vector<8x128xf32>, vector<128x384xf32>, vector<8x384xf32> -> vector<8x384xf32>
    %281 = vector.broadcast %14 : vector<1x384xf32> to vector<8x384xf32>
    %282 = arith.addf %280, %281 : vector<8x384xf32>
    %283 = vector.extract_strided_slice %278 {offsets = [0, 0], sizes = [8, 128], strides = [1, 1]} : vector<8x384xf32> to vector<8x128xf32>
    %284 = vector.extract_strided_slice %282 {offsets = [0, 0], sizes = [8, 128], strides = [1, 1]} : vector<8x384xf32> to vector<8x128xf32>
    %285 = arith.addf %283, %284 : vector<8x128xf32>
    %286 = arith.negf %285 : vector<8x128xf32>
    %287 = math.exp %286 : vector<8x128xf32>
    %cst_116 = arith.constant 1.000000e+00 : f32
    %288 = vector.broadcast %cst_116 : f32 to vector<8x128xf32>
    %289 = arith.addf %288, %287 : vector<8x128xf32>
    %290 = arith.divf %288, %289 : vector<8x128xf32>
    %291 = vector.extract_strided_slice %278 {offsets = [0, 128], sizes = [8, 128], strides = [1, 1]} : vector<8x384xf32> to vector<8x128xf32>
    %292 = vector.extract_strided_slice %282 {offsets = [0, 128], sizes = [8, 128], strides = [1, 1]} : vector<8x384xf32> to vector<8x128xf32>
    %293 = arith.addf %291, %292 : vector<8x128xf32>
    %294 = arith.negf %293 : vector<8x128xf32>
    %295 = math.exp %294 : vector<8x128xf32>
    %cst_117 = arith.constant 1.000000e+00 : f32
    %296 = vector.broadcast %cst_117 : f32 to vector<8x128xf32>
    %297 = arith.addf %296, %295 : vector<8x128xf32>
    %298 = arith.divf %296, %297 : vector<8x128xf32>
    %299 = vector.extract_strided_slice %278 {offsets = [0, 256], sizes = [8, 128], strides = [1, 1]} : vector<8x384xf32> to vector<8x128xf32>
    %300 = vector.extract_strided_slice %282 {offsets = [0, 256], sizes = [8, 128], strides = [1, 1]} : vector<8x384xf32> to vector<8x128xf32>
    %301 = arith.mulf %290, %300 : vector<8x128xf32>
    %302 = arith.addf %299, %301 : vector<8x128xf32>
    %303 = math.tanh %302 : vector<8x128xf32>
    %cst_118 = arith.constant 1.000000e+00 : f32
    %304 = vector.broadcast %cst_118 : f32 to vector<8x128xf32>
    %305 = arith.subf %304, %298 : vector<8x128xf32>
    %306 = arith.mulf %305, %303 : vector<8x128xf32>
    %307 = arith.mulf %298, %274 : vector<8x128xf32>
    %308 = arith.addf %306, %307 : vector<8x128xf32>
    %c0_119 = arith.constant 0 : index
    %c0_120 = arith.constant 0 : index
    %309 = vector.load %arg13[%c0_119, %c0_120] : memref<8x128xf32, #tpu.memory_space<vmem>>, vector<8x128xf32>
    tpu.vector_store %arg13[%c0_119, %c0_120], %273 {strides = array<i32>} : memref<8x128xf32, #tpu.memory_space<vmem>>, vector<8x128xf32>,
    %c0_121 = arith.constant 0 : index
    %c0_122 = arith.constant 0 : index
    %310 = vector.load %arg14[%c0_121, %c0_122] : memref<8x128xf32, #tpu.memory_space<vmem>>, vector<8x128xf32>
    tpu.vector_store %arg14[%c0_121, %c0_122], %308 {strides = array<i32>} : memref<8x128xf32, #tpu.memory_space<vmem>>, vector<8x128xf32>,
    %311 = arith.index_cast %c3_i32 : i32 to index
    %c0_123 = arith.constant 0 : index
    %c0_124 = arith.constant 0 : index
    %312 = vector.load %arg11[%311, %c0_123, %c0_124] : memref<8x8x128xf32, #tpu.memory_space<vmem>>, vector<1x8x128xf32>
    %313 = vector.shape_cast %312 : vector<1x8x128xf32> to vector<8x128xf32>
    %314 = vector.shape_cast %308 : vector<8x128xf32> to vector<1x8x128xf32>
    tpu.vector_store %arg11[%311, %c0_123, %c0_124], %314 {strides = array<i32>} : memref<8x8x128xf32, #tpu.memory_space<vmem>>, vector<1x8x128xf32>,
    %c4_i32 = arith.constant 4 : i32
    %315 = arith.index_cast %c4_i32 : i32 to index
    %c0_125 = arith.constant 0 : index
    %c0_126 = arith.constant 0 : index
    %316 = vector.load %arg12[%315, %c0_125, %c0_126] : memref<8x8x384xf32, #tpu.memory_space<vmem>>, vector<1x8x384xf32>
    %317 = vector.shape_cast %316 : vector<1x8x384xf32> to vector<8x384xf32>
    %c0_127 = arith.constant 0 : index
    %c0_128 = arith.constant 0 : index
    %318 = vector.load %arg13[%c0_127, %c0_128] : memref<8x128xf32, #tpu.memory_space<vmem>>, vector<8x128xf32>
    %c0_129 = arith.constant 0 : index
    %c0_130 = arith.constant 0 : index
    %319 = vector.load %arg5[%c0_129, %c0_130] : memref<128x384xf32, #tpu.memory_space<vmem>>, vector<128x384xf32>
    %cst_131 = arith.constant dense<0.000000e+00> : vector<8x384xf32>
    %320 = tpu.matmul %318, %319, %cst_131 {dimension_numbers = #tpu.dot_dimension_numbers<[1], [0], [0], [1], [0, 0, 1, 1], [], []>} : vector<8x128xf32>, vector<128x384xf32>, vector<8x384xf32> -> vector<8x384xf32>
    %321 = vector.broadcast %12 : vector<1x384xf32> to vector<8x384xf32>
    %322 = arith.addf %320, %321 : vector<8x384xf32>
    %323 = vector.extract_strided_slice %317 {offsets = [0, 0], sizes = [8, 128], strides = [1, 1]} : vector<8x384xf32> to vector<8x128xf32>
    %324 = vector.extract_strided_slice %322 {offsets = [0, 0], sizes = [8, 128], strides = [1, 1]} : vector<8x384xf32> to vector<8x128xf32>
    %325 = arith.addf %323, %324 : vector<8x128xf32>
    %326 = arith.negf %325 : vector<8x128xf32>
    %327 = math.exp %326 : vector<8x128xf32>
    %cst_132 = arith.constant 1.000000e+00 : f32
    %328 = vector.broadcast %cst_132 : f32 to vector<8x128xf32>
    %329 = arith.addf %328, %327 : vector<8x128xf32>
    %330 = arith.divf %328, %329 : vector<8x128xf32>
    %331 = vector.extract_strided_slice %317 {offsets = [0, 128], sizes = [8, 128], strides = [1, 1]} : vector<8x384xf32> to vector<8x128xf32>
    %332 = vector.extract_strided_slice %322 {offsets = [0, 128], sizes = [8, 128], strides = [1, 1]} : vector<8x384xf32> to vector<8x128xf32>
    %333 = arith.addf %331, %332 : vector<8x128xf32>
    %334 = arith.negf %333 : vector<8x128xf32>
    %335 = math.exp %334 : vector<8x128xf32>
    %cst_133 = arith.constant 1.000000e+00 : f32
    %336 = vector.broadcast %cst_133 : f32 to vector<8x128xf32>
    %337 = arith.addf %336, %335 : vector<8x128xf32>
    %338 = arith.divf %336, %337 : vector<8x128xf32>
    %339 = vector.extract_strided_slice %317 {offsets = [0, 256], sizes = [8, 128], strides = [1, 1]} : vector<8x384xf32> to vector<8x128xf32>
    %340 = vector.extract_strided_slice %322 {offsets = [0, 256], sizes = [8, 128], strides = [1, 1]} : vector<8x384xf32> to vector<8x128xf32>
    %341 = arith.mulf %330, %340 : vector<8x128xf32>
    %342 = arith.addf %339, %341 : vector<8x128xf32>
    %343 = math.tanh %342 : vector<8x128xf32>
    %cst_134 = arith.constant 1.000000e+00 : f32
    %344 = vector.broadcast %cst_134 : f32 to vector<8x128xf32>
    %345 = arith.subf %344, %338 : vector<8x128xf32>
    %346 = arith.mulf %345, %343 : vector<8x128xf32>
    %347 = arith.mulf %338, %318 : vector<8x128xf32>
    %348 = arith.addf %346, %347 : vector<8x128xf32>
    %c0_135 = arith.constant 0 : index
    %c0_136 = arith.constant 0 : index
    %349 = vector.load %arg14[%c0_135, %c0_136] : memref<8x128xf32, #tpu.memory_space<vmem>>, vector<8x128xf32>
    %c0_137 = arith.constant 0 : index
    %c0_138 = arith.constant 0 : index
    %350 = vector.load %arg7[%c0_137, %c0_138] : memref<128x384xf32, #tpu.memory_space<vmem>>, vector<128x384xf32>
    %cst_139 = arith.constant dense<0.000000e+00> : vector<8x384xf32>
    %351 = tpu.matmul %348, %350, %cst_139 {dimension_numbers = #tpu.dot_dimension_numbers<[1], [0], [0], [1], [0, 0, 1, 1], [], []>} : vector<8x128xf32>, vector<128x384xf32>, vector<8x384xf32> -> vector<8x384xf32>
    %352 = vector.broadcast %13 : vector<1x384xf32> to vector<8x384xf32>
    %353 = arith.addf %351, %352 : vector<8x384xf32>
    %c0_140 = arith.constant 0 : index
    %c0_141 = arith.constant 0 : index
    %354 = vector.load %arg9[%c0_140, %c0_141] : memref<128x384xf32, #tpu.memory_space<vmem>>, vector<128x384xf32>
    %cst_142 = arith.constant dense<0.000000e+00> : vector<8x384xf32>
    %355 = tpu.matmul %349, %354, %cst_142 {dimension_numbers = #tpu.dot_dimension_numbers<[1], [0], [0], [1], [0, 0, 1, 1], [], []>} : vector<8x128xf32>, vector<128x384xf32>, vector<8x384xf32> -> vector<8x384xf32>
    %356 = vector.broadcast %14 : vector<1x384xf32> to vector<8x384xf32>
    %357 = arith.addf %355, %356 : vector<8x384xf32>
    %358 = vector.extract_strided_slice %353 {offsets = [0, 0], sizes = [8, 128], strides = [1, 1]} : vector<8x384xf32> to vector<8x128xf32>
    %359 = vector.extract_strided_slice %357 {offsets = [0, 0], sizes = [8, 128], strides = [1, 1]} : vector<8x384xf32> to vector<8x128xf32>
    %360 = arith.addf %358, %359 : vector<8x128xf32>
    %361 = arith.negf %360 : vector<8x128xf32>
    %362 = math.exp %361 : vector<8x128xf32>
    %cst_143 = arith.constant 1.000000e+00 : f32
    %363 = vector.broadcast %cst_143 : f32 to vector<8x128xf32>
    %364 = arith.addf %363, %362 : vector<8x128xf32>
    %365 = arith.divf %363, %364 : vector<8x128xf32>
    %366 = vector.extract_strided_slice %353 {offsets = [0, 128], sizes = [8, 128], strides = [1, 1]} : vector<8x384xf32> to vector<8x128xf32>
    %367 = vector.extract_strided_slice %357 {offsets = [0, 128], sizes = [8, 128], strides = [1, 1]} : vector<8x384xf32> to vector<8x128xf32>
    %368 = arith.addf %366, %367 : vector<8x128xf32>
    %369 = arith.negf %368 : vector<8x128xf32>
    %370 = math.exp %369 : vector<8x128xf32>
    %cst_144 = arith.constant 1.000000e+00 : f32
    %371 = vector.broadcast %cst_144 : f32 to vector<8x128xf32>
    %372 = arith.addf %371, %370 : vector<8x128xf32>
    %373 = arith.divf %371, %372 : vector<8x128xf32>
    %374 = vector.extract_strided_slice %353 {offsets = [0, 256], sizes = [8, 128], strides = [1, 1]} : vector<8x384xf32> to vector<8x128xf32>
    %375 = vector.extract_strided_slice %357 {offsets = [0, 256], sizes = [8, 128], strides = [1, 1]} : vector<8x384xf32> to vector<8x128xf32>
    %376 = arith.mulf %365, %375 : vector<8x128xf32>
    %377 = arith.addf %374, %376 : vector<8x128xf32>
    %378 = math.tanh %377 : vector<8x128xf32>
    %cst_145 = arith.constant 1.000000e+00 : f32
    %379 = vector.broadcast %cst_145 : f32 to vector<8x128xf32>
    %380 = arith.subf %379, %373 : vector<8x128xf32>
    %381 = arith.mulf %380, %378 : vector<8x128xf32>
    %382 = arith.mulf %373, %349 : vector<8x128xf32>
    %383 = arith.addf %381, %382 : vector<8x128xf32>
    %c0_146 = arith.constant 0 : index
    %c0_147 = arith.constant 0 : index
    %384 = vector.load %arg13[%c0_146, %c0_147] : memref<8x128xf32, #tpu.memory_space<vmem>>, vector<8x128xf32>
    tpu.vector_store %arg13[%c0_146, %c0_147], %348 {strides = array<i32>} : memref<8x128xf32, #tpu.memory_space<vmem>>, vector<8x128xf32>,
    %c0_148 = arith.constant 0 : index
    %c0_149 = arith.constant 0 : index
    %385 = vector.load %arg14[%c0_148, %c0_149] : memref<8x128xf32, #tpu.memory_space<vmem>>, vector<8x128xf32>
    tpu.vector_store %arg14[%c0_148, %c0_149], %383 {strides = array<i32>} : memref<8x128xf32, #tpu.memory_space<vmem>>, vector<8x128xf32>,
    %386 = arith.index_cast %c4_i32 : i32 to index
    %c0_150 = arith.constant 0 : index
    %c0_151 = arith.constant 0 : index
    %387 = vector.load %arg11[%386, %c0_150, %c0_151] : memref<8x8x128xf32, #tpu.memory_space<vmem>>, vector<1x8x128xf32>
    %388 = vector.shape_cast %387 : vector<1x8x128xf32> to vector<8x128xf32>
    %389 = vector.shape_cast %383 : vector<8x128xf32> to vector<1x8x128xf32>
    tpu.vector_store %arg11[%386, %c0_150, %c0_151], %389 {strides = array<i32>} : memref<8x8x128xf32, #tpu.memory_space<vmem>>, vector<1x8x128xf32>,
    %c5_i32 = arith.constant 5 : i32
    %390 = arith.index_cast %c5_i32 : i32 to index
    %c0_152 = arith.constant 0 : index
    %c0_153 = arith.constant 0 : index
    %391 = vector.load %arg12[%390, %c0_152, %c0_153] : memref<8x8x384xf32, #tpu.memory_space<vmem>>, vector<1x8x384xf32>
    %392 = vector.shape_cast %391 : vector<1x8x384xf32> to vector<8x384xf32>
    %c0_154 = arith.constant 0 : index
    %c0_155 = arith.constant 0 : index
    %393 = vector.load %arg13[%c0_154, %c0_155] : memref<8x128xf32, #tpu.memory_space<vmem>>, vector<8x128xf32>
    %c0_156 = arith.constant 0 : index
    %c0_157 = arith.constant 0 : index
    %394 = vector.load %arg5[%c0_156, %c0_157] : memref<128x384xf32, #tpu.memory_space<vmem>>, vector<128x384xf32>
    %cst_158 = arith.constant dense<0.000000e+00> : vector<8x384xf32>
    %395 = tpu.matmul %393, %394, %cst_158 {dimension_numbers = #tpu.dot_dimension_numbers<[1], [0], [0], [1], [0, 0, 1, 1], [], []>} : vector<8x128xf32>, vector<128x384xf32>, vector<8x384xf32> -> vector<8x384xf32>
    %396 = vector.broadcast %12 : vector<1x384xf32> to vector<8x384xf32>
    %397 = arith.addf %395, %396 : vector<8x384xf32>
    %398 = vector.extract_strided_slice %392 {offsets = [0, 0], sizes = [8, 128], strides = [1, 1]} : vector<8x384xf32> to vector<8x128xf32>
    %399 = vector.extract_strided_slice %397 {offsets = [0, 0], sizes = [8, 128], strides = [1, 1]} : vector<8x384xf32> to vector<8x128xf32>
    %400 = arith.addf %398, %399 : vector<8x128xf32>
    %401 = arith.negf %400 : vector<8x128xf32>
    %402 = math.exp %401 : vector<8x128xf32>
    %cst_159 = arith.constant 1.000000e+00 : f32
    %403 = vector.broadcast %cst_159 : f32 to vector<8x128xf32>
    %404 = arith.addf %403, %402 : vector<8x128xf32>
    %405 = arith.divf %403, %404 : vector<8x128xf32>
    %406 = vector.extract_strided_slice %392 {offsets = [0, 128], sizes = [8, 128], strides = [1, 1]} : vector<8x384xf32> to vector<8x128xf32>
    %407 = vector.extract_strided_slice %397 {offsets = [0, 128], sizes = [8, 128], strides = [1, 1]} : vector<8x384xf32> to vector<8x128xf32>
    %408 = arith.addf %406, %407 : vector<8x128xf32>
    %409 = arith.negf %408 : vector<8x128xf32>
    %410 = math.exp %409 : vector<8x128xf32>
    %cst_160 = arith.constant 1.000000e+00 : f32
    %411 = vector.broadcast %cst_160 : f32 to vector<8x128xf32>
    %412 = arith.addf %411, %410 : vector<8x128xf32>
    %413 = arith.divf %411, %412 : vector<8x128xf32>
    %414 = vector.extract_strided_slice %392 {offsets = [0, 256], sizes = [8, 128], strides = [1, 1]} : vector<8x384xf32> to vector<8x128xf32>
    %415 = vector.extract_strided_slice %397 {offsets = [0, 256], sizes = [8, 128], strides = [1, 1]} : vector<8x384xf32> to vector<8x128xf32>
    %416 = arith.mulf %405, %415 : vector<8x128xf32>
    %417 = arith.addf %414, %416 : vector<8x128xf32>
    %418 = math.tanh %417 : vector<8x128xf32>
    %cst_161 = arith.constant 1.000000e+00 : f32
    %419 = vector.broadcast %cst_161 : f32 to vector<8x128xf32>
    %420 = arith.subf %419, %413 : vector<8x128xf32>
    %421 = arith.mulf %420, %418 : vector<8x128xf32>
    %422 = arith.mulf %413, %393 : vector<8x128xf32>
    %423 = arith.addf %421, %422 : vector<8x128xf32>
    %c0_162 = arith.constant 0 : index
    %c0_163 = arith.constant 0 : index
    %424 = vector.load %arg14[%c0_162, %c0_163] : memref<8x128xf32, #tpu.memory_space<vmem>>, vector<8x128xf32>
    %c0_164 = arith.constant 0 : index
    %c0_165 = arith.constant 0 : index
    %425 = vector.load %arg7[%c0_164, %c0_165] : memref<128x384xf32, #tpu.memory_space<vmem>>, vector<128x384xf32>
    %cst_166 = arith.constant dense<0.000000e+00> : vector<8x384xf32>
    %426 = tpu.matmul %423, %425, %cst_166 {dimension_numbers = #tpu.dot_dimension_numbers<[1], [0], [0], [1], [0, 0, 1, 1], [], []>} : vector<8x128xf32>, vector<128x384xf32>, vector<8x384xf32> -> vector<8x384xf32>
    %427 = vector.broadcast %13 : vector<1x384xf32> to vector<8x384xf32>
    %428 = arith.addf %426, %427 : vector<8x384xf32>
    %c0_167 = arith.constant 0 : index
    %c0_168 = arith.constant 0 : index
    %429 = vector.load %arg9[%c0_167, %c0_168] : memref<128x384xf32, #tpu.memory_space<vmem>>, vector<128x384xf32>
    %cst_169 = arith.constant dense<0.000000e+00> : vector<8x384xf32>
    %430 = tpu.matmul %424, %429, %cst_169 {dimension_numbers = #tpu.dot_dimension_numbers<[1], [0], [0], [1], [0, 0, 1, 1], [], []>} : vector<8x128xf32>, vector<128x384xf32>, vector<8x384xf32> -> vector<8x384xf32>
    %431 = vector.broadcast %14 : vector<1x384xf32> to vector<8x384xf32>
    %432 = arith.addf %430, %431 : vector<8x384xf32>
    %433 = vector.extract_strided_slice %428 {offsets = [0, 0], sizes = [8, 128], strides = [1, 1]} : vector<8x384xf32> to vector<8x128xf32>
    %434 = vector.extract_strided_slice %432 {offsets = [0, 0], sizes = [8, 128], strides = [1, 1]} : vector<8x384xf32> to vector<8x128xf32>
    %435 = arith.addf %433, %434 : vector<8x128xf32>
    %436 = arith.negf %435 : vector<8x128xf32>
    %437 = math.exp %436 : vector<8x128xf32>
    %cst_170 = arith.constant 1.000000e+00 : f32
    %438 = vector.broadcast %cst_170 : f32 to vector<8x128xf32>
    %439 = arith.addf %438, %437 : vector<8x128xf32>
    %440 = arith.divf %438, %439 : vector<8x128xf32>
    %441 = vector.extract_strided_slice %428 {offsets = [0, 128], sizes = [8, 128], strides = [1, 1]} : vector<8x384xf32> to vector<8x128xf32>
    %442 = vector.extract_strided_slice %432 {offsets = [0, 128], sizes = [8, 128], strides = [1, 1]} : vector<8x384xf32> to vector<8x128xf32>
    %443 = arith.addf %441, %442 : vector<8x128xf32>
    %444 = arith.negf %443 : vector<8x128xf32>
    %445 = math.exp %444 : vector<8x128xf32>
    %cst_171 = arith.constant 1.000000e+00 : f32
    %446 = vector.broadcast %cst_171 : f32 to vector<8x128xf32>
    %447 = arith.addf %446, %445 : vector<8x128xf32>
    %448 = arith.divf %446, %447 : vector<8x128xf32>
    %449 = vector.extract_strided_slice %428 {offsets = [0, 256], sizes = [8, 128], strides = [1, 1]} : vector<8x384xf32> to vector<8x128xf32>
    %450 = vector.extract_strided_slice %432 {offsets = [0, 256], sizes = [8, 128], strides = [1, 1]} : vector<8x384xf32> to vector<8x128xf32>
    %451 = arith.mulf %440, %450 : vector<8x128xf32>
    %452 = arith.addf %449, %451 : vector<8x128xf32>
    %453 = math.tanh %452 : vector<8x128xf32>
    %cst_172 = arith.constant 1.000000e+00 : f32
    %454 = vector.broadcast %cst_172 : f32 to vector<8x128xf32>
    %455 = arith.subf %454, %448 : vector<8x128xf32>
    %456 = arith.mulf %455, %453 : vector<8x128xf32>
    %457 = arith.mulf %448, %424 : vector<8x128xf32>
    %458 = arith.addf %456, %457 : vector<8x128xf32>
    %c0_173 = arith.constant 0 : index
    %c0_174 = arith.constant 0 : index
    %459 = vector.load %arg13[%c0_173, %c0_174] : memref<8x128xf32, #tpu.memory_space<vmem>>, vector<8x128xf32>
    tpu.vector_store %arg13[%c0_173, %c0_174], %423 {strides = array<i32>} : memref<8x128xf32, #tpu.memory_space<vmem>>, vector<8x128xf32>,
    %c0_175 = arith.constant 0 : index
    %c0_176 = arith.constant 0 : index
    %460 = vector.load %arg14[%c0_175, %c0_176] : memref<8x128xf32, #tpu.memory_space<vmem>>, vector<8x128xf32>
    tpu.vector_store %arg14[%c0_175, %c0_176], %458 {strides = array<i32>} : memref<8x128xf32, #tpu.memory_space<vmem>>, vector<8x128xf32>,
    %461 = arith.index_cast %c5_i32 : i32 to index
    %c0_177 = arith.constant 0 : index
    %c0_178 = arith.constant 0 : index
    %462 = vector.load %arg11[%461, %c0_177, %c0_178] : memref<8x8x128xf32, #tpu.memory_space<vmem>>, vector<1x8x128xf32>
    %463 = vector.shape_cast %462 : vector<1x8x128xf32> to vector<8x128xf32>
    %464 = vector.shape_cast %458 : vector<8x128xf32> to vector<1x8x128xf32>
    tpu.vector_store %arg11[%461, %c0_177, %c0_178], %464 {strides = array<i32>} : memref<8x8x128xf32, #tpu.memory_space<vmem>>, vector<1x8x128xf32>,
    %c6_i32 = arith.constant 6 : i32
    %465 = arith.index_cast %c6_i32 : i32 to index
    %c0_179 = arith.constant 0 : index
    %c0_180 = arith.constant 0 : index
    %466 = vector.load %arg12[%465, %c0_179, %c0_180] : memref<8x8x384xf32, #tpu.memory_space<vmem>>, vector<1x8x384xf32>
    %467 = vector.shape_cast %466 : vector<1x8x384xf32> to vector<8x384xf32>
    %c0_181 = arith.constant 0 : index
    %c0_182 = arith.constant 0 : index
    %468 = vector.load %arg13[%c0_181, %c0_182] : memref<8x128xf32, #tpu.memory_space<vmem>>, vector<8x128xf32>
    %c0_183 = arith.constant 0 : index
    %c0_184 = arith.constant 0 : index
    %469 = vector.load %arg5[%c0_183, %c0_184] : memref<128x384xf32, #tpu.memory_space<vmem>>, vector<128x384xf32>
    %cst_185 = arith.constant dense<0.000000e+00> : vector<8x384xf32>
    %470 = tpu.matmul %468, %469, %cst_185 {dimension_numbers = #tpu.dot_dimension_numbers<[1], [0], [0], [1], [0, 0, 1, 1], [], []>} : vector<8x128xf32>, vector<128x384xf32>, vector<8x384xf32> -> vector<8x384xf32>
    %471 = vector.broadcast %12 : vector<1x384xf32> to vector<8x384xf32>
    %472 = arith.addf %470, %471 : vector<8x384xf32>
    %473 = vector.extract_strided_slice %467 {offsets = [0, 0], sizes = [8, 128], strides = [1, 1]} : vector<8x384xf32> to vector<8x128xf32>
    %474 = vector.extract_strided_slice %472 {offsets = [0, 0], sizes = [8, 128], strides = [1, 1]} : vector<8x384xf32> to vector<8x128xf32>
    %475 = arith.addf %473, %474 : vector<8x128xf32>
    %476 = arith.negf %475 : vector<8x128xf32>
    %477 = math.exp %476 : vector<8x128xf32>
    %cst_186 = arith.constant 1.000000e+00 : f32
    %478 = vector.broadcast %cst_186 : f32 to vector<8x128xf32>
    %479 = arith.addf %478, %477 : vector<8x128xf32>
    %480 = arith.divf %478, %479 : vector<8x128xf32>
    %481 = vector.extract_strided_slice %467 {offsets = [0, 128], sizes = [8, 128], strides = [1, 1]} : vector<8x384xf32> to vector<8x128xf32>
    %482 = vector.extract_strided_slice %472 {offsets = [0, 128], sizes = [8, 128], strides = [1, 1]} : vector<8x384xf32> to vector<8x128xf32>
    %483 = arith.addf %481, %482 : vector<8x128xf32>
    %484 = arith.negf %483 : vector<8x128xf32>
    %485 = math.exp %484 : vector<8x128xf32>
    %cst_187 = arith.constant 1.000000e+00 : f32
    %486 = vector.broadcast %cst_187 : f32 to vector<8x128xf32>
    %487 = arith.addf %486, %485 : vector<8x128xf32>
    %488 = arith.divf %486, %487 : vector<8x128xf32>
    %489 = vector.extract_strided_slice %467 {offsets = [0, 256], sizes = [8, 128], strides = [1, 1]} : vector<8x384xf32> to vector<8x128xf32>
    %490 = vector.extract_strided_slice %472 {offsets = [0, 256], sizes = [8, 128], strides = [1, 1]} : vector<8x384xf32> to vector<8x128xf32>
    %491 = arith.mulf %480, %490 : vector<8x128xf32>
    %492 = arith.addf %489, %491 : vector<8x128xf32>
    %493 = math.tanh %492 : vector<8x128xf32>
    %cst_188 = arith.constant 1.000000e+00 : f32
    %494 = vector.broadcast %cst_188 : f32 to vector<8x128xf32>
    %495 = arith.subf %494, %488 : vector<8x128xf32>
    %496 = arith.mulf %495, %493 : vector<8x128xf32>
    %497 = arith.mulf %488, %468 : vector<8x128xf32>
    %498 = arith.addf %496, %497 : vector<8x128xf32>
    %c0_189 = arith.constant 0 : index
    %c0_190 = arith.constant 0 : index
    %499 = vector.load %arg14[%c0_189, %c0_190] : memref<8x128xf32, #tpu.memory_space<vmem>>, vector<8x128xf32>
    %c0_191 = arith.constant 0 : index
    %c0_192 = arith.constant 0 : index
    %500 = vector.load %arg7[%c0_191, %c0_192] : memref<128x384xf32, #tpu.memory_space<vmem>>, vector<128x384xf32>
    %cst_193 = arith.constant dense<0.000000e+00> : vector<8x384xf32>
    %501 = tpu.matmul %498, %500, %cst_193 {dimension_numbers = #tpu.dot_dimension_numbers<[1], [0], [0], [1], [0, 0, 1, 1], [], []>} : vector<8x128xf32>, vector<128x384xf32>, vector<8x384xf32> -> vector<8x384xf32>
    %502 = vector.broadcast %13 : vector<1x384xf32> to vector<8x384xf32>
    %503 = arith.addf %501, %502 : vector<8x384xf32>
    %c0_194 = arith.constant 0 : index
    %c0_195 = arith.constant 0 : index
    %504 = vector.load %arg9[%c0_194, %c0_195] : memref<128x384xf32, #tpu.memory_space<vmem>>, vector<128x384xf32>
    %cst_196 = arith.constant dense<0.000000e+00> : vector<8x384xf32>
    %505 = tpu.matmul %499, %504, %cst_196 {dimension_numbers = #tpu.dot_dimension_numbers<[1], [0], [0], [1], [0, 0, 1, 1], [], []>} : vector<8x128xf32>, vector<128x384xf32>, vector<8x384xf32> -> vector<8x384xf32>
    %506 = vector.broadcast %14 : vector<1x384xf32> to vector<8x384xf32>
    %507 = arith.addf %505, %506 : vector<8x384xf32>
    %508 = vector.extract_strided_slice %503 {offsets = [0, 0], sizes = [8, 128], strides = [1, 1]} : vector<8x384xf32> to vector<8x128xf32>
    %509 = vector.extract_strided_slice %507 {offsets = [0, 0], sizes = [8, 128], strides = [1, 1]} : vector<8x384xf32> to vector<8x128xf32>
    %510 = arith.addf %508, %509 : vector<8x128xf32>
    %511 = arith.negf %510 : vector<8x128xf32>
    %512 = math.exp %511 : vector<8x128xf32>
    %cst_197 = arith.constant 1.000000e+00 : f32
    %513 = vector.broadcast %cst_197 : f32 to vector<8x128xf32>
    %514 = arith.addf %513, %512 : vector<8x128xf32>
    %515 = arith.divf %513, %514 : vector<8x128xf32>
    %516 = vector.extract_strided_slice %503 {offsets = [0, 128], sizes = [8, 128], strides = [1, 1]} : vector<8x384xf32> to vector<8x128xf32>
    %517 = vector.extract_strided_slice %507 {offsets = [0, 128], sizes = [8, 128], strides = [1, 1]} : vector<8x384xf32> to vector<8x128xf32>
    %518 = arith.addf %516, %517 : vector<8x128xf32>
    %519 = arith.negf %518 : vector<8x128xf32>
    %520 = math.exp %519 : vector<8x128xf32>
    %cst_198 = arith.constant 1.000000e+00 : f32
    %521 = vector.broadcast %cst_198 : f32 to vector<8x128xf32>
    %522 = arith.addf %521, %520 : vector<8x128xf32>
    %523 = arith.divf %521, %522 : vector<8x128xf32>
    %524 = vector.extract_strided_slice %503 {offsets = [0, 256], sizes = [8, 128], strides = [1, 1]} : vector<8x384xf32> to vector<8x128xf32>
    %525 = vector.extract_strided_slice %507 {offsets = [0, 256], sizes = [8, 128], strides = [1, 1]} : vector<8x384xf32> to vector<8x128xf32>
    %526 = arith.mulf %515, %525 : vector<8x128xf32>
    %527 = arith.addf %524, %526 : vector<8x128xf32>
    %528 = math.tanh %527 : vector<8x128xf32>
    %cst_199 = arith.constant 1.000000e+00 : f32
    %529 = vector.broadcast %cst_199 : f32 to vector<8x128xf32>
    %530 = arith.subf %529, %523 : vector<8x128xf32>
    %531 = arith.mulf %530, %528 : vector<8x128xf32>
    %532 = arith.mulf %523, %499 : vector<8x128xf32>
    %533 = arith.addf %531, %532 : vector<8x128xf32>
    %c0_200 = arith.constant 0 : index
    %c0_201 = arith.constant 0 : index
    %534 = vector.load %arg13[%c0_200, %c0_201] : memref<8x128xf32, #tpu.memory_space<vmem>>, vector<8x128xf32>
    tpu.vector_store %arg13[%c0_200, %c0_201], %498 {strides = array<i32>} : memref<8x128xf32, #tpu.memory_space<vmem>>, vector<8x128xf32>,
    %c0_202 = arith.constant 0 : index
    %c0_203 = arith.constant 0 : index
    %535 = vector.load %arg14[%c0_202, %c0_203] : memref<8x128xf32, #tpu.memory_space<vmem>>, vector<8x128xf32>
    tpu.vector_store %arg14[%c0_202, %c0_203], %533 {strides = array<i32>} : memref<8x128xf32, #tpu.memory_space<vmem>>, vector<8x128xf32>,
    %536 = arith.index_cast %c6_i32 : i32 to index
    %c0_204 = arith.constant 0 : index
    %c0_205 = arith.constant 0 : index
    %537 = vector.load %arg11[%536, %c0_204, %c0_205] : memref<8x8x128xf32, #tpu.memory_space<vmem>>, vector<1x8x128xf32>
    %538 = vector.shape_cast %537 : vector<1x8x128xf32> to vector<8x128xf32>
    %539 = vector.shape_cast %533 : vector<8x128xf32> to vector<1x8x128xf32>
    tpu.vector_store %arg11[%536, %c0_204, %c0_205], %539 {strides = array<i32>} : memref<8x8x128xf32, #tpu.memory_space<vmem>>, vector<1x8x128xf32>,
    %c7_i32 = arith.constant 7 : i32
    %540 = arith.index_cast %c7_i32 : i32 to index
    %c0_206 = arith.constant 0 : index
    %c0_207 = arith.constant 0 : index
    %541 = vector.load %arg12[%540, %c0_206, %c0_207] : memref<8x8x384xf32, #tpu.memory_space<vmem>>, vector<1x8x384xf32>
    %542 = vector.shape_cast %541 : vector<1x8x384xf32> to vector<8x384xf32>
    %c0_208 = arith.constant 0 : index
    %c0_209 = arith.constant 0 : index
    %543 = vector.load %arg13[%c0_208, %c0_209] : memref<8x128xf32, #tpu.memory_space<vmem>>, vector<8x128xf32>
    %c0_210 = arith.constant 0 : index
    %c0_211 = arith.constant 0 : index
    %544 = vector.load %arg5[%c0_210, %c0_211] : memref<128x384xf32, #tpu.memory_space<vmem>>, vector<128x384xf32>
    %cst_212 = arith.constant dense<0.000000e+00> : vector<8x384xf32>
    %545 = tpu.matmul %543, %544, %cst_212 {dimension_numbers = #tpu.dot_dimension_numbers<[1], [0], [0], [1], [0, 0, 1, 1], [], []>} : vector<8x128xf32>, vector<128x384xf32>, vector<8x384xf32> -> vector<8x384xf32>
    %546 = vector.broadcast %12 : vector<1x384xf32> to vector<8x384xf32>
    %547 = arith.addf %545, %546 : vector<8x384xf32>
    %548 = vector.extract_strided_slice %542 {offsets = [0, 0], sizes = [8, 128], strides = [1, 1]} : vector<8x384xf32> to vector<8x128xf32>
    %549 = vector.extract_strided_slice %547 {offsets = [0, 0], sizes = [8, 128], strides = [1, 1]} : vector<8x384xf32> to vector<8x128xf32>
    %550 = arith.addf %548, %549 : vector<8x128xf32>
    %551 = arith.negf %550 : vector<8x128xf32>
    %552 = math.exp %551 : vector<8x128xf32>
    %cst_213 = arith.constant 1.000000e+00 : f32
    %553 = vector.broadcast %cst_213 : f32 to vector<8x128xf32>
    %554 = arith.addf %553, %552 : vector<8x128xf32>
    %555 = arith.divf %553, %554 : vector<8x128xf32>
    %556 = vector.extract_strided_slice %542 {offsets = [0, 128], sizes = [8, 128], strides = [1, 1]} : vector<8x384xf32> to vector<8x128xf32>
    %557 = vector.extract_strided_slice %547 {offsets = [0, 128], sizes = [8, 128], strides = [1, 1]} : vector<8x384xf32> to vector<8x128xf32>
    %558 = arith.addf %556, %557 : vector<8x128xf32>
    %559 = arith.negf %558 : vector<8x128xf32>
    %560 = math.exp %559 : vector<8x128xf32>
    %cst_214 = arith.constant 1.000000e+00 : f32
    %561 = vector.broadcast %cst_214 : f32 to vector<8x128xf32>
    %562 = arith.addf %561, %560 : vector<8x128xf32>
    %563 = arith.divf %561, %562 : vector<8x128xf32>
    %564 = vector.extract_strided_slice %542 {offsets = [0, 256], sizes = [8, 128], strides = [1, 1]} : vector<8x384xf32> to vector<8x128xf32>
    %565 = vector.extract_strided_slice %547 {offsets = [0, 256], sizes = [8, 128], strides = [1, 1]} : vector<8x384xf32> to vector<8x128xf32>
    %566 = arith.mulf %555, %565 : vector<8x128xf32>
    %567 = arith.addf %564, %566 : vector<8x128xf32>
    %568 = math.tanh %567 : vector<8x128xf32>
    %cst_215 = arith.constant 1.000000e+00 : f32
    %569 = vector.broadcast %cst_215 : f32 to vector<8x128xf32>
    %570 = arith.subf %569, %563 : vector<8x128xf32>
    %571 = arith.mulf %570, %568 : vector<8x128xf32>
    %572 = arith.mulf %563, %543 : vector<8x128xf32>
    %573 = arith.addf %571, %572 : vector<8x128xf32>
    %c0_216 = arith.constant 0 : index
    %c0_217 = arith.constant 0 : index
    %574 = vector.load %arg14[%c0_216, %c0_217] : memref<8x128xf32, #tpu.memory_space<vmem>>, vector<8x128xf32>
    %c0_218 = arith.constant 0 : index
    %c0_219 = arith.constant 0 : index
    %575 = vector.load %arg7[%c0_218, %c0_219] : memref<128x384xf32, #tpu.memory_space<vmem>>, vector<128x384xf32>
    %cst_220 = arith.constant dense<0.000000e+00> : vector<8x384xf32>
    %576 = tpu.matmul %573, %575, %cst_220 {dimension_numbers = #tpu.dot_dimension_numbers<[1], [0], [0], [1], [0, 0, 1, 1], [], []>} : vector<8x128xf32>, vector<128x384xf32>, vector<8x384xf32> -> vector<8x384xf32>
    %577 = vector.broadcast %13 : vector<1x384xf32> to vector<8x384xf32>
    %578 = arith.addf %576, %577 : vector<8x384xf32>
    %c0_221 = arith.constant 0 : index
    %c0_222 = arith.constant 0 : index
    %579 = vector.load %arg9[%c0_221, %c0_222] : memref<128x384xf32, #tpu.memory_space<vmem>>, vector<128x384xf32>
    %cst_223 = arith.constant dense<0.000000e+00> : vector<8x384xf32>
    %580 = tpu.matmul %574, %579, %cst_223 {dimension_numbers = #tpu.dot_dimension_numbers<[1], [0], [0], [1], [0, 0, 1, 1], [], []>} : vector<8x128xf32>, vector<128x384xf32>, vector<8x384xf32> -> vector<8x384xf32>
    %581 = vector.broadcast %14 : vector<1x384xf32> to vector<8x384xf32>
    %582 = arith.addf %580, %581 : vector<8x384xf32>
    %583 = vector.extract_strided_slice %578 {offsets = [0, 0], sizes = [8, 128], strides = [1, 1]} : vector<8x384xf32> to vector<8x128xf32>
    %584 = vector.extract_strided_slice %582 {offsets = [0, 0], sizes = [8, 128], strides = [1, 1]} : vector<8x384xf32> to vector<8x128xf32>
    %585 = arith.addf %583, %584 : vector<8x128xf32>
    %586 = arith.negf %585 : vector<8x128xf32>
    %587 = math.exp %586 : vector<8x128xf32>
    %cst_224 = arith.constant 1.000000e+00 : f32
    %588 = vector.broadcast %cst_224 : f32 to vector<8x128xf32>
    %589 = arith.addf %588, %587 : vector<8x128xf32>
    %590 = arith.divf %588, %589 : vector<8x128xf32>
    %591 = vector.extract_strided_slice %578 {offsets = [0, 128], sizes = [8, 128], strides = [1, 1]} : vector<8x384xf32> to vector<8x128xf32>
    %592 = vector.extract_strided_slice %582 {offsets = [0, 128], sizes = [8, 128], strides = [1, 1]} : vector<8x384xf32> to vector<8x128xf32>
    %593 = arith.addf %591, %592 : vector<8x128xf32>
    %594 = arith.negf %593 : vector<8x128xf32>
    %595 = math.exp %594 : vector<8x128xf32>
    %cst_225 = arith.constant 1.000000e+00 : f32
    %596 = vector.broadcast %cst_225 : f32 to vector<8x128xf32>
    %597 = arith.addf %596, %595 : vector<8x128xf32>
    %598 = arith.divf %596, %597 : vector<8x128xf32>
    %599 = vector.extract_strided_slice %578 {offsets = [0, 256], sizes = [8, 128], strides = [1, 1]} : vector<8x384xf32> to vector<8x128xf32>
    %600 = vector.extract_strided_slice %582 {offsets = [0, 256], sizes = [8, 128], strides = [1, 1]} : vector<8x384xf32> to vector<8x128xf32>
    %601 = arith.mulf %590, %600 : vector<8x128xf32>
    %602 = arith.addf %599, %601 : vector<8x128xf32>
    %603 = math.tanh %602 : vector<8x128xf32>
    %cst_226 = arith.constant 1.000000e+00 : f32
    %604 = vector.broadcast %cst_226 : f32 to vector<8x128xf32>
    %605 = arith.subf %604, %598 : vector<8x128xf32>
    %606 = arith.mulf %605, %603 : vector<8x128xf32>
    %607 = arith.mulf %598, %574 : vector<8x128xf32>
    %608 = arith.addf %606, %607 : vector<8x128xf32>
    %c0_227 = arith.constant 0 : index
    %c0_228 = arith.constant 0 : index
    %609 = vector.load %arg13[%c0_227, %c0_228] : memref<8x128xf32, #tpu.memory_space<vmem>>, vector<8x128xf32>
    tpu.vector_store %arg13[%c0_227, %c0_228], %573 {strides = array<i32>} : memref<8x128xf32, #tpu.memory_space<vmem>>, vector<8x128xf32>,
    %c0_229 = arith.constant 0 : index
    %c0_230 = arith.constant 0 : index
    %610 = vector.load %arg14[%c0_229, %c0_230] : memref<8x128xf32, #tpu.memory_space<vmem>>, vector<8x128xf32>
    tpu.vector_store %arg14[%c0_229, %c0_230], %608 {strides = array<i32>} : memref<8x128xf32, #tpu.memory_space<vmem>>, vector<8x128xf32>,
    %611 = arith.index_cast %c7_i32 : i32 to index
    %c0_231 = arith.constant 0 : index
    %c0_232 = arith.constant 0 : index
    %612 = vector.load %arg11[%611, %c0_231, %c0_232] : memref<8x8x128xf32, #tpu.memory_space<vmem>>, vector<1x8x128xf32>
    %613 = vector.shape_cast %612 : vector<1x8x128xf32> to vector<8x128xf32>
    %614 = vector.shape_cast %608 : vector<8x128xf32> to vector<1x8x128xf32>
    tpu.vector_store %arg11[%611, %c0_231, %c0_232], %614 {strides = array<i32>} : memref<8x8x128xf32, #tpu.memory_space<vmem>>, vector<1x8x128xf32>,
    %c8_i32 = arith.constant 8 : i32
    return
  }
  func.func @transform_0(%arg0: i32, %arg1: i32) -> (i32, i32, i32) {
    %c0_i32 = arith.constant 0 : i32
    %c0_i32_0 = arith.constant 0 : i32
    return %arg1, %arg0, %c0_i32 : i32, i32, i32
  }
  func.func @transform_1(%arg0: i32, %arg1: i32) -> (i32, i32) {
    %c0_i32 = arith.constant 0 : i32
    %c0_i32_0 = arith.constant 0 : i32
    %c0_i32_1 = arith.constant 0 : i32
    return %c0_i32, %c0_i32_0 : i32, i32
  }
  func.func @transform_2(%arg0: i32, %arg1: i32) -> (i32, i32) {
    %c0_i32 = arith.constant 0 : i32
    %c0_i32_0 = arith.constant 0 : i32
    %c0_i32_1 = arith.constant 0 : i32
    return %c0_i32, %c0_i32_0 : i32, i32
  }
  func.func @transform_3(%arg0: i32, %arg1: i32) -> (i32, i32) {
    %c0_i32 = arith.constant 0 : i32
    %c0_i32_0 = arith.constant 0 : i32
    %c0_i32_1 = arith.constant 0 : i32
    return %c0_i32, %c0_i32_0 : i32, i32
  }
  func.func @transform_4(%arg0: i32, %arg1: i32) -> (i32, i32) {
    %c0_i32 = arith.constant 0 : i32
    %c0_i32_0 = arith.constant 0 : i32
    %c0_i32_1 = arith.constant 0 : i32
    return %c0_i32, %c0_i32_0 : i32, i32
  }
  func.func @transform_5(%arg0: i32, %arg1: i32) -> (i32, i32) {
    %c0_i32 = arith.constant 0 : i32
    %c0_i32_0 = arith.constant 0 : i32
    %c0_i32_1 = arith.constant 0 : i32
    return %c0_i32, %c0_i32_0 : i32, i32
  }
  func.func @transform_6(%arg0: i32, %arg1: i32) -> (i32, i32) {
    %c0_i32 = arith.constant 0 : i32
    %c0_i32_0 = arith.constant 0 : i32
    %c0_i32_1 = arith.constant 0 : i32
    return %c0_i32, %c0_i32_0 : i32, i32
  }
  func.func @transform_7(%arg0: i32, %arg1: i32) -> (i32, i32) {
    %c0_i32 = arith.constant 0 : i32
    %c0_i32_0 = arith.constant 0 : i32
    %c0_i32_1 = arith.constant 0 : i32
    return %c0_i32, %c0_i32_0 : i32, i32
  }
  func.func @transform_8(%arg0: i32, %arg1: i32) -> (i32, i32) {
    %c0_i32 = arith.constant 0 : i32
    %c0_i32_0 = arith.constant 0 : i32
    %c0_i32_1 = arith.constant 0 : i32
    return %c0_i32, %c0_i32_0 : i32, i32
  }
  func.func @transform_9(%arg0: i32, %arg1: i32) -> (i32, i32, i32) {
    %c0_i32 = arith.constant 0 : i32
    %c0_i32_0 = arith.constant 0 : i32
    return %arg1, %arg0, %c0_i32 : i32, i32, i32
  }
}

</mosaic_0001>

<bundles_post_ra>
// kernel: seq_model_forward.1
= control target key start
LH: loop header
LB: loop body
LE: loop exit
PB: predicated region body
PF: predicated region fallthrough
CT: control target
= control target key end

     0   :  { %s8904_s30 = smov 0   ;;  %s8906_s10 = smov 0   ;;  %s12479_s0 = inlined_call_operand.vmem [shape: f32[16,8,128], index: 0, kind: input, shape index: {}]   ;;  %s12480_s1 = inlined_call_operand.vmem [shape: f32[128,384], index: 1, kind: input, shape index: {}]   ;;  %s12481_s2 = inlined_call_operand.vmem [shape: f32[1,384], index: 2, kind: input, shape index: {}]   ;;  %s12482_s3 = inlined_call_operand.vmem [shape: f32[128,384], index: 3, kind: input, shape index: {}]   ;;  %s12483_s4 = inlined_call_operand.vmem [shape: f32[1,384], index: 4, kind: input, shape index: {}]   ;;  %s12484_s5 = inlined_call_operand.vmem [shape: f32[128,384], index: 5, kind: input, shape index: {}]   ;;  %s12485_s6 = inlined_call_operand.vmem [shape: f32[1,384], index: 6, kind: input, shape index: {}]   ;;  %s12486_s7 = inlined_call_operand.vmem [shape: f32[128,384], index: 7, kind: input, shape index: {}]   ;;  %s12487_s8 = inlined_call_operand.vmem [shape: f32[1,384], index: 8, kind: input, shape index: {}]   ;;  %s12488_s9 = inlined_call_operand.vmem [shape: f32[16,8,128], index: 9, kind: output, shape index: {}]  }
   0x1   :  { %s8908_s11 = smov 0  }
   0x2 LB: > { %s28_s12 = sadd.s32 1, %s8844_s10  ;;  %p5771_p0 = scmp.ge.s32.totalorder %s8848_s11, 1  ;;  %s8848_s11 = sphi %s8908_s11, %s19_s11   ;;  %s8844_s10 = sphi %s8906_s10, %s12805_s10   ;;  %s8840_s30 = sphi %s8904_s30, %s12804_s30  }
   0x3   : > { %p29_p1 = scmp.ge.s32.totalorder %s28_s12, 2  ;;  %p307_p2 = scmp.lt.s32.totalorder %s8848_s11, 3 }
   0x5   : > { %s12807_s12 = smov (%p29_p1, %s28_s12), 0  ;;  %p308_p3 = pnand %p5771_p0, %p307_p2 }
   0x7   : > { %311 = sbr.rel (%p308_p3) target bundleno = 2902 (0xb56), region = 56 }
   0xe   : > { %s5772_s13 = sshll.u32 %s8840_s30, 3  ;;  %p5776_p5 = scmp.ne.s32.totalorder %s8840_s30, 0 }
   0xf   : > { %p350_p4 = scmp.lt.s32.totalorder %s5772_s13, 15  ;;  %v8850_v0 = vmov (!%p5776_p5), 0.0  }
  0x10   : > { %370 = sbr.rel (%p5776_p5) target bundleno = 23 (0x17), region = 60  ;;  %371 = vst [vmem:[#allocation3] sm:$0xff] (!%p5776_p5), %v8850_v0  ;;  %372 = vst [vmem:[#allocation4] sm:$0xff] (!%p5776_p5), %v8850_v0 }
  0x11   : > { %s12809_s13 = smov (!%p350_p4, %s5772_s13), 15 }
  0x12   : > { %s5773_s14 = sshll.u32 %s12809_s13, 3 }
  0x13   : > { %s8925_s17 = scalar_lea.vmem %s12479_s0, %s5773_s14  ;;  %s8930_s20 = scalar_lea.vmem %s12488_s9, %s5773_s14 }
  0x17 PF: > { %v382_v1 = vld [vmem:[%s12480_s1 + $0x8] sm:$0xff]  ;;  %v385_v2 = vld [vmem:[%s12480_s1 + $0x20] sm:$0xff]  ;;  %v384_v5 = vld [vmem:[%s12480_s1 + $0x18] sm:$0xff]  ;;  %v12489_v8 = vmov 0.0   ;;  %vm8853_vm0 = vmmov 0  }
  0x18   : > { %v381_v3 = vld [vmem:[%s12480_s1] sm:$0xff]  ;;  %v7134_v4 = vpack.c.bf16 %v385_v2, %v382_v1  ;;  %v388_v6 = vld [vmem:[%s12480_s1 + $0x38] sm:$0xff]  ;;  %v391_v7 = vld [vmem:[%s12480_s1 + $0x50] sm:$0xff]  ;;  %510 = vmatprep.mubr.f32.mxu0 %v12489_v8 }
  0x19   : > { %v7136_v9 = vpack.c.bf16 %v384_v5, %v381_v3  ;;  %v7138_v10 = vpack.c.bf16 %v391_v7, %v388_v6  ;;  %v387_v11 = vld [vmem:[%s12480_s1 + $0x30] sm:$0xff]  ;;  %v390_v12 = vld [vmem:[%s12480_s1 + $0x48] sm:$0xff]  ;;  %v397_v14 = vld [vmem:[%s12480_s1 + $0x80] sm:$0xff] }
  0x1a   : > { %v394_v13 = vld [vmem:[%s12480_s1 + $0x68] sm:$0xff]  ;;  %7135 = vmatprep.subr.bf16.mxu0 %v7134_v4  ;;  %v7140_v15 = vpack.c.bf16 %v390_v12, %v387_v11  ;;  %v393_v17 = vld [vmem:[%s12480_s1 + $0x60] sm:$0xff]  ;;  %v396_v18 = vld [vmem:[%s12480_s1 + $0x78] sm:$0xff] }
  0x1b   : > { %7137 = vmatpush1.bf16.msra.mxu0 %v7136_v9  ;;  %v7142_v16 = vpack.c.bf16 %v397_v14, %v394_v13  ;;  %v400_v19 = vld [vmem:[%s12480_s1 + $0x98] sm:$0xff]  ;;  %v403_v20 = vld [vmem:[%s12480_s1 + $0xb0] sm:$0xff]  ;;  %v7144_v21 = vpack.c.bf16 %v396_v18, %v393_v17  ;;  %v402_v24 = vld [vmem:[%s12480_s1 + $0xa8] sm:$0xff] }
  0x1c   : > { %7139 = vmatprep.subr.bf16.mxu0 %v7138_v10  ;;  %v399_v22 = vld [vmem:[%s12480_s1 + $0x90] sm:$0xff]  ;;  %v7146_v23 = vpack.c.bf16 %v403_v20, %v400_v19  ;;  %v386_v26 = vld [vmem:[%s12480_s1 + $0x28] sm:$0xff]  ;;  %v409_v28 = vld [vmem:[%s12480_s1 + $0xe0] sm:$0xff] }
  0x1d   : > { %v383_v25 = vld [vmem:[%s12480_s1 + $0x10] sm:$0xff]  ;;  %v406_v27 = vld [vmem:[%s12480_s1 + $0xc8] sm:$0xff]  ;;  %v389_v30 = vld [vmem:[%s12480_s1 + $0x40] sm:$0xff]  ;;  %v7148_v32 = vpack.c.bf16 %v402_v24, %v399_v22 }
  0x1e   : > { %v7166_v29 = vpack.c.bf16 %v386_v26, %v383_v25  ;;  %v392_v31 = vld [vmem:[%s12480_s1 + $0x58] sm:$0xff]  ;;  %v405_v33 = vld [vmem:[%s12480_s1 + $0xc0] sm:$0xff]  ;;  %v7150_v35 = vpack.c.bf16 %v409_v28, %v406_v27  ;;  %v395_v38 = vld [vmem:[%s12480_s1 + $0x70] sm:$0xff] }
  0x1f   : > { %7141 = vmatpush1.bf16.msra.mxu0 %v7140_v15  ;;  %v7170_v34 = vpack.c.bf16 %v392_v31, %v389_v30  ;;  %v408_v36 = vld [vmem:[%s12480_s1 + $0xd8] sm:$0xff]  ;;  %v9006_v37 = vld [vmem:[%s8925_s17] sm:$0xff]  ;;  %v415_v40 = vld [vmem:[%s12480_s1 + $0x110] sm:$0xff] }
  0x20   : > { %7143 = vmatprep.subr.bf16.mxu0 %v7142_v16  ;;  %7167 = vmatprep.subr.bf16.mxu1 %v7166_v29  ;;  %v412_v39 = vld [vmem:[%s12480_s1 + $0xf8] sm:$0xff]  ;;  %v398_v41 = vld [vmem:[%s12480_s1 + $0x88] sm:$0xff]  ;;  %v7152_v43 = vpack.c.bf16 %v408_v36, %v405_v33  ;;  %v401_v44 = vld [vmem:[%s12480_s1 + $0xa0] sm:$0xff] }
  0x21   : > { %7169 = vmatpush3.bf16.msra.mxu1 %v7166_v29  ;;  %6282 = vmatprep.mubr.f32.mxu1 %v9006_v37  ;;  %v7174_v42 = vpack.c.bf16 %v398_v41, %v395_v38  ;;  %v404_v45 = vld [vmem:[%s12480_s1 + $0xb8] sm:$0xff]  ;;  %v7154_v46 = vpack.c.bf16 %v415_v40, %v412_v39  ;;  %v411_v47 = vld [vmem:[%s12480_s1 + $0xf0] sm:$0xff]  ;;  %v414_v48 = vld [vmem:[%s12480_s1 + $0x108] sm:$0xff]  ;;  %v12491_v41 = vmov 0.0|0.0  }
  0x22   : > { %7171 = vmatprep.subr.bf16.mxu1 %v7170_v34  ;;  %v418_v49 = vld [vmem:[%s12480_s1 + $0x128] sm:$0xff]  ;;  %v421_v50 = vld [vmem:[%s12480_s1 + $0x140] sm:$0xff]  ;;  %v7178_v51 = vpack.c.bf16 %v404_v45, %v401_v44  ;;  %v407_v52 = vld [vmem:[%s12480_s1 + $0xd0] sm:$0xff]  ;;  %v7156_v54 = vpack.c.bf16 %v414_v48, %v411_v47 }
  0x23   : > { %7145 = vmatpush1.bf16.msra.mxu0 %v7144_v21  ;;  %v410_v53 = vld [vmem:[%s12480_s1 + $0xe8] sm:$0xff]  ;;  %v7158_v55 = vpack.c.bf16 %v421_v50, %v418_v49  ;;  %v417_v56 = vld [vmem:[%s12480_s1 + $0x120] sm:$0xff]  ;;  %v420_v57 = vld [vmem:[%s12480_s1 + $0x138] sm:$0xff] }
  0x24   : > { %7147 = vmatprep.subr.bf16.mxu0 %v7146_v23  ;;  %v424_v58 = vld [vmem:[%s12480_s1 + $0x158] sm:$0xff]  ;;  %v427_v59 = vld [vmem:[%s12480_s1 + $0x170] sm:$0xff]  ;;  %v7182_v60 = vpack.c.bf16 %v410_v53, %v407_v52  ;;  %v413_v61 = vld [vmem:[%s12480_s1 + $0x100] sm:$0xff]  ;;  %v7160_v63 = vpack.c.bf16 %v420_v57, %v417_v56 }
  0x25   : > { %7173 = vmatpush3.bf16.msra.mxu1 %v7170_v34  ;;  %v416_v62 = vld [vmem:[%s12480_s1 + $0x118] sm:$0xff]  ;;  %v7162_v0 = vpack.c.bf16 %v427_v59, %v424_v58  ;;  %v423_v1 = vld [vmem:[%s12480_s1 + $0x150] sm:$0xff]  ;;  %v426_v2 = vld [vmem:[%s12480_s1 + $0x168] sm:$0xff] }
  0x26   : > { %7175 = vmatprep.subr.bf16.mxu1 %v7174_v42  ;;  %v696_v3 = vld [vmem:[%s12482_s3 + $0x8] sm:$0xff]  ;;  %v699_v4 = vld [vmem:[%s12482_s3 + $0x20] sm:$0xff]  ;;  %v7186_v5 = vpack.c.bf16 %v416_v62, %v413_v61  ;;  %v419_v6 = vld [vmem:[%s12480_s1 + $0x130] sm:$0xff]  ;;  %v7164_v9 = vpack.c.bf16 %v426_v2, %v423_v1 }
  0x27   : > { %7149 = vmatpush1.bf16.msra.mxu0 %v7148_v32  ;;  %v422_v7 = vld [vmem:[%s12480_s1 + $0x148] sm:$0xff]  ;;  %v9081_v10 = vpack.c.bf16 %v699_v4, %v696_v3  ;;  %v695_v11 = vld [vmem:[%s12482_s3] sm:$0xff]  ;;  %v698_v12 = vld [vmem:[%s12482_s3 + $0x18] sm:$0xff] }
  0x28   : > { %7151 = vmatprep.subr.bf16.mxu0 %v7150_v35  ;;  %v702_v13 = vld [vmem:[%s12482_s3 + $0x38] sm:$0xff]  ;;  %v705_v14 = vld [vmem:[%s12482_s3 + $0x50] sm:$0xff]  ;;  %v7190_v15 = vpack.c.bf16 %v422_v7, %v419_v6  ;;  %v425_v16 = vld [vmem:[%s12480_s1 + $0x160] sm:$0xff]  ;;  %v9101_v18 = vpack.c.bf16 %v698_v12, %v695_v11 }
  0x29   : > { %7177 = vmatpush3.bf16.msra.mxu1 %v7174_v42  ;;  %v428_v17 = vld [vmem:[%s12480_s1 + $0x178] sm:$0xff]  ;;  %v9104_v19 = vpack.c.bf16 %v705_v14, %v702_v13  ;;  %v701_v20 = vld [vmem:[%s12482_s3 + $0x30] sm:$0xff]  ;;  %v704_v21 = vld [vmem:[%s12482_s3 + $0x48] sm:$0xff] }
  0x2a   : > { %7179 = vmatprep.subr.bf16.mxu1 %v7178_v51  ;;  %v708_v22 = vld [vmem:[%s12482_s3 + $0x68] sm:$0xff]  ;;  %v711_v23 = vld [vmem:[%s12482_s3 + $0x80] sm:$0xff]  ;;  %v7194_v24 = vpack.c.bf16 %v428_v17, %v425_v16  ;;  %v9122_v26 = vpack.c.bf16 %v704_v21, %v701_v20  ;;  %v710_v29 = vld [vmem:[%s12482_s3 + $0x78] sm:$0xff] }
  0x2b   : > { %7153 = vmatpush1.bf16.msra.mxu0 %v7152_v43  ;;  %v374_v25 = vld [vmem:[%s8925_s17 + $0x8] sm:$0xff]  ;;  %v9125_v27 = vpack.c.bf16 %v711_v23, %v708_v22  ;;  %v707_v28 = vld [vmem:[%s12482_s3 + $0x60] sm:$0xff]  ;;  %v714_v30 = vld [vmem:[%s12482_s3 + $0x98] sm:$0xff] }
  0x2c   : > { %7155 = vmatprep.subr.bf16.mxu0 %v7154_v46  ;;  %v717_v31 = vld [vmem:[%s12482_s3 + $0xb0] sm:$0xff]  ;;  %v700_v33 = vld [vmem:[%s12482_s3 + $0x28] sm:$0xff]  ;;  %v9148_v35 = vpack.c.bf16 %v710_v29, %v707_v28  ;;  %v723_v40 = vld [vmem:[%s12482_s3 + $0xe0] sm:$0xff] }
  0x2d   : > { %7181 = vmatpush3.bf16.msra.mxu1 %v7178_v51  ;;  %v697_v32 = vld [vmem:[%s12482_s3 + $0x10] sm:$0xff]  ;;  %v9151_v36 = vpack.c.bf16 %v717_v31, %v714_v30  ;;  %v716_v38 = vld [vmem:[%s12482_s3 + $0xa8] sm:$0xff]  ;;  %v703_v43 = vld [vmem:[%s12482_s3 + $0x40] sm:$0xff] }
  0x2e   : > { %7183 = vmatprep.subr.bf16.mxu1 %v7182_v60  ;;  %v375_v34 = vld [vmem:[%s8925_s17 + $0x10] sm:$0xff]  ;;  %v720_v39 = vld [vmem:[%s12482_s3 + $0xc8] sm:$0xff]  ;;  %v9166_v42 = vpack.c.bf16 %v700_v33, %v697_v32  ;;  %v706_v44 = vld [vmem:[%s12482_s3 + $0x58] sm:$0xff] }
  0x2f   : > { %7157 = vmatpush1.bf16.msra.mxu0 %v7156_v54  ;;  %v376_v45 = vld [vmem:[%s8925_s17 + $0x18] sm:$0xff]  ;;  %v9180_v47 = vpack.c.bf16 %v723_v40, %v720_v39  ;;  %v719_v48 = vld [vmem:[%s12482_s3 + $0xc0] sm:$0xff]  ;;  %v729_v51 = vld [vmem:[%s12482_s3 + $0x110] sm:$0xff]  ;;  %v9195_v52 = vpack.c.bf16 %v706_v44, %v703_v43 }
  0x30   : > { %7159 = vmatprep.subr.bf16.mxu0 %v7158_v55  ;;  %v722_v49 = vld [vmem:[%s12482_s3 + $0xd8] sm:$0xff]  ;;  %v709_v53 = vld [vmem:[%s12482_s3 + $0x70] sm:$0xff]  ;;  %v712_v54 = vld [vmem:[%s12482_s3 + $0x88] sm:$0xff] }
  0x31   : > { %7185 = vmatpush3.bf16.msra.mxu1 %v7182_v60  ;;  %v726_v50 = vld [vmem:[%s12482_s3 + $0xf8] sm:$0xff]  ;;  %v377_v55 = vld [vmem:[%s8925_s17 + $0x20] sm:$0xff]  ;;  %v9207_v56 = vpack.c.bf16 %v722_v49, %v719_v48  ;;  %v725_v58 = vld [vmem:[%s12482_s3 + $0xf0] sm:$0xff]  ;;  %v9225_v62 = vpack.c.bf16 %v712_v54, %v709_v53 }
  0x32   : > { %7187 = vmatprep.subr.bf16.mxu1 %v7186_v5  ;;  %v9210_v57 = vpack.c.bf16 %v729_v51, %v726_v50  ;;  %v728_v59 = vld [vmem:[%s12482_s3 + $0x108] sm:$0xff]  ;;  %v735_v61 = vld [vmem:[%s12482_s3 + $0x140] sm:$0xff]  ;;  %v379_v3 = vld [vmem:[%s8925_s17 + $0x30] sm:$0xff] }
  0x33   : > { %7161 = vmatpush1.bf16.msra.mxu0 %v7160_v63  ;;  %v732_v60 = vld [vmem:[%s12482_s3 + $0x128] sm:$0xff]  ;;  %v715_v63 = vld [vmem:[%s12482_s3 + $0xa0] sm:$0xff]  ;;  %v9237_v2 = vpack.c.bf16 %v728_v59, %v725_v58  ;;  %v734_v6 = vld [vmem:[%s12482_s3 + $0x138] sm:$0xff] }
  0x34   : > { %7163 = vmatprep.subr.bf16.mxu0 %v7162_v0  ;;  %v718_v0 = vld [vmem:[%s12482_s3 + $0xb8] sm:$0xff]  ;;  %v378_v1 = vld [vmem:[%s8925_s17 + $0x28] sm:$0xff]  ;;  %v9241_v4 = vpack.c.bf16 %v735_v61, %v732_v60  ;;  %v721_v12 = vld [vmem:[%s12482_s3 + $0xd0] sm:$0xff] }
  0x35   : > { %7189 = vmatpush3.bf16.msra.mxu1 %v7186_v5  ;;  %v731_v5 = vld [vmem:[%s12482_s3 + $0x120] sm:$0xff]  ;;  %v738_v7 = vld [vmem:[%s12482_s3 + $0x158] sm:$0xff]  ;;  %v9256_v11 = vpack.c.bf16 %v718_v0, %v715_v63  ;;  %v724_v13 = vld [vmem:[%s12482_s3 + $0xe8] sm:$0xff] }
  0x36   : > { %7191 = vmatprep.subr.bf16.mxu1 %v7190_v15  ;;  %v9267_v14 = vpack.c.bf16 %v734_v6, %v731_v5  ;;  %v737_v17 = vld [vmem:[%s12482_s3 + $0x150] sm:$0xff]  ;;  %v740_v20 = vld [vmem:[%s12482_s3 + $0x168] sm:$0xff]  ;;  %v9280_v21 = vpack.c.bf16 %v724_v13, %v721_v12  ;;  %v727_v22 = vld [vmem:[%s12482_s3 + $0x100] sm:$0xff] }
  0x37   : > { %7165 = vmatpush1.bf16.msra.mxu0 %v7164_v9  ;;  %v741_v9 = vld [vmem:[%s12482_s3 + $0x170] sm:$0xff]  ;;  %v730_v23 = vld [vmem:[%s12482_s3 + $0x118] sm:$0xff]  ;;  %v736_v29 = vld [vmem:[%s12482_s3 + $0x148] sm:$0xff] }
  0x38   : > { %7199 = vmatprep.subr.bf16.mxu0 %v9081_v10  ;;  %v9271_v16 = vpack.c.bf16 %v741_v9, %v738_v7  ;;  %v733_v28 = vld [vmem:[%s12482_s3 + $0x130] sm:$0xff]  ;;  %v9308_v30 = vld [vmem:[#allocation3] sm:$0xff]  ;;  %v742_v33 = vld [vmem:[%s12482_s3 + $0x178] sm:$0xff] }
  0x39   : > { %7193 = vmatpush3.bf16.msra.mxu1 %v7190_v15  ;;  %v380_v15 = vld [vmem:[%s8925_s17 + $0x38] sm:$0xff]  ;;  %v9311_v31 = vpack.c.bf16 %v736_v29, %v733_v28  ;;  %v739_v32 = vld [vmem:[%s12482_s3 + $0x160] sm:$0xff]  ;;  %v924_v44 = vld [vmem:[%s12484_s5 + $0x10] sm:$0xff] }
  0x3a   : > { %511 = vmatmul.mubr.f32.vlgmr.msra.gmra.mrb[0].mxu0 %v9006_v37  ;;  %7195 = vmatprep.subr.bf16.mxu1 %v7194_v24  ;;  %v713_v37 = vld [vmem:[%s12482_s3 + $0x90] sm:$0xff]  ;;  %v922_v40 = vld [vmem:[%s12484_s5] sm:$0xff]  ;;  %v925_v43 = vld [vmem:[%s12484_s5 + $0x18] sm:$0xff] }
  0x3b   : > { %7201 = vmatpush1.bf16.msra.mxu0 %v9101_v18  ;;  %516 = vmatprep.mubr.f32.mxu0 %v12489_v8  ;;  %v9177_v46 = vpack.c.bf16 %v716_v38, %v713_v37  ;;  %v923_v37 = vld [vmem:[%s12484_s5 + $0x8] sm:$0xff]  ;;  %v926_v38 = vld [vmem:[%s12484_s5 + $0x20] sm:$0xff]  ;;  %v929_v50 = vld [vmem:[%s12484_s5 + $0x38] sm:$0xff] }
  0x3c   : > { %7203 = vmatprep.subr.bf16.mxu0 %v9104_v19  ;;  %v9337_v39 = vpack.c.bf16 %v926_v38, %v923_v37  ;;  %v927_v48 = vld [vmem:[%s12484_s5 + $0x28] sm:$0xff]  ;;  %v932_v51 = vld [vmem:[%s12484_s5 + $0x50] sm:$0xff]  ;;  %v930_v58 = vld [vmem:[%s12484_s5 + $0x40] sm:$0xff] }
  0x3d   : > { %7197 = vmatpush3.bf16.msra.mxu1 %v7194_v24  ;;  %v9293_v24 = vpack.c.bf16 %v740_v20, %v737_v17  ;;  %v9354_v49 = vpack.c.bf16 %v927_v48, %v924_v44  ;;  %v9364_v53 = vpack.c.bf16 %v932_v51, %v929_v50  ;;  %v928_v54 = vld [vmem:[%s12484_s5 + $0x30] sm:$0xff]  ;;  %v933_v60 = vld [vmem:[%s12484_s5 + $0x58] sm:$0xff]  ;;  %v935_v63 = vld [vmem:[%s12484_s5 + $0x68] sm:$0xff] }
  0x3e   : > { %517 = vmatmul.mubr.f32.gmra.mrb[2].mxu0 %v374_v25  ;;  %7230 = vmatprep.subr.bf16.mxu1 %v12491_v41  ;;  %v9382_v61 = vpack.c.bf16 %v933_v60, %v930_v58  ;;  %v938_v0 = vld [vmem:[%s12484_s5 + $0x80] sm:$0xff]  ;;  %v937_v5 = vld [vmem:[%s12484_s5 + $0x78] sm:$0xff]  ;;  %v936_v6 = vld [vmem:[%s12484_s5 + $0x70] sm:$0xff] }
  0x3f   : > { %7205 = vmatpush1.bf16.msra.mxu0 %v9122_v26  ;;  %522 = vmatprep.mubr.f32.mxu0 %v12489_v8  ;;  %v939_v7 = vld [vmem:[%s12484_s5 + $0x88] sm:$0xff]  ;;  %v941_v13 = vld [vmem:[%s12484_s5 + $0x98] sm:$0xff]  ;;  %v940_v20 = vld [vmem:[%s12484_s5 + $0x90] sm:$0xff] }
  0x40   : > { %7207 = vmatprep.subr.bf16.mxu0 %v9125_v27  ;;  %6283 = vmatmul.mubr.f32.vlgmr.msra.gmra.mrb[0].mxu1 %v374_v25  ;;  %v9297_v25 = vpack.c.bf16 %v730_v23, %v727_v22  ;;  %v9408_v12 = vpack.c.bf16 %v939_v7, %v936_v6  ;;  %v943_v22 = vld [vmem:[%s12484_s5 + $0xa8] sm:$0xff]  ;;  %v942_v23 = vld [vmem:[%s12484_s5 + $0xa0] sm:$0xff]  ;;  %v945_v29 = vld [vmem:[%s12484_s5 + $0xb8] sm:$0xff] }
  0x41   : > { %7232 = vmatpush3.bf16.msra.mxu1 %v9166_v42  ;;  %6285 = vmatprep.mubr.f32.mxu1 %v375_v34  ;;  %v9432_v28 = vpack.c.bf16 %v943_v22, %v940_v20  ;;  %v950_v37 = vld [vmem:[%s12484_s5 + $0xe0] sm:$0xff]  ;;  %v948_v44 = vld [vmem:[%s12484_s5 + $0xd0] sm:$0xff]  ;;  %v951_v50 = vld [vmem:[%s12484_s5 + $0xe8] sm:$0xff] }
  0x42   : > { %523 = vmatmul.mubr.f32.gmra.mrb[4].mxu0 %v375_v34  ;;  %7233 = vmatprep.subr.bf16.mxu1 %v12491_v41  ;;  %v9323_v34 = vpack.c.bf16 %v742_v33, %v739_v32  ;;  %v9438_v32 = vpack.c.bf16 %v945_v29, %v942_v23  ;;  %v947_v33 = vld [vmem:[%s12484_s5 + $0xc8] sm:$0xff]  ;;  %v9466_v51 = vpack.c.bf16 %v951_v50, %v948_v44  ;;  %v952_v60 = vld [vmem:[%s12484_s5 + $0xf0] sm:$0xff]  ;;  %v962_v7 = vld [vmem:[%s12484_s5 + $0x140] sm:$0xff] }
  0x43   : > { %7209 = vmatpush1.bf16.msra.mxu0 %v9148_v35  ;;  %528 = vmatprep.mubr.f32.mxu0 %v12489_v8  ;;  %v9448_v38 = vpack.c.bf16 %v950_v37, %v947_v33  ;;  %v959_v6 = vld [vmem:[%s12484_s5 + $0x128] sm:$0xff]  ;;  %v958_v20 = vld [vmem:[%s12484_s5 + $0x120] sm:$0xff]  ;;  %v961_v22 = vld [vmem:[%s12484_s5 + $0x138] sm:$0xff] }
  0x44   : > { %7211 = vmatprep.subr.bf16.mxu0 %v9151_v36  ;;  %6286 = vmatmul.mubr.f32.gmra.mrb[2].mxu1 %v376_v45  ;;  %v960_v23 = vld [vmem:[%s12484_s5 + $0x130] sm:$0xff]  ;;  %v9514_v29 = vpack.c.bf16 %v961_v22, %v958_v20  ;;  %v963_v33 = vld [vmem:[%s12484_s5 + $0x148] sm:$0xff]  ;;  %v965_v37 = vld [vmem:[%s12484_s5 + $0x158] sm:$0xff]  ;;  %v431_v20 = vlaneseq }
  0x45   : > { %7235 = vmatpush3.bf16.msra.mxu1 %v9195_v52  ;;  %6288 = vmatprep.mubr.f32.mxu1 %v377_v55  ;;  %v964_v50 = vld [vmem:[%s12484_s5 + $0x150] sm:$0xff] }
  0x46   : > { %529 = vmatmul.mubr.f32.gmra.mrb[6].mxu0 %v376_v45  ;;  %7236 = vmatprep.subr.bf16.mxu1 %v12491_v41  ;;  %v9348_v45 = vpack.c.bf16 %v925_v43, %v922_v40  ;;  %v946_v40 = vld [vmem:[%s12484_s5 + $0xc0] sm:$0xff]  ;;  %v949_v43 = vld [vmem:[%s12484_s5 + $0xd8] sm:$0xff]  ;;  %12595 = vst [vmem:[#allocation6_spill] sm:$0xff] %v9514_v29  ;;  %v432_v22 = vshrl.u32 %v431_v20, 7 }
  0x47   : > { %7213 = vmatpush1.bf16.msra.mxu0 %v9177_v46  ;;  %534 = vmatprep.mubr.f32.mxu0 %v12489_v8  ;;  %v9460_v48 = vpack.c.bf16 %v949_v43, %v946_v40  ;;  %v968_v40 = vld [vmem:[%s12484_s5 + $0x170] sm:$0xff]  ;;  %v9527_v43 = vpack.c.bf16 %v963_v33, %v960_v23  ;;  %v429_v33 = vld [vmem:[%s12481_s2] sm:$0x7] }
  0x48   : > { %7215 = vmatprep.subr.bf16.mxu0 %v9180_v47  ;;  %6289 = vmatmul.mubr.f32.gmra.mrb[4].mxu1 %v378_v1  ;;  %v9529_v44 = vpack.c.bf16 %v968_v40, %v965_v37  ;;  %v9564_v23 = vsub.s32 2, %v432_v22 }
  0x49   : > { %7238 = vmatpush3.bf16.msra.mxu1 %v9225_v62  ;;  %6291 = vmatprep.mubr.f32.mxu1 %v379_v3  ;;  %12596 = vst [vmem:[#allocation7_spill] sm:$0xff] %v9527_v43 }
  0x4a   : > { %535 = vmatmul.mubr.f32.gmra.mrb[8].mxu0 %v377_v55  ;;  %7239 = vmatprep.subr.bf16.mxu1 %v12491_v41  ;;  %v931_v55 = vld [vmem:[%s12484_s5 + $0x48] sm:$0xff]  ;;  %12597 = vst [vmem:[#allocation8_spill] sm:$0xff] %v9529_v44  ;;  %v442_v37 = vrot.slane %v429_v33, %v9564_v23 }
  0x4b   : > { %7217 = vmatpush1.bf16.msra.mxu0 %v9207_v56  ;;  %540 = vmatprep.mubr.f32.mxu0 %v12489_v8  ;;  %v9376_v59 = vpack.c.bf16 %v931_v55, %v928_v54  ;;  %v953_v54 = vld [vmem:[%s12484_s5 + $0xf8] sm:$0xff]  ;;  %v956_v55 = vld [vmem:[%s12484_s5 + $0x110] sm:$0xff] }
  0x4c   : > { %7219 = vmatprep.subr.bf16.mxu0 %v9210_v57  ;;  %6292 = vmatmul.mubr.f32.gmra.mrb[6].mxu1 %v380_v15  ;;  %v9476_v58 = vpack.c.bf16 %v956_v55, %v953_v54  ;;  %v967_v54 = vld [vmem:[%s12484_s5 + $0x168] sm:$0xff]  ;;  %v966_v55 = vld [vmem:[%s12484_s5 + $0x160] sm:$0xff] }
  0x4d   : > { %7241 = vmatpush3.bf16.msra.mxu1 %v9256_v11  ;;  %6326 = vmatprep.mubr.msk.f32.mxu1 %vm8853_vm0, %v12489_v8 }
  0x4e   : > { %541 = vmatmul.mubr.f32.gmra.mrb[10].mxu0 %v378_v1  ;;  %7242 = vmatprep.subr.bf16.mxu1 %v12491_v41  ;;  %v934_v1 = vld [vmem:[%s12484_s5 + $0x60] sm:$0xff] }
  0x4f   : > { %7221 = vmatpush1.bf16.msra.mxu0 %v9237_v2  ;;  %546 = vmatprep.mubr.f32.mxu0 %v12489_v8  ;;  %v9406_v9 = vpack.c.bf16 %v937_v5, %v934_v1  ;;  %v957_v5 = vld [vmem:[%s12484_s5 + $0x118] sm:$0xff] }
  0x50   : > { %7223 = vmatprep.subr.bf16.mxu0 %v9241_v4 }
  0x51   : > { %7244 = vmatpush3.bf16.msra.mxu1 %v9280_v21 }
  0x52   : > { %547 = vmatmul.mubr.f32.gmra.mrb[12].mxu0 %v379_v3  ;;  %7245 = vmatprep.subr.bf16.mxu1 %v12491_v41  ;;  %v9394_v3 = vpack.c.bf16 %v938_v0, %v935_v63  ;;  %v955_v63 = vld [vmem:[%s12484_s5 + $0x108] sm:$0xff]  ;;  %v954_v0 = vld [vmem:[%s12484_s5 + $0x100] sm:$0xff] }
  0x53   : > { %7225 = vmatpush1.bf16.msra.mxu0 %v9267_v14  ;;  %552 = vmatprep.mubr.f32.mxu0 %v12489_v8  ;;  %v9488_v1 = vpack.c.bf16 %v955_v63, %v952_v60  ;;  %v969_v60 = vld [vmem:[%s12484_s5 + $0x178] sm:$0xff]  ;;  %v1128_v63 = vld [vmem:[%s12486_s7 + $0x8] sm:$0xff] }
  0x54   : > { %7227 = vmatprep.subr.bf16.mxu0 %v9271_v16 }
  0x55   : > { %7247 = vmatpush3.bf16.msra.mxu1 %v9297_v25 }
  0x56   : > { %553 = vmatmul.mubr.f32.gmra.mrb[14].mxu0 %v380_v15  ;;  %7248 = vmatprep.subr.bf16.mxu1 %v12491_v41  ;;  %v944_v15 = vld [vmem:[%s12484_s5 + $0xb0] sm:$0xff] }
  0x57   : > { %7229 = vmatpush1.bf16.msra.mxu0 %v9293_v24  ;;  %823 = vmatprep.mubr.f32.mxu0 %v12489_v8  ;;  %v9420_v17 = vpack.c.bf16 %v944_v15, %v941_v13  ;;  %v9500_v13 = vpack.c.bf16 %v957_v5, %v954_v0  ;;  %v9502_v15 = vpack.c.bf16 %v962_v7, %v959_v6  ;;  %v1131_v0 = vld [vmem:[%s12486_s7 + $0x20] sm:$0xff] }
  0x58   : > { %7255 = vmatprep.subr.bf16.mxu0 %v9337_v39  ;;  %v9551_v5 = vpack.c.bf16 %v967_v54, %v964_v50  ;;  %v9555_v6 = vpack.c.bf16 %v969_v60, %v966_v55  ;;  %v9557_v7 = vpack.c.bf16 %v1131_v0, %v1128_v63 }
  0x59   : > { %7250 = vmatpush3.bf16.msra.mxu1 %v9311_v31  ;;  %12594 = vst [vmem:[#allocation5_spill] sm:$0xff] %v9502_v15 }
  0x5a   : > { %824 = vmatmul.mubr.f32.vlgmr.msra.gmra.mrb[0].mxu0 %v9308_v30  ;;  %7251 = vmatprep.subr.bf16.mxu1 %v12491_v41  ;;  %12598 = vst [vmem:[#allocation9_spill] sm:$0xff] %v9551_v5  ;;  %12599 = vst [vmem:[#allocation10_spill] sm:$0xff] %v9555_v6 }
  0x5b   : > { %1050 = vmatprep.mubr.f32.mxu0 %v12489_v8  ;;  %7257 = vmatpush1.bf16.msra.mxu0 %v9348_v45  ;;  %12600 = vst [vmem:[#allocation11_spill] sm:$0xff] %v9557_v7 }
  0x5c   : > { %7259 = vmatprep.subr.bf16.mxu0 %v9364_v53 }
  0x5d   : > { %7253 = vmatpush3.bf16.msra.mxu1 %v9323_v34 }
  0x5e   : > { %7286 = vmatprep.subr.bf16.mxu1 %v12491_v41 }
  0x5f   : > { %7261 = vmatpush1.bf16.msra.mxu0 %v9376_v59 }
  0x60   : > { %6327 = vmatmul.mubr.f32.vlgmr.msra.gmra.mrb[8].mxu1 %v9308_v30  ;;  %7263 = vmatprep.subr.bf16.mxu0 %v9394_v3 }
  0x61   : > { %6361 = vmatprep.mubr.msk.f32.mxu1 %vm8853_vm0, %v12489_v8  ;;  %7288 = vmatpush3.bf16.msra.mxu1 %v9354_v49 }
  0x62   : > { %7289 = vmatprep.subr.bf16.mxu1 %v12491_v41 }
  0x63   : > { %7265 = vmatpush1.bf16.msra.mxu0 %v9406_v9 }
  0x64   : > { %7267 = vmatprep.subr.bf16.mxu0 %v9420_v17 }
  0x65   : > { %7291 = vmatpush3.bf16.msra.mxu1 %v9382_v61 }
  0x66   : > { %7292 = vmatprep.subr.bf16.mxu1 %v12491_v41 }
  0x67   : > { %7269 = vmatpush1.bf16.msra.mxu0 %v9432_v28 }
  0x68   : > { %7271 = vmatprep.subr.bf16.mxu0 %v9448_v38 }
  0x69   : > { %7294 = vmatpush3.bf16.msra.mxu1 %v9408_v12 }
  0x6a   : > { %7295 = vmatprep.subr.bf16.mxu1 %v12491_v41 }
  0x6b   : > { %7273 = vmatpush1.bf16.msra.mxu0 %v9460_v48 }
  0x6c   : > { %7275 = vmatprep.subr.bf16.mxu0 %v9476_v58 }
  0x6d   : > { %7297 = vmatpush3.bf16.msra.mxu1 %v9438_v32 }
  0x6e   : > { %7298 = vmatprep.subr.bf16.mxu1 %v12491_v41 }
  0x6f   : > { %7277 = vmatpush1.bf16.msra.mxu0 %v9488_v1 }
  0x70   : > { %7279 = vmatprep.subr.bf16.mxu0 %v9502_v15 }
  0x71   : > { %7300 = vmatpush3.bf16.msra.mxu1 %v9466_v51 }
  0x72   : > { %7301 = vmatprep.subr.bf16.mxu1 %v12491_v41 }
  0x73   : > { %7281 = vmatpush1.bf16.msra.mxu0 %v9514_v29 }
  0x74   : > { %7283 = vmatprep.subr.bf16.mxu0 %v9529_v44 }
  0x75   : > { %7303 = vmatpush3.bf16.msra.mxu1 %v9500_v13 }
  0x76   : > { %7304 = vmatprep.subr.bf16.mxu1 %v12491_v41 }
  0x77   : > { %7285 = vmatpush1.bf16.msra.mxu0 %v9551_v5 }
  0x78   : > { %7311 = vmatprep.subr.bf16.mxu0 %v9557_v7 }
  0x79   : > { %7306 = vmatpush3.bf16.msra.mxu1 %v9527_v43 }
  0x7a   : > { %7307 = vmatprep.subr.bf16.mxu1 %v12491_v41 }
  0x7d   : > { %7309 = vmatpush3.bf16.msra.mxu1 %v9555_v6  ;;  %v9580_v6 = vsub.s32 0, %v432_v22 }
  0x7e   : > { %7342 = vmatprep.subr.bf16.mxu1 %v12491_v41 }
  0x7f   : > { %12606 = vst [vmem:[#allocation17_spill] sm:$0xff] %v9580_v6 }
 0x113   : > { %v6284_v40 = vpop.f32.mrb[0].mxu1 }
 0x114   : > { %v9570_v50 = vadd.f32 %v6284_v40, %v442_v37  ;;  %v625_v54 = vpop.f32.mrb[1].mxu1  ;;  %v688_v40 = vld [vmem:[%s12483_s4] sm:$0x7] }
 0x116   : > { %12601 = vst [vmem:[#allocation12_spill] sm:$0xff] %v9570_v50 }
 0x117   : > { %v6287_v55 = vpop.f32.mrb[2].mxu1 }
 0x118   : > { %v9572_v60 = vadd.f32 %v6287_v55, %v442_v37  ;;  %v635_v63 = vpop.f32.mrb[3].mxu1 }
 0x119   : > { %v9574_v0 = vadd.f32 %v635_v63, %v442_v37 }
 0x11a   : > { %12602 = vst [vmem:[#allocation13_spill] sm:$0xff] %v9572_v60  ;;  %v9587_v60 = vsub.s32 1, %v432_v22 }
 0x11b   : > { %12603 = vst [vmem:[#allocation14_spill] sm:$0xff] %v9574_v0  ;;  %v6290_v8 = vpop.f32.mrb[4].mxu1 }
 0x11c   : > { %v9576_v20 = vadd.f32 %v6290_v8, %v442_v37  ;;  %v645_v41 = vpop.f32.mrb[5].mxu1  ;;  %v434_v8 = vrot.slane %v429_v33, %v9580_v6 }
 0x11d   : > { %v9578_v7 = vadd.f32 %v645_v41, %v442_v37  ;;  %v438_v41 = vrot.slane %v429_v33, %v9587_v60 }
 0x11e   : > { %12604 = vst [vmem:[#allocation15_spill] sm:$0xff] %v9576_v20  ;;  %v747_v20 = vrot.slane %v688_v40, %v9580_v6 }
 0x11f   : > { %12605 = vst [vmem:[#allocation16_spill] sm:$0xff] %v9578_v7  ;;  %v6293_v50 = vpop.f32.mrb[6].mxu1  ;;  %v751_v7 = vrot.slane %v688_v40, %v9587_v60 }
 0x120   : > { %v9585_v5 = vadd.f32 %v6293_v50, %v442_v37  ;;  %v655_v55 = vpop.f32.mrb[7].mxu1  ;;  %v9595_v0 = vadd.f32 %v747_v20, %v434_v8  ;;  %v9602_v20 = vrot.slane %v688_v40, %v9564_v23  ;;  %v1130_v40 = vld [vmem:[%s12486_s7 + $0x18] sm:$0xff] }
 0x121   : > { %v9589_v63 = vadd.f32 %v655_v55, %v442_v37  ;;  %v9597_v43 = vadd.f32 %v751_v7, %v438_v41 }
 0x122   : > { %12607 = vst [vmem:[#allocation18_spill] sm:$0xff] %v9585_v5  ;;  %12609 = vst [vmem:[#allocation20_spill] sm:$0xff] %v9595_v0 }
 0x123   : > { %12608 = vst [vmem:[#allocation19_spill] sm:$0xff] %v9589_v63 }
 0x12d   : > { %v825_v44 = vpop.f32.mrb[0].mxu0 }
 0x12e   : > { %v8543_v50 = vadd.f32 %v9595_v0, %v825_v44  ;;  %v827_v5 = vpop.f32.mrb[1].mxu0  ;;  %v626_v0 = vadd.f32 %v625_v54, %v442_v37  ;;  %v1132_v37 = vld [vmem:[%s12486_s7 + $0x28] sm:$0xff] }
 0x12f   : > { %v8545_v55 = vadd.f32 %v9597_v43, %v827_v5 }
 0x130   : > { %v5777_v22 = vmul.f32 -1.442695, %v8543_v50 }
 0x131   : > { %v5778_v63 = vmul.f32 -1.442695, %v8545_v55 }
 0x132   : > { %8666 = vpow2.f32 %v5777_v22 }
 0x133   : > { %v896_v29 = vpop.f32.mrb[8].mxu1  ;;  %8668 = vpow2.f32 %v5778_v63  ;;  %v1137_v63 = vld [vmem:[%s12486_s7 + $0x50] sm:$0xff] }
 0x134   : > { %v6328_v15 = vpop.f32.mrb[9].mxu1  ;;  %v897_v41 = vadd.f32 %v896_v29, %v9602_v20  ;;  %v1129_v29 = vld [vmem:[%s12486_s7 + $0x10] sm:$0xff] }
 0x135   : > { %v1127_v15 = vld [vmem:[%s12486_s7] sm:$0xff] }
 0x13c   : > { %v8667_v6 = vpop.eup %8666 }
 0x13d   : > { %v904_v33 = vadd.f32 1.0, %v8667_v6  ;;  %v8669_v8 = vpop.eup %8668 }
 0x13e   : > { %v911_v7 = vadd.f32 1.0, %v8669_v8  ;;  %v9624_v8 = vpack.c.bf16 %v1130_v40, %v1127_v15  ;;  %v1140_v15 = vld [vmem:[%s12486_s7 + $0x68] sm:$0xff] }
 0x13f   : > { %8670 = vrcp.f32 %v904_v33 }
 0x140   : > { %8672 = vrcp.f32 %v911_v7  ;;  %v9626_v7 = vpack.c.bf16 %v1132_v37, %v1129_v29  ;;  %v1139_v37 = vld [vmem:[%s12486_s7 + $0x60] sm:$0xff] }
 0x149   : > { %v8671_v44 = vpop.eup %8670 }
 0x14a   : > { %v914_v50 = vmul.f32 %v8671_v44, %v897_v41  ;;  %v8673_v22 = vpop.eup %8672  ;;  %v1133_v41 = vld [vmem:[%s12486_s7 + $0x30] sm:$0xff] }
 0x14b   : > { %v917_v6 = vsub.f32 1.0, %v8673_v22  ;;  %v919_v33 = vmul.f32 %v8673_v22, %v9308_v30  ;;  %v1135_v30 = vld [vmem:[%s12486_s7 + $0x40] sm:$0xff]  ;;  %v1138_v22 = vld [vmem:[%s12486_s7 + $0x58] sm:$0xff] }
 0x14c   : > { %v915_v5 = vadd.f32 %v914_v50, %v626_v0  ;;  %v1134_v0 = vld [vmem:[%s12486_s7 + $0x38] sm:$0xff]  ;;  %v9656_v29 = vpack.c.bf16 %v1138_v22, %v1135_v30  ;;  %v12615_v30 = vmov 0.0  }
 0x14d   : > { %v9633_v50 = vpack.c.bf16 %v1137_v63, %v1134_v0  ;;  %v1142_v63 = vld [vmem:[%s12486_s7 + $0x78] sm:$0xff] }
 0x14e   : > { %8674 = vtanh.f32 %v915_v5  ;;  %v1136_v5 = vld [vmem:[%s12486_s7 + $0x48] sm:$0xff]  ;;  %12612 = vst [vmem:[#allocation23_spill] sm:$0xff] %v9656_v29  ;;  %v9685_v22 = vpack.c.bf16 %v1142_v63, %v1139_v37  ;;  %v1147_v37 = vld [vmem:[%s12486_s7 + $0xa0] sm:$0xff]  ;;  %v1150_v63 = vld [vmem:[%s12486_s7 + $0xb8] sm:$0xff] }
 0x14f   : > { %12610 = vst [vmem:[#allocation21_spill] sm:$0xff] %v9633_v50  ;;  %v9654_v40 = vpack.c.bf16 %v1136_v5, %v1133_v41  ;;  %v1146_v41 = vld [vmem:[%s12486_s7 + $0x98] sm:$0xff]  ;;  %v1149_v5 = vld [vmem:[%s12486_s7 + $0xb0] sm:$0xff] }
 0x150   : > { %12616 = vst [vmem:[#allocation25_spill] sm:$0xff] %v9685_v22 }
 0x151   : > { %12611 = vst [vmem:[#allocation22_spill] sm:$0xff] %v9654_v40 }
 0x158   : > { %v8675_v54 = vpop.eup %8674 }
 0x159   : > { %v918_v55 = vmul.f32 %v8675_v54, %v917_v6  ;;  %v1143_v6 = vld [vmem:[%s12486_s7 + $0x80] sm:$0xff]  ;;  %v12613_v54 = vmov 0.0|0.0  }
 0x15a   : > { %v9663_v0 = vpack.c.bf16 %v1143_v6, %v1140_v15  ;;  %v1145_v6 = vld [vmem:[%s12486_s7 + $0x90] sm:$0xff] }
 0x15b   : > { %v9631_v44 = vadd.f32 %v919_v33, %v918_v55  ;;  %v1141_v55 = vld [vmem:[%s12486_s7 + $0x70] sm:$0xff]  ;;  %v1144_v33 = vld [vmem:[%s12486_s7 + $0x88] sm:$0xff] }
 0x15c   : > { %12614 = vst [vmem:[#allocation24_spill] sm:$0xff] %v9663_v0  ;;  %v9687_v15 = vpack.c.bf16 %v1144_v33, %v1141_v55  ;;  %v1152_v55 = vld [vmem:[%s12486_s7 + $0xc8] sm:$0xff]  ;;  %v1155_v33 = vld [vmem:[%s12486_s7 + $0xe0] sm:$0xff] }
 0x15d   : > { %1051 = vmatmul.mubr.f32.vlgmr.msra.gmra.mrb[16].mxu0 %v9631_v44  ;;  %6362 = vmatmul.mubr.f32.vlgmr.msra.gmra.mrb[10].mxu1 %v9631_v44 }
 0x15e   : > { %7313 = vmatpush1.bf16.msra.mxu0 %v9624_v8  ;;  %7344 = vmatpush3.bf16.msra.mxu1 %v9626_v7  ;;  %12617 = vst [vmem:[#allocation26_spill] sm:$0xff] %v9687_v15 }
 0x15f   : > { %7315 = vmatprep.subr.bf16.mxu0 %v9633_v50  ;;  %7345 = vmatprep.subr.bf16.mxu1 %v12613_v54  ;;  %v9694_v50 = vpack.c.bf16 %v1149_v5, %v1146_v41  ;;  %v9715_v5 = vpack.c.bf16 %v1150_v63, %v1147_v37  ;;  %v1158_v37 = vld [vmem:[%s12486_s7 + $0xf8] sm:$0xff]  ;;  %v1161_v63 = vld [vmem:[%s12486_s7 + $0x110] sm:$0xff] }
 0x160   : > { %1255 = vmatprep.mubr.f32.mxu0 %v12615_v30  ;;  %6396 = vmatprep.mubr.msk.f32.mxu1 %vm8853_vm0, %v12615_v30 }
 0x161   : > { %12618 = vst [vmem:[#allocation27_spill] sm:$0xff] %v9694_v50  ;;  %12620 = vst [vmem:[#allocation29_spill] sm:$0xff] %v9715_v5 }
 0x162   : > { %7317 = vmatpush1.bf16.msra.mxu0 %v9654_v40  ;;  %7347 = vmatpush3.bf16.msra.mxu1 %v9656_v29  ;;  %v1148_v40 = vld [vmem:[%s12486_s7 + $0xa8] sm:$0xff]  ;;  %v9722_v29 = vpack.c.bf16 %v1155_v33, %v1152_v55 }
 0x163   : > { %7319 = vmatprep.subr.bf16.mxu0 %v9663_v0  ;;  %7348 = vmatprep.subr.bf16.mxu1 %v12613_v54  ;;  %v9713_v41 = vpack.c.bf16 %v1148_v40, %v1145_v6  ;;  %v1151_v0 = vld [vmem:[%s12486_s7 + $0xc0] sm:$0xff]  ;;  %v1153_v40 = vld [vmem:[%s12486_s7 + $0xd0] sm:$0xff]  ;;  %v1156_v6 = vld [vmem:[%s12486_s7 + $0xe8] sm:$0xff] }
 0x164   : > { %12621 = vst [vmem:[#allocation30_spill] sm:$0xff] %v9722_v29  ;;  %v9743_v33 = vpack.c.bf16 %v1156_v6, %v1153_v40  ;;  %v1164_v40 = vld [vmem:[%s12486_s7 + $0x128] sm:$0xff]  ;;  %v1167_v6 = vld [vmem:[%s12486_s7 + $0x140] sm:$0xff] }
 0x165   : > { %12619 = vst [vmem:[#allocation28_spill] sm:$0xff] %v9713_v41 }
 0x166   : > { %7321 = vmatpush1.bf16.msra.mxu0 %v9685_v22  ;;  %7350 = vmatpush3.bf16.msra.mxu1 %v9687_v15  ;;  %v1154_v22 = vld [vmem:[%s12486_s7 + $0xd8] sm:$0xff]  ;;  %12623 = vst [vmem:[#allocation32_spill] sm:$0xff] %v9743_v33  ;;  %v9750_v15 = vpack.c.bf16 %v1161_v63, %v1158_v37 }
 0x167   : > { %7323 = vmatprep.subr.bf16.mxu0 %v9694_v50  ;;  %7351 = vmatprep.subr.bf16.mxu1 %v12613_v54  ;;  %v9741_v55 = vpack.c.bf16 %v1154_v22, %v1151_v0  ;;  %v1157_v50 = vld [vmem:[%s12486_s7 + $0xf0] sm:$0xff]  ;;  %v1159_v0 = vld [vmem:[%s12486_s7 + $0x100] sm:$0xff]  ;;  %v1162_v22 = vld [vmem:[%s12486_s7 + $0x118] sm:$0xff] }
 0x168   : > { %12624 = vst [vmem:[#allocation33_spill] sm:$0xff] %v9750_v15  ;;  %v9771_v63 = vpack.c.bf16 %v1162_v22, %v1159_v0  ;;  %v1170_v0 = vld [vmem:[%s12486_s7 + $0x158] sm:$0xff]  ;;  %v1173_v22 = vld [vmem:[%s12486_s7 + $0x170] sm:$0xff] }
 0x169   : > { %12622 = vst [vmem:[#allocation31_spill] sm:$0xff] %v9741_v55 }
 0x16a   : > { %7325 = vmatpush1.bf16.msra.mxu0 %v9713_v41  ;;  %7353 = vmatpush3.bf16.msra.mxu1 %v9715_v5  ;;  %v1160_v41 = vld [vmem:[%s12486_s7 + $0x108] sm:$0xff]  ;;  %v9778_v5 = vpack.c.bf16 %v1167_v6, %v1164_v40 }
 0x16b   : > { %7327 = vmatprep.subr.bf16.mxu0 %v9722_v29  ;;  %7354 = vmatprep.subr.bf16.mxu1 %v12613_v54  ;;  %v9769_v37 = vpack.c.bf16 %v1160_v41, %v1157_v50  ;;  %v1163_v29 = vld [vmem:[%s12486_s7 + $0x120] sm:$0xff]  ;;  %v1165_v50 = vld [vmem:[%s12486_s7 + $0x130] sm:$0xff]  ;;  %v1168_v41 = vld [vmem:[%s12486_s7 + $0x148] sm:$0xff] }
 0x16c   : > { %v9799_v6 = vpack.c.bf16 %v1168_v41, %v1165_v50 }
 0x16d   : > { %12625 = vst [vmem:[#allocation34_spill] sm:$0xff] %v9769_v37 }
 0x16e   : > { %7329 = vmatpush1.bf16.msra.mxu0 %v9741_v55  ;;  %7356 = vmatpush3.bf16.msra.mxu1 %v9743_v33  ;;  %v1166_v55 = vld [vmem:[%s12486_s7 + $0x138] sm:$0xff]  ;;  %v9806_v33 = vpack.c.bf16 %v1173_v22, %v1170_v0  ;;  %v9827_v0 = vld [vmem:[#allocation4] sm:$0xff] }
 0x16f   : > { %7331 = vmatprep.subr.bf16.mxu0 %v9750_v15  ;;  %7357 = vmatprep.subr.bf16.mxu1 %v12613_v54  ;;  %v9797_v40 = vpack.c.bf16 %v1166_v55, %v1163_v29  ;;  %v1169_v15 = vld [vmem:[%s12486_s7 + $0x150] sm:$0xff]  ;;  %v1171_v29 = vld [vmem:[%s12486_s7 + $0x160] sm:$0xff]  ;;  %v1174_v55 = vld [vmem:[%s12486_s7 + $0x178] sm:$0xff] }
 0x170   : > { %v9821_v41 = vpack.c.bf16 %v1174_v55, %v1171_v29 }
 0x172   : > { %7333 = vmatpush1.bf16.msra.mxu0 %v9769_v37  ;;  %7359 = vmatpush3.bf16.msra.mxu1 %v9771_v63  ;;  %v1172_v37 = vld [vmem:[%s12486_s7 + $0x168] sm:$0xff] }
 0x173   : > { %7335 = vmatprep.subr.bf16.mxu0 %v9778_v5  ;;  %7360 = vmatprep.subr.bf16.mxu1 %v12613_v54  ;;  %v9819_v50 = vpack.c.bf16 %v1172_v37, %v1169_v15 }
 0x176   : > { %7337 = vmatpush1.bf16.msra.mxu0 %v9797_v40  ;;  %7362 = vmatpush3.bf16.msra.mxu1 %v9799_v6 }
 0x177   : > { %7339 = vmatprep.subr.bf16.mxu0 %v9806_v33  ;;  %7363 = vmatprep.subr.bf16.mxu1 %v12613_v54 }
 0x17a   : > { %7341 = vmatpush1.bf16.msra.mxu0 %v9819_v50  ;;  %7365 = vmatpush3.bf16.msra.mxu1 %v9821_v41 }
 0x17b   : > { %7367 = vmatprep.subr.bf16.mxu0 %v9081_v10  ;;  %7398 = vmatprep.subr.bf16.mxu1 %v12613_v54  ;;  %v12626_v10 = vld [vmem:[#allocation5_spill] sm:$0xff] }
 0x17d   : > { %1256 = vmatmul.mubr.f32.vlgmr.msra.gmra.mrb[16].mxu0 %v9827_v0  ;;  %6397 = vmatmul.mubr.f32.vlgmr.msra.gmra.mrb[12].mxu1 %v9827_v0 }
 0x17e   : > { %7369 = vmatpush1.bf16.msra.mxu0 %v9101_v18  ;;  %7400 = vmatpush3.bf16.msra.mxu1 %v9166_v42  ;;  %v12627_v18 = vld [vmem:[#allocation6_spill] sm:$0xff] }
 0x17f   : > { %7371 = vmatprep.subr.bf16.mxu0 %v9104_v19  ;;  %7401 = vmatprep.subr.bf16.mxu1 %v12613_v54  ;;  %v12628_v19 = vld [vmem:[#allocation7_spill] sm:$0xff] }
 0x180   : > { %1473 = vmatprep.mubr.f32.mxu0 %v12615_v30  ;;  %6431 = vmatprep.mubr.msk.f32.mxu1 %vm8853_vm0, %v12615_v30 }
 0x182   : > { %7373 = vmatpush1.bf16.msra.mxu0 %v9122_v26  ;;  %7403 = vmatpush3.bf16.msra.mxu1 %v9195_v52  ;;  %v12629_v26 = vld [vmem:[#allocation8_spill] sm:$0xff]  ;;  %v689_v52 = vld [vmem:[%s12485_s6] sm:$0x7] }
 0x183   : > { %7375 = vmatprep.subr.bf16.mxu0 %v9125_v27  ;;  %7404 = vmatprep.subr.bf16.mxu1 %v12613_v54  ;;  %v12630_v27 = vld [vmem:[#allocation9_spill] sm:$0xff] }
 0x186   : > { %7377 = vmatpush1.bf16.msra.mxu0 %v9148_v35  ;;  %7406 = vmatpush3.bf16.msra.mxu1 %v9225_v62  ;;  %v12631_v35 = vld [vmem:[#allocation10_spill] sm:$0xff] }
 0x187   : > { %7379 = vmatprep.subr.bf16.mxu0 %v9151_v36  ;;  %7407 = vmatprep.subr.bf16.mxu1 %v12613_v54  ;;  %v12632_v36 = vld [vmem:[#allocation11_spill] sm:$0xff] }
 0x18a   : > { %7381 = vmatpush1.bf16.msra.mxu0 %v9177_v46  ;;  %7409 = vmatpush3.bf16.msra.mxu1 %v9256_v11 }
 0x18b   : > { %7383 = vmatprep.subr.bf16.mxu0 %v9180_v47  ;;  %7410 = vmatprep.subr.bf16.mxu1 %v12613_v54  ;;  %v690_v47 = vld [vmem:[%s12487_s8] sm:$0x7] }
 0x18e   : > { %7385 = vmatpush1.bf16.msra.mxu0 %v9207_v56  ;;  %7412 = vmatpush3.bf16.msra.mxu1 %v9280_v21  ;;  %v12633_v56 = vld [vmem:[#allocation17_spill] sm:$0xff] }
 0x18f   : > { %7387 = vmatprep.subr.bf16.mxu0 %v9210_v57  ;;  %7413 = vmatprep.subr.bf16.mxu1 %v12613_v54  ;;  %v974_v57 = vrot.slane %v689_v52, %v12633_v56  ;;  %v1179_v62 = vrot.slane %v690_v47, %v12633_v56 }
 0x191   : > { %v9915_v11 = vadd.f32 %v1179_v62, %v974_v57 }
 0x192   : > { %7389 = vmatpush1.bf16.msra.mxu0 %v9237_v2  ;;  %7415 = vmatpush3.bf16.msra.mxu1 %v9297_v25  ;;  %v978_v2 = vrot.slane %v689_v52, %v9587_v60 }
 0x193   : > { %7391 = vmatprep.subr.bf16.mxu0 %v9241_v4  ;;  %7416 = vmatprep.subr.bf16.mxu1 %v12613_v54  ;;  %v1183_v4 = vrot.slane %v690_v47, %v9587_v60 }
 0x196   : > { %7393 = vmatpush1.bf16.msra.mxu0 %v9267_v14  ;;  %7418 = vmatpush3.bf16.msra.mxu1 %v9311_v31 }
 0x197   : > { %7395 = vmatprep.subr.bf16.mxu0 %v9271_v16  ;;  %7419 = vmatprep.subr.bf16.mxu1 %v12613_v54  ;;  %v9917_v16 = vadd.f32 %v1183_v4, %v978_v2 }
 0x19a   : > { %7397 = vmatpush1.bf16.msra.mxu0 %v9293_v24  ;;  %7421 = vmatpush3.bf16.msra.mxu1 %v9323_v34 }
 0x19b   : > { %7423 = vmatprep.subr.bf16.mxu0 %v9337_v39  ;;  %7454 = vmatprep.subr.bf16.mxu1 %v12613_v54 }
 0x19d   : > { %1474 = vmatmul.mubr.f32.vlgmr.msra.gmra.mrb[2].mxu0 %v9631_v44  ;;  %6432 = vmatmul.mubr.f32.vlgmr.msra.gmra.mrb[14].mxu1 %v9631_v44 }
 0x19e   : > { %7425 = vmatpush1.bf16.msra.mxu0 %v9348_v45  ;;  %7456 = vmatpush3.bf16.msra.mxu1 %v9354_v49 }
 0x19f   : > { %7427 = vmatprep.subr.bf16.mxu0 %v9364_v53  ;;  %7457 = vmatprep.subr.bf16.mxu1 %v12613_v54 }
 0x1a0   : > { %1684 = vmatprep.mubr.f32.mxu0 %v12615_v30  ;;  %6466 = vmatprep.mubr.msk.f32.mxu1 %vm8853_vm0, %v12615_v30 }
 0x1a2   : > { %7429 = vmatpush1.bf16.msra.mxu0 %v9376_v59  ;;  %7459 = vmatpush3.bf16.msra.mxu1 %v9382_v61  ;;  %v9922_v59 = vrot.slane %v690_v47, %v9564_v23 }
 0x1a3   : > { %7431 = vmatprep.subr.bf16.mxu0 %v9394_v3  ;;  %7460 = vmatprep.subr.bf16.mxu1 %v12613_v54  ;;  %v9925_v3 = vrot.slane %v689_v52, %v9564_v23  ;;  %v12636_v52 = vld [vmem:[#allocation12_spill] sm:$0xff] }
 0x1a4   : > { %12634 = vst [vmem:[#allocation5_spill] sm:$0xff] %v9922_v59 }
 0x1a6   : > { %7433 = vmatpush1.bf16.msra.mxu0 %v9406_v9  ;;  %7462 = vmatpush3.bf16.msra.mxu1 %v9408_v12 }
 0x1a7   : > { %7435 = vmatprep.subr.bf16.mxu0 %v9420_v17  ;;  %7463 = vmatprep.subr.bf16.mxu1 %v12613_v54 }
 0x1aa   : > { %7437 = vmatpush1.bf16.msra.mxu0 %v9432_v28  ;;  %7465 = vmatpush3.bf16.msra.mxu1 %v9438_v32 }
 0x1ab   : > { %7439 = vmatprep.subr.bf16.mxu0 %v9448_v38  ;;  %7466 = vmatprep.subr.bf16.mxu1 %v12613_v54 }
 0x1ae   : > { %7441 = vmatpush1.bf16.msra.mxu0 %v9460_v48  ;;  %7468 = vmatpush3.bf16.msra.mxu1 %v9466_v51 }
 0x1af   : > { %7443 = vmatprep.subr.bf16.mxu0 %v9476_v58  ;;  %7469 = vmatprep.subr.bf16.mxu1 %v12613_v54  ;;  %v12635_v58 = vld [vmem:[#allocation20_spill] sm:$0xff] }
 0x1b2   : > { %7445 = vmatpush1.bf16.msra.mxu0 %v9488_v1  ;;  %7471 = vmatpush3.bf16.msra.mxu1 %v9500_v13 }
 0x1b3   : > { %7447 = vmatprep.subr.bf16.mxu0 %v12626_v10  ;;  %7472 = vmatprep.subr.bf16.mxu1 %v12613_v54 }
 0x1b6   : > { %7449 = vmatpush1.bf16.msra.mxu0 %v12627_v18  ;;  %7474 = vmatpush3.bf16.msra.mxu1 %v12628_v19 }
 0x1b7   : > { %7451 = vmatprep.subr.bf16.mxu0 %v12629_v26  ;;  %7475 = vmatprep.subr.bf16.mxu1 %v12613_v54 }
 0x1ba   : > { %7453 = vmatpush1.bf16.msra.mxu0 %v12630_v27  ;;  %7477 = vmatpush3.bf16.msra.mxu1 %v12631_v35 }
 0x1bb   : > { %7479 = vmatprep.subr.bf16.mxu0 %v12632_v36  ;;  %7510 = vmatprep.subr.bf16.mxu1 %v12613_v54 }
 0x230   : > { %v1123_v42 = vpop.f32.mrb[10].mxu1 }
 0x231   : > { %v6363_v46 = vpop.f32.mrb[11].mxu1  ;;  %v1124_v28 = vadd.f32 %v1123_v42, %v9925_v3 }
 0x250   : > { %v1257_v14 = vpop.f32.mrb[16].mxu0  ;;  %v1328_v21 = vpop.f32.mrb[12].mxu1 }
 0x251   : > { %v8575_v24 = vadd.f32 %v9915_v11, %v1257_v14  ;;  %v1259_v25 = vpop.f32.mrb[17].mxu0  ;;  %v6398_v31 = vpop.f32.mrb[13].mxu1  ;;  %v1329_v12 = vadd.f32 %v1328_v21, %v9922_v59  ;;  %v12637_v21 = vld [vmem:[#allocation21_spill] sm:$0xff] }
 0x252   : > { %v8577_v39 = vadd.f32 %v9917_v16, %v1259_v25  ;;  %v12640_v25 = vld [vmem:[#allocation24_spill] sm:$0xff]  ;;  %v12643_v31 = vld [vmem:[#allocation27_spill] sm:$0xff] }
 0x253   : > { %v5779_v34 = vmul.f32 -1.442695, %v8575_v24  ;;  %v12639_v24 = vld [vmem:[#allocation23_spill] sm:$0xff] }
 0x254   : > { %v5780_v45 = vmul.f32 -1.442695, %v8577_v39  ;;  %v12645_v39 = vld [vmem:[#allocation29_spill] sm:$0xff] }
 0x255   : > { %8676 = vpow2.f32 %v5779_v34  ;;  %v12644_v34 = vld [vmem:[#allocation28_spill] sm:$0xff] }
 0x256   : > { %8678 = vpow2.f32 %v5780_v45  ;;  %v12646_v45 = vld [vmem:[#allocation30_spill] sm:$0xff] }
 0x25f   : > { %v8677_v49 = vpop.eup %8676 }
 0x260   : > { %v1336_v53 = vadd.f32 1.0, %v8677_v49  ;;  %v8679_v61 = vpop.eup %8678  ;;  %v12647_v49 = vld [vmem:[#allocation31_spill] sm:$0xff] }
 0x261   : > { %v1343_v9 = vadd.f32 1.0, %v8679_v61  ;;  %v12649_v61 = vld [vmem:[#allocation33_spill] sm:$0xff] }
 0x262   : > { %8680 = vrcp.f32 %v1336_v53  ;;  %v12648_v53 = vld [vmem:[#allocation32_spill] sm:$0xff] }
 0x263   : > { %8682 = vrcp.f32 %v1343_v9  ;;  %v12650_v9 = vld [vmem:[#allocation34_spill] sm:$0xff] }
 0x26c   : > { %v8681_v17 = vpop.eup %8680 }
 0x26d   : > { %v1346_v32 = vmul.f32 %v8681_v17, %v1329_v12  ;;  %v8683_v37 = vpop.eup %8682  ;;  %v1981_v12 = vld [vmem:[%s12482_s3 + $0x8] sm:$0xff]  ;;  %v1984_v17 = vld [vmem:[%s12482_s3 + $0x20] sm:$0xff] }
 0x26e   : > { %v1349_v29 = vsub.f32 1.0, %v8683_v37  ;;  %v1351_v10 = vmul.f32 %v8683_v37, %v9827_v0 }
 0x26f   : > { %v1347_v38 = vadd.f32 %v1346_v32, %v1124_v28  ;;  %v1983_v28 = vld [vmem:[%s12482_s3 + $0x18] sm:$0xff]  ;;  %v1990_v32 = vld [vmem:[%s12482_s3 + $0x50] sm:$0xff] }
 0x270   : > { %v1475_v48 = vpop.f32.mrb[2].mxu0  ;;  %v1546_v51 = vpop.f32.mrb[14].mxu1 }
 0x271   : > { %8684 = vtanh.f32 %v1347_v38  ;;  %v8547_v1 = vadd.f32 %v12635_v58, %v1475_v48  ;;  %v1477_v13 = vpop.f32.mrb[3].mxu0  ;;  %v6433_v60 = vpop.f32.mrb[15].mxu1  ;;  %v1547_v42 = vadd.f32 %v1546_v51, %v9602_v20  ;;  %v1986_v51 = vld [vmem:[%s12482_s3 + $0x30] sm:$0xff] }
 0x272   : > { %v8549_v23 = vadd.f32 %v9597_v43, %v1477_v13  ;;  %v1991_v13 = vld [vmem:[%s12482_s3 + $0x58] sm:$0xff]  ;;  %v1993_v60 = vld [vmem:[%s12482_s3 + $0x68] sm:$0xff] }
 0x273   : > { %v5781_v15 = vmul.f32 -1.442695, %v8547_v1 }
 0x274   : > { %v5782_v22 = vmul.f32 -1.442695, %v8549_v23 }
 0x275   : > { %8686 = vpow2.f32 %v5781_v15  ;;  %v1996_v15 = vld [vmem:[%s12482_s3 + $0x80] sm:$0xff] }
 0x276   : > { %8688 = vpow2.f32 %v5782_v22  ;;  %v1992_v22 = vld [vmem:[%s12482_s3 + $0x60] sm:$0xff] }
 0x27b   : > { %v8685_v55 = vpop.eup %8684 }
 0x27c   : > { %v1350_v18 = vmul.f32 %v8685_v55, %v1349_v29  ;;  %v10041_v29 = vpack.c.bf16 %v1996_v15, %v1993_v60  ;;  %v1995_v55 = vld [vmem:[%s12482_s3 + $0x78] sm:$0xff]  ;;  %v2022_v60 = vld [vmem:[%s12482_s3 + $0x150] sm:$0xff] }
 0x27e   : > { %v9932_v19 = vadd.f32 %v1351_v10, %v1350_v18  ;;  %v1994_v10 = vld [vmem:[%s12482_s3 + $0x70] sm:$0xff]  ;;  %v1997_v18 = vld [vmem:[%s12482_s3 + $0x88] sm:$0xff] }
 0x27f   : > { %v8687_v26 = vpop.eup %8686 }
 0x280   : > { %1355 = vst [vmem:[%s8930_s20] sm:$0xff] %v9932_v19  ;;  %v1554_v27 = vadd.f32 1.0, %v8687_v26  ;;  %v8689_v35 = vpop.eup %8688  ;;  %v1999_v26 = vld [vmem:[%s12482_s3 + $0x98] sm:$0xff] }
 0x281   : > { %v1561_v36 = vadd.f32 1.0, %v8689_v35  ;;  %v10063_v35 = vpack.c.bf16 %v1995_v55, %v1992_v22  ;;  %v2025_v22 = vld [vmem:[%s12482_s3 + $0x168] sm:$0xff]  ;;  %v2024_v55 = vld [vmem:[%s12482_s3 + $0x160] sm:$0xff] }
 0x282   : > { %8690 = vrcp.f32 %v1554_v27  ;;  %v2002_v27 = vld [vmem:[%s12482_s3 + $0xb0] sm:$0xff] }
 0x283   : > { %8692 = vrcp.f32 %v1561_v36  ;;  %v10065_v36 = vpack.c.bf16 %v1997_v18, %v1994_v10  ;;  %v2027_v10 = vld [vmem:[%s12482_s3 + $0x178] sm:$0xff]  ;;  %v10197_v18 = vpack.c.bf16 %v2025_v22, %v2022_v60  ;;  %v2208_v60 = vld [vmem:[%s12484_s5 + $0x88] sm:$0xff] }
 0x28c   : > { %v8691_v46 = vpop.eup %8690 }
 0x28d   : > { %v1564_v47 = vmul.f32 %v8691_v46, %v1547_v42  ;;  %v8693_v0 = vpop.eup %8692  ;;  %v1998_v42 = vld [vmem:[%s12482_s3 + $0x90] sm:$0xff]  ;;  %v10072_v46 = vpack.c.bf16 %v2002_v27, %v1999_v26  ;;  %v10199_v26 = vpack.c.bf16 %v2027_v10, %v2024_v55  ;;  %v2192_v27 = vld [vmem:[%s12484_s5 + $0x8] sm:$0xff]  ;;  %v2210_v55 = vld [vmem:[%s12484_s5 + $0x98] sm:$0xff] }
 0x28e   : > { %v1567_v57 = vsub.f32 1.0, %v8693_v0  ;;  %v1569_v4 = vmul.f32 %v8693_v0, %v9631_v44  ;;  %v12638_v44 = vld [vmem:[#allocation22_spill] sm:$0xff]  ;;  %v2005_v0 = vld [vmem:[%s12482_s3 + $0xc8] sm:$0xff]  ;;  %v2213_v10 = vld [vmem:[%s12484_s5 + $0xb0] sm:$0xff] }
 0x28f   : > { %v1565_v56 = vadd.f32 %v1564_v47, %v12636_v52  ;;  %v2001_v47 = vld [vmem:[%s12482_s3 + $0xa8] sm:$0xff]  ;;  %v2000_v52 = vld [vmem:[%s12482_s3 + $0xa0] sm:$0xff] }
 0x291   : > { %8694 = vtanh.f32 %v1565_v56  ;;  %v2003_v56 = vld [vmem:[%s12482_s3 + $0xb8] sm:$0xff] }
 0x29b   : > { %v8695_v62 = vpop.eup %8694 }
 0x29c   : > { %v1568_v2 = vmul.f32 %v8695_v62, %v1567_v57  ;;  %v2008_v57 = vld [vmem:[%s12482_s3 + $0xe0] sm:$0xff]  ;;  %v10091_v62 = vpack.c.bf16 %v2001_v47, %v1998_v42 }
 0x29d   : > { %v2195_v42 = vld [vmem:[%s12484_s5 + $0x20] sm:$0xff] }
 0x29e   : > { %v9939_v14 = vadd.f32 %v1569_v4, %v1568_v2  ;;  %v10093_v2 = vpack.c.bf16 %v2003_v56, %v2000_v52  ;;  %v2004_v4 = vld [vmem:[%s12482_s3 + $0xc0] sm:$0xff]  ;;  %v10217_v47 = vpack.c.bf16 %v2195_v42, %v2192_v27  ;;  %v2194_v56 = vld [vmem:[%s12484_s5 + $0x18] sm:$0xff]  ;;  %v10300_v27 = vpack.c.bf16 %v2213_v10, %v2210_v55  ;;  %v2209_v42 = vld [vmem:[%s12484_s5 + $0x90] sm:$0xff] }
 0x29f   : > { %v2191_v52 = vld [vmem:[%s12484_s5] sm:$0xff]  ;;  %v2221_v10 = vld [vmem:[%s12484_s5 + $0xf0] sm:$0xff] }
 0x2a0   : > { %1685 = vmatmul.mubr.f32.vlgmr.msra.gmra.mrb[18].mxu0 %v9939_v14  ;;  %6467 = vmatmul.mubr.f32.vlgmr.msra.gmra.mrb[16].mxu1 %v9939_v14 }
 0x2a1   : > { %7481 = vmatpush1.bf16.msra.mxu0 %v9624_v8  ;;  %7512 = vmatpush3.bf16.msra.mxu1 %v9626_v7  ;;  %v12641_v8 = vld [vmem:[#allocation25_spill] sm:$0xff]  ;;  %v12642_v7 = vld [vmem:[#allocation26_spill] sm:$0xff] }
 0x2a2   : > { %7483 = vmatprep.subr.bf16.mxu0 %v12637_v21  ;;  %7513 = vmatprep.subr.bf16.mxu1 %v12613_v54  ;;  %v10100_v21 = vpack.c.bf16 %v2008_v57, %v2005_v0  ;;  %v2193_v0 = vld [vmem:[%s12484_s5 + $0x10] sm:$0xff]  ;;  %v10228_v57 = vpack.c.bf16 %v2194_v56, %v2191_v52  ;;  %v2212_v52 = vld [vmem:[%s12484_s5 + $0xa8] sm:$0xff]  ;;  %v2211_v56 = vld [vmem:[%s12484_s5 + $0xa0] sm:$0xff] }
 0x2a3   : > { %1873 = vmatprep.mubr.f32.mxu0 %v12615_v30  ;;  %6501 = vmatprep.mubr.msk.f32.mxu1 %vm8853_vm0, %v12615_v30 }
 0x2a5   : > { %7485 = vmatpush1.bf16.msra.mxu0 %v12638_v44  ;;  %7515 = vmatpush3.bf16.msra.mxu1 %v12639_v24  ;;  %v2007_v44 = vld [vmem:[%s12482_s3 + $0xd8] sm:$0xff]  ;;  %v2006_v24 = vld [vmem:[%s12482_s3 + $0xd0] sm:$0xff] }
 0x2a6   : > { %7487 = vmatprep.subr.bf16.mxu0 %v12640_v25  ;;  %7516 = vmatprep.subr.bf16.mxu1 %v12613_v54  ;;  %v2009_v25 = vld [vmem:[%s12482_s3 + $0xe8] sm:$0xff] }
 0x2a9   : > { %7489 = vmatpush1.bf16.msra.mxu0 %v12641_v8  ;;  %7518 = vmatpush3.bf16.msra.mxu1 %v12642_v7  ;;  %v2011_v8 = vld [vmem:[%s12482_s3 + $0xf8] sm:$0xff]  ;;  %v2014_v7 = vld [vmem:[%s12482_s3 + $0x110] sm:$0xff] }
 0x2aa   : > { %7491 = vmatprep.subr.bf16.mxu0 %v12643_v31  ;;  %7519 = vmatprep.subr.bf16.mxu1 %v12613_v54  ;;  %v10119_v31 = vpack.c.bf16 %v2007_v44, %v2004_v4  ;;  %v2196_v4 = vld [vmem:[%s12484_s5 + $0x28] sm:$0xff] }
 0x2ab   : > { %v10234_v44 = vpack.c.bf16 %v2196_v4, %v2193_v0  ;;  %v10312_v0 = vpack.c.bf16 %v2212_v52, %v2209_v42  ;;  %v2214_v4 = vld [vmem:[%s12484_s5 + $0xb8] sm:$0xff]  ;;  %v2224_v42 = vld [vmem:[%s12484_s5 + $0x108] sm:$0xff]  ;;  %v2223_v52 = vld [vmem:[%s12484_s5 + $0x100] sm:$0xff] }
 0x2ad   : > { %7493 = vmatpush1.bf16.msra.mxu0 %v12644_v34  ;;  %7521 = vmatpush3.bf16.msra.mxu1 %v12645_v39  ;;  %v10121_v34 = vpack.c.bf16 %v2009_v25, %v2006_v24  ;;  %v2010_v39 = vld [vmem:[%s12482_s3 + $0xf0] sm:$0xff]  ;;  %v2198_v24 = vld [vmem:[%s12484_s5 + $0x38] sm:$0xff] }
 0x2ae   : > { %7495 = vmatprep.subr.bf16.mxu0 %v12646_v45  ;;  %7522 = vmatprep.subr.bf16.mxu1 %v12613_v54  ;;  %v10128_v45 = vpack.c.bf16 %v2014_v7, %v2011_v8  ;;  %v2201_v25 = vld [vmem:[%s12484_s5 + $0x50] sm:$0xff] }
 0x2af   : > { %v10244_v8 = vpack.c.bf16 %v2201_v25, %v2198_v24  ;;  %v2197_v7 = vld [vmem:[%s12484_s5 + $0x30] sm:$0xff]  ;;  %v10318_v24 = vpack.c.bf16 %v2214_v4, %v2211_v56  ;;  %v2216_v25 = vld [vmem:[%s12484_s5 + $0xc8] sm:$0xff]  ;;  %v10368_v56 = vpack.c.bf16 %v2224_v42, %v2221_v10  ;;  %v2226_v4 = vld [vmem:[%s12484_s5 + $0x118] sm:$0xff] }
 0x2b0   : > { %v2232_v10 = vld [vmem:[%s12484_s5 + $0x148] sm:$0xff]  ;;  %v2234_v42 = vld [vmem:[%s12484_s5 + $0x158] sm:$0xff] }
 0x2b1   : > { %7497 = vmatpush1.bf16.msra.mxu0 %v12647_v49  ;;  %7524 = vmatpush3.bf16.msra.mxu1 %v12648_v53  ;;  %v2013_v49 = vld [vmem:[%s12482_s3 + $0x108] sm:$0xff]  ;;  %v2012_v53 = vld [vmem:[%s12482_s3 + $0x100] sm:$0xff]  ;;  %12655 = vst [vmem:[#allocation10_spill] sm:$0xff] %v10368_v56 }
 0x2b2   : > { %7499 = vmatprep.subr.bf16.mxu0 %v12649_v61  ;;  %7525 = vmatprep.subr.bf16.mxu1 %v12613_v54  ;;  %v2015_v61 = vld [vmem:[%s12482_s3 + $0x118] sm:$0xff] }
 0x2b5   : > { %7501 = vmatpush1.bf16.msra.mxu0 %v12650_v9  ;;  %7527 = vmatpush3.bf16.msra.mxu1 %v9771_v63  ;;  %v1980_v63 = vld [vmem:[%s12482_s3] sm:$0xff]  ;;  %v2017_v9 = vld [vmem:[%s12482_s3 + $0x128] sm:$0xff] }
 0x2b6   : > { %7503 = vmatprep.subr.bf16.mxu0 %v9778_v5  ;;  %7528 = vmatprep.subr.bf16.mxu1 %v12613_v54  ;;  %v9983_v5 = vpack.c.bf16 %v1984_v17, %v1981_v12  ;;  %v10002_v38 = vpack.c.bf16 %v1983_v28, %v1980_v63  ;;  %v2020_v12 = vld [vmem:[%s12482_s3 + $0x140] sm:$0xff]  ;;  %v10147_v17 = vpack.c.bf16 %v2013_v49, %v2010_v39  ;;  %v2200_v39 = vld [vmem:[%s12484_s5 + $0x48] sm:$0xff] }
 0x2b7   : > { %v10149_v63 = vpack.c.bf16 %v2015_v61, %v2012_v53  ;;  %v2016_v28 = vld [vmem:[%s12482_s3 + $0x120] sm:$0xff]  ;;  %v10256_v53 = vpack.c.bf16 %v2200_v39, %v2197_v7  ;;  %v2202_v61 = vld [vmem:[%s12484_s5 + $0x58] sm:$0xff] }
 0x2b8   : > { %v2199_v49 = vld [vmem:[%s12484_s5 + $0x40] sm:$0xff] }
 0x2b9   : > { %7505 = vmatpush1.bf16.msra.mxu0 %v9797_v40  ;;  %7530 = vmatpush3.bf16.msra.mxu1 %v9799_v6  ;;  %v1982_v40 = vld [vmem:[%s12482_s3 + $0x10] sm:$0xff]  ;;  %v1985_v6 = vld [vmem:[%s12482_s3 + $0x28] sm:$0xff]  ;;  %v2219_v7 = vld [vmem:[%s12484_s5 + $0xe0] sm:$0xff] }
 0x2ba   : > { %7507 = vmatprep.subr.bf16.mxu0 %v9806_v33  ;;  %7531 = vmatprep.subr.bf16.mxu1 %v12613_v54  ;;  %v1987_v33 = vld [vmem:[%s12482_s3 + $0x38] sm:$0xff]  ;;  %v10004_v48 = vpack.c.bf16 %v1985_v6, %v1982_v40  ;;  %v10156_v40 = vpack.c.bf16 %v2020_v12, %v2017_v9  ;;  %v10262_v9 = vpack.c.bf16 %v2202_v61, %v2199_v49  ;;  %v2204_v12 = vld [vmem:[%s12484_s5 + $0x68] sm:$0xff]  ;;  %v2215_v49 = vld [vmem:[%s12484_s5 + $0xc0] sm:$0xff] }
 0x2bb   : > { %v10011_v1 = vpack.c.bf16 %v1990_v32, %v1987_v33  ;;  %v2019_v6 = vld [vmem:[%s12482_s3 + $0x138] sm:$0xff]  ;;  %v2018_v33 = vld [vmem:[%s12482_s3 + $0x130] sm:$0xff]  ;;  %v2021_v32 = vld [vmem:[%s12482_s3 + $0x148] sm:$0xff]  ;;  %v10328_v39 = vpack.c.bf16 %v2219_v7, %v2216_v25 }
 0x2bc   : > { %v2218_v61 = vld [vmem:[%s12484_s5 + $0xd8] sm:$0xff]  ;;  %v2228_v25 = vld [vmem:[%s12484_s5 + $0x128] sm:$0xff]  ;;  %v2231_v7 = vld [vmem:[%s12484_s5 + $0x140] sm:$0xff] }
 0x2bd   : > { %7509 = vmatpush1.bf16.msra.mxu0 %v9819_v50  ;;  %7533 = vmatpush3.bf16.msra.mxu1 %v9821_v41  ;;  %v1989_v50 = vld [vmem:[%s12482_s3 + $0x48] sm:$0xff]  ;;  %v1988_v41 = vld [vmem:[%s12482_s3 + $0x40] sm:$0xff]  ;;  %12651 = vst [vmem:[#allocation6_spill] sm:$0xff] %v10328_v39 }
 0x2be   : > { %7535 = vmatprep.subr.bf16.mxu0 %v9983_v5  ;;  %7566 = vmatprep.subr.bf16.mxu1 %v12613_v54  ;;  %v10032_v23 = vpack.c.bf16 %v1989_v50, %v1986_v51  ;;  %v10034_v37 = vpack.c.bf16 %v1991_v13, %v1988_v41  ;;  %v2023_v51 = vld [vmem:[%s12482_s3 + $0x158] sm:$0xff]  ;;  %v2026_v50 = vld [vmem:[%s12482_s3 + $0x170] sm:$0xff]  ;;  %v10175_v41 = vpack.c.bf16 %v2019_v6, %v2016_v28  ;;  %v2207_v28 = vld [vmem:[%s12484_s5 + $0x80] sm:$0xff] }
 0x2bf   : > { %v10177_v13 = vpack.c.bf16 %v2021_v32, %v2018_v33  ;;  %v10184_v15 = vpack.c.bf16 %v2026_v50, %v2023_v51  ;;  %v10272_v6 = vpack.c.bf16 %v2207_v28, %v2204_v12  ;;  %v2203_v33 = vld [vmem:[%s12484_s5 + $0x60] sm:$0xff]  ;;  %v2206_v32 = vld [vmem:[%s12484_s5 + $0x78] sm:$0xff]  ;;  %v2205_v51 = vld [vmem:[%s12484_s5 + $0x70] sm:$0xff]  ;;  %v10340_v28 = vpack.c.bf16 %v2218_v61, %v2215_v49 }
 0x2c0   : > { %1874 = vmatmul.mubr.f32.vlgmr.msra.gmra.mrb[18].mxu0 %v9932_v19  ;;  %6502 = vmatmul.mubr.f32.vlgmr.msra.gmra.mrb[18].mxu1 %v9932_v19  ;;  %v10284_v50 = vpack.c.bf16 %v2206_v32, %v2203_v33  ;;  %v10290_v22 = vpack.c.bf16 %v2208_v60, %v2205_v51  ;;  %v2217_v12 = vld [vmem:[%s12484_s5 + $0xd0] sm:$0xff]  ;;  %v2220_v33 = vld [vmem:[%s12484_s5 + $0xe8] sm:$0xff]  ;;  %v2222_v51 = vld [vmem:[%s12484_s5 + $0xf8] sm:$0xff]  ;;  %v10380_v49 = vpack.c.bf16 %v2226_v4, %v2223_v52 }
 0x2c1   : > { %7537 = vmatpush1.bf16.msra.mxu0 %v10002_v38  ;;  %7568 = vmatpush3.bf16.msra.mxu1 %v10004_v48  ;;  %12652 = vst [vmem:[#allocation7_spill] sm:$0xff] %v10340_v28  ;;  %v10346_v32 = vpack.c.bf16 %v2220_v33, %v2217_v12  ;;  %v2225_v60 = vld [vmem:[%s12484_s5 + $0x110] sm:$0xff]  ;;  %v10382_v61 = vpack.c.bf16 %v2231_v7, %v2228_v25  ;;  %v2227_v12 = vld [vmem:[%s12484_s5 + $0x120] sm:$0xff]  ;;  %v2230_v33 = vld [vmem:[%s12484_s5 + $0x138] sm:$0xff] }
 0x2c2   : > { %7539 = vmatprep.subr.bf16.mxu0 %v10011_v1  ;;  %7569 = vmatprep.subr.bf16.mxu1 %v12613_v54  ;;  %v10356_v55 = vpack.c.bf16 %v2225_v60, %v2222_v51  ;;  %12656 = vst [vmem:[#allocation11_spill] sm:$0xff] %v10380_v49  ;;  %v2229_v51 = vld [vmem:[%s12484_s5 + $0x130] sm:$0xff]  ;;  %v10394_v60 = vpack.c.bf16 %v2230_v33, %v2227_v12  ;;  %v2236_v12 = vld [vmem:[%s12484_s5 + $0x168] sm:$0xff]  ;;  %v2235_v33 = vld [vmem:[%s12484_s5 + $0x160] sm:$0xff] }
 0x2c3   : > { %2092 = vmatprep.mubr.f32.mxu0 %v12615_v30  ;;  %6536 = vmatprep.mubr.msk.f32.mxu1 %vm8853_vm0, %v12615_v30  ;;  %12653 = vst [vmem:[#allocation8_spill] sm:$0xff] %v10346_v32  ;;  %12657 = vst [vmem:[#allocation17_spill] sm:$0xff] %v10382_v61  ;;  %v2237_v52 = vld [vmem:[%s12484_s5 + $0x170] sm:$0xff]  ;;  %v10407_v4 = vpack.c.bf16 %v2232_v10, %v2229_v51  ;;  %v2238_v51 = vld [vmem:[%s12484_s5 + $0x178] sm:$0xff] }
 0x2c4   : > { %12654 = vst [vmem:[#allocation9_spill] sm:$0xff] %v10356_v55  ;;  %12658 = vst [vmem:[#allocation20_spill] sm:$0xff] %v10394_v60  ;;  %v10409_v25 = vpack.c.bf16 %v2237_v52, %v2234_v42  ;;  %v2233_v7 = vld [vmem:[%s12484_s5 + $0x150] sm:$0xff]  ;;  %v2381_v10 = vld [vmem:[%s12486_s7 + $0x8] sm:$0xff] }
 0x2c5   : > { %7541 = vmatpush1.bf16.msra.mxu0 %v10032_v23  ;;  %7571 = vmatpush3.bf16.msra.mxu1 %v10034_v37  ;;  %12659 = vst [vmem:[#allocation12_spill] sm:$0xff] %v10407_v4  ;;  %v2384_v42 = vld [vmem:[%s12486_s7 + $0x20] sm:$0xff]  ;;  %v10431_v52 = vpack.c.bf16 %v2236_v12, %v2233_v7 }
 0x2c6   : > { %7543 = vmatprep.subr.bf16.mxu0 %v10041_v29  ;;  %7572 = vmatprep.subr.bf16.mxu1 %v12613_v54  ;;  %12660 = vst [vmem:[#allocation21_spill] sm:$0xff] %v10409_v25 }
 0x2c7   : > { %12661 = vst [vmem:[#allocation22_spill] sm:$0xff] %v10431_v52 }
 0x2c9   : > { %7545 = vmatpush1.bf16.msra.mxu0 %v10063_v35  ;;  %7574 = vmatpush3.bf16.msra.mxu1 %v10065_v36 }
 0x2ca   : > { %7547 = vmatprep.subr.bf16.mxu0 %v10072_v46  ;;  %7575 = vmatprep.subr.bf16.mxu1 %v12613_v54 }
 0x2cd   : > { %7549 = vmatpush1.bf16.msra.mxu0 %v10091_v62  ;;  %7577 = vmatpush3.bf16.msra.mxu1 %v10093_v2 }
 0x2ce   : > { %7551 = vmatprep.subr.bf16.mxu0 %v10100_v21  ;;  %7578 = vmatprep.subr.bf16.mxu1 %v12613_v54 }
 0x2d1   : > { %7553 = vmatpush1.bf16.msra.mxu0 %v10119_v31  ;;  %7580 = vmatpush3.bf16.msra.mxu1 %v10121_v34 }
 0x2d2   : > { %7555 = vmatprep.subr.bf16.mxu0 %v10128_v45  ;;  %7581 = vmatprep.subr.bf16.mxu1 %v12613_v54 }
 0x2d5   : > { %7557 = vmatpush1.bf16.msra.mxu0 %v10147_v17  ;;  %7583 = vmatpush3.bf16.msra.mxu1 %v10149_v63 }
 0x2d6   : > { %7559 = vmatprep.subr.bf16.mxu0 %v10156_v40  ;;  %7584 = vmatprep.subr.bf16.mxu1 %v12613_v54 }
 0x2d9   : > { %7561 = vmatpush1.bf16.msra.mxu0 %v10175_v41  ;;  %7586 = vmatpush3.bf16.msra.mxu1 %v10177_v13 }
 0x2da   : > { %7563 = vmatprep.subr.bf16.mxu0 %v10184_v15  ;;  %7587 = vmatprep.subr.bf16.mxu1 %v12613_v54 }
 0x2dd   : > { %7565 = vmatpush1.bf16.msra.mxu0 %v10197_v18  ;;  %7589 = vmatpush3.bf16.msra.mxu1 %v10199_v26 }
 0x2de   : > { %7622 = vmatprep.subr.bf16.mxu1 %v12613_v54  ;;  %7591 = vmatprep.subr.bf16.mxu0 %v10217_v47 }
 0x2e0   : > { %2093 = vmatmul.mubr.f32.vlgmr.msra.gmra.mrb[4].mxu0 %v9939_v14  ;;  %6537 = vmatmul.mubr.f32.vlgmr.msra.gmra.mrb[20].mxu1 %v9939_v14 }
 0x2e1   : > { %2303 = vmatprep.mubr.f32.mxu0 %v12615_v30  ;;  %6571 = vmatprep.mubr.msk.f32.mxu1 %vm8853_vm0, %v12615_v30 }
 0x2e2   : > { %7593 = vmatpush1.bf16.msra.mxu0 %v10228_v57  ;;  %7624 = vmatpush3.bf16.msra.mxu1 %v10234_v44 }
 0x2e3   : > { %7625 = vmatprep.subr.bf16.mxu1 %v12613_v54  ;;  %7595 = vmatprep.subr.bf16.mxu0 %v10244_v8 }
 0x2e6   : > { %7597 = vmatpush1.bf16.msra.mxu0 %v10256_v53  ;;  %7627 = vmatpush3.bf16.msra.mxu1 %v10262_v9 }
 0x2e7   : > { %7628 = vmatprep.subr.bf16.mxu1 %v12613_v54  ;;  %7599 = vmatprep.subr.bf16.mxu0 %v10272_v6 }
 0x2ea   : > { %7601 = vmatpush1.bf16.msra.mxu0 %v10284_v50  ;;  %7630 = vmatpush3.bf16.msra.mxu1 %v10290_v22 }
 0x2eb   : > { %7631 = vmatprep.subr.bf16.mxu1 %v12613_v54  ;;  %7603 = vmatprep.subr.bf16.mxu0 %v10300_v27 }
 0x2ee   : > { %7605 = vmatpush1.bf16.msra.mxu0 %v10312_v0  ;;  %7633 = vmatpush3.bf16.msra.mxu1 %v10318_v24 }
 0x2ef   : > { %7634 = vmatprep.subr.bf16.mxu1 %v12613_v54  ;;  %7607 = vmatprep.subr.bf16.mxu0 %v10328_v39 }
 0x2f2   : > { %7609 = vmatpush1.bf16.msra.mxu0 %v10340_v28  ;;  %7636 = vmatpush3.bf16.msra.mxu1 %v10346_v32 }
 0x2f3   : > { %7637 = vmatprep.subr.bf16.mxu1 %v12613_v54  ;;  %7611 = vmatprep.subr.bf16.mxu0 %v10356_v55 }
 0x2f6   : > { %7613 = vmatpush1.bf16.msra.mxu0 %v10368_v56  ;;  %7639 = vmatpush3.bf16.msra.mxu1 %v10380_v49  ;;  %v10437_v49 = vpack.c.bf16 %v2384_v42, %v2381_v10 }
 0x2f7   : > { %7615 = vmatprep.subr.bf16.mxu0 %v10382_v61  ;;  %7640 = vmatprep.subr.bf16.mxu1 %v12613_v54  ;;  %v10435_v61 = vpack.c.bf16 %v2238_v51, %v2235_v33 }
 0x2f8   : > { %12663 = vst [vmem:[#allocation24_spill] sm:$0xff] %v10437_v49 }
 0x2f9   : > { %12662 = vst [vmem:[#allocation23_spill] sm:$0xff] %v10435_v61 }
 0x2fa   : > { %7617 = vmatpush1.bf16.msra.mxu0 %v10394_v60  ;;  %7642 = vmatpush3.bf16.msra.mxu1 %v10407_v4 }
 0x2fb   : > { %7619 = vmatprep.subr.bf16.mxu0 %v10409_v25  ;;  %7643 = vmatprep.subr.bf16.mxu1 %v12613_v54 }
 0x2fe   : > { %7621 = vmatpush1.bf16.msra.mxu0 %v10431_v52  ;;  %7645 = vmatpush3.bf16.msra.mxu1 %v10435_v61 }
 0x2ff   : > { %7647 = vmatprep.subr.bf16.mxu0 %v10437_v49  ;;  %7678 = vmatprep.subr.bf16.mxu1 %v12613_v54 }
 0x373   : > { %v1757_v7 = vpop.f32.mrb[16].mxu1 }
 0x374   : > { %v6468_v12 = vpop.f32.mrb[17].mxu1  ;;  %v1758_v28 = vadd.f32 %v1757_v7, %v9925_v3 }
 0x393   : > { %v1875_v60 = vpop.f32.mrb[18].mxu0  ;;  %v1946_v4 = vpop.f32.mrb[18].mxu1 }
 0x394   : > { %v8579_v25 = vadd.f32 %v9915_v11, %v1875_v60  ;;  %v1877_v33 = vpop.f32.mrb[19].mxu0  ;;  %v6503_v51 = vpop.f32.mrb[19].mxu1  ;;  %v1947_v32 = vadd.f32 %v1946_v4, %v9922_v59 }
 0x395   : > { %v8581_v42 = vadd.f32 %v9917_v16, %v1877_v33 }
 0x396   : > { %v5783_v10 = vmul.f32 -1.442695, %v8579_v25 }
 0x397   : > { %v5784_v56 = vmul.f32 -1.442695, %v8581_v42 }
 0x398   : > { %8696 = vpow2.f32 %v5783_v10 }
 0x399   : > { %8698 = vpow2.f32 %v5784_v56 }
 0x3a2   : > { %v8697_v52 = vpop.eup %8696 }
 0x3a3   : > { %v1954_v61 = vadd.f32 1.0, %v8697_v52  ;;  %v8699_v49 = vpop.eup %8698 }
 0x3a4   : > { %v1961_v55 = vadd.f32 1.0, %v8699_v49 }
 0x3a5   : > { %8700 = vrcp.f32 %v1954_v61 }
 0x3a6   : > { %8702 = vrcp.f32 %v1961_v55 }
 0x3af   : > { %v8701_v12 = vpop.eup %8700 }
 0x3b0   : > { %v1964_v39 = vmul.f32 %v8701_v12, %v1947_v32  ;;  %v8703_v49 = vpop.eup %8702 }
 0x3b1   : > { %v1967_v42 = vsub.f32 1.0, %v8703_v49  ;;  %v1969_v32 = vmul.f32 %v8703_v49, %v9932_v19  ;;  %v2380_v19 = vld [vmem:[%s12486_s7] sm:$0xff]  ;;  %v2383_v49 = vld [vmem:[%s12486_s7 + $0x18] sm:$0xff] }
 0x3b2   : > { %v1965_v60 = vadd.f32 %v1964_v39, %v1758_v28 }
 0x3b3   : > { %v2094_v51 = vpop.f32.mrb[4].mxu0  ;;  %v2165_v25 = vpop.f32.mrb[20].mxu1 }
 0x3b4   : > { %8704 = vtanh.f32 %v1965_v60  ;;  %v8551_v33 = vadd.f32 %v12635_v58, %v2094_v51  ;;  %v2096_v56 = vpop.f32.mrb[5].mxu0  ;;  %v6538_v10 = vpop.f32.mrb[21].mxu1  ;;  %v2166_v51 = vadd.f32 %v2165_v25, %v9602_v20  ;;  %v2382_v25 = vld [vmem:[%s12486_s7 + $0x10] sm:$0xff] }
 0x3b5   : > { %v8553_v61 = vadd.f32 %v9597_v43, %v2096_v56  ;;  %v12664_v10 = vld [vmem:[#allocation14_spill] sm:$0xff] }
 0x3b6   : > { %v5786_v52 = vmul.f32 -1.442695, %v8551_v33 }
 0x3b7   : > { %v5787_v4 = vmul.f32 -1.442695, %v8553_v61 }
 0x3b8   : > { %8706 = vpow2.f32 %v5786_v52 }
 0x3b9   : > { %8708 = vpow2.f32 %v5787_v4  ;;  %v2385_v4 = vld [vmem:[%s12486_s7 + $0x28] sm:$0xff] }
 0x3be   : > { %v8705_v59 = vpop.eup %8704 }
 0x3bf   : > { %v1968_v7 = vmul.f32 %v8705_v59, %v1967_v42 }
 0x3c1   : > { %v10451_v39 = vadd.f32 %v1969_v32, %v1968_v7  ;;  %v2387_v7 = vld [vmem:[%s12486_s7 + $0x38] sm:$0xff]  ;;  %v2390_v32 = vld [vmem:[%s12486_s7 + $0x50] sm:$0xff] }
 0x3c2   : > { %v8707_v28 = vpop.eup %8706 }
 0x3c3   : > { %5785 = vst [vmem:[%s8930_s20 + $0x8] sm:$0xff] %v10451_v39  ;;  %v2173_v55 = vadd.f32 1.0, %v8707_v28  ;;  %v8709_v12 = vpop.eup %8708 }
 0x3c4   : > { %v2180_v60 = vadd.f32 1.0, %v8709_v12  ;;  %v10476_v12 = vpack.c.bf16 %v2383_v49, %v2380_v19  ;;  %v2396_v19 = vld [vmem:[%s12486_s7 + $0x80] sm:$0xff] }
 0x3c5   : > { %8710 = vrcp.f32 %v2173_v55 }
 0x3c6   : > { %8712 = vrcp.f32 %v2180_v60  ;;  %v10478_v60 = vpack.c.bf16 %v2385_v4, %v2382_v25  ;;  %v2392_v25 = vld [vmem:[%s12486_s7 + $0x60] sm:$0xff] }
 0x3cf   : > { %v8711_v33 = vpop.eup %8710 }
 0x3d0   : > { %v2183_v56 = vmul.f32 %v8711_v33, %v2166_v51  ;;  %v8713_v59 = vpop.eup %8712  ;;  %v2386_v51 = vld [vmem:[%s12486_s7 + $0x30] sm:$0xff] }
 0x3d1   : > { %v2186_v61 = vsub.f32 1.0, %v8713_v59  ;;  %v2188_v55 = vmul.f32 %v8713_v59, %v9939_v14  ;;  %v2388_v14 = vld [vmem:[%s12486_s7 + $0x40] sm:$0xff]  ;;  %v2393_v59 = vld [vmem:[%s12486_s7 + $0x68] sm:$0xff] }
 0x3d2   : > { %v2184_v52 = vadd.f32 %v2183_v56, %v12664_v10  ;;  %v10485_v56 = vpack.c.bf16 %v2390_v32, %v2387_v7  ;;  %v2389_v10 = vld [vmem:[%s12486_s7 + $0x48] sm:$0xff]  ;;  %v10515_v4 = vpack.c.bf16 %v2396_v19, %v2393_v59  ;;  %v2394_v7 = vld [vmem:[%s12486_s7 + $0x70] sm:$0xff]  ;;  %v2400_v19 = vld [vmem:[%s12486_s7 + $0xa0] sm:$0xff] }
 0x3d3   : > { %v2397_v32 = vld [vmem:[%s12486_s7 + $0x88] sm:$0xff] }
 0x3d4   : > { %8714 = vtanh.f32 %v2184_v52  ;;  %v2391_v52 = vld [vmem:[%s12486_s7 + $0x58] sm:$0xff]  ;;  %12665 = vst [vmem:[#allocation25_spill] sm:$0xff] %v10515_v4  ;;  %v2401_v59 = vld [vmem:[%s12486_s7 + $0xa8] sm:$0xff] }
 0x3d5   : > { %v10508_v49 = vpack.c.bf16 %v2391_v52, %v2388_v14  ;;  %v2398_v14 = vld [vmem:[%s12486_s7 + $0x90] sm:$0xff] }
 0x3de   : > { %v8715_v42 = vpop.eup %8714 }
 0x3df   : > { %v2187_v28 = vmul.f32 %v8715_v42, %v2186_v61  ;;  %v10506_v61 = vpack.c.bf16 %v2389_v10, %v2386_v51  ;;  %v2395_v42 = vld [vmem:[%s12486_s7 + $0x78] sm:$0xff]  ;;  %v10539_v10 = vpack.c.bf16 %v2397_v32, %v2394_v7  ;;  %v2408_v7 = vld [vmem:[%s12486_s7 + $0xe0] sm:$0xff]  ;;  %v10565_v32 = vpack.c.bf16 %v2401_v59, %v2398_v14  ;;  %v2406_v14 = vld [vmem:[%s12486_s7 + $0xd0] sm:$0xff] }
 0x3e0   : > { %v10537_v51 = vpack.c.bf16 %v2395_v42, %v2392_v25  ;;  %v2403_v25 = vld [vmem:[%s12486_s7 + $0xb8] sm:$0xff]  ;;  %v2405_v42 = vld [vmem:[%s12486_s7 + $0xc8] sm:$0xff] }
 0x3e1   : > { %v10483_v33 = vadd.f32 %v2188_v55, %v2187_v28  ;;  %v2399_v28 = vld [vmem:[%s12486_s7 + $0x98] sm:$0xff]  ;;  %v2402_v55 = vld [vmem:[%s12486_s7 + $0xb0] sm:$0xff]  ;;  %12667 = vst [vmem:[#allocation27_spill] sm:$0xff] %v10539_v10  ;;  %12669 = vst [vmem:[#allocation29_spill] sm:$0xff] %v10565_v32 }
 0x3e2   : > { %12666 = vst [vmem:[#allocation26_spill] sm:$0xff] %v10537_v51  ;;  %v10546_v52 = vpack.c.bf16 %v2402_v55, %v2399_v28  ;;  %v10567_v28 = vpack.c.bf16 %v2403_v25, %v2400_v19  ;;  %v2404_v55 = vld [vmem:[%s12486_s7 + $0xc0] sm:$0xff]  ;;  %v2409_v59 = vld [vmem:[%s12486_s7 + $0xe8] sm:$0xff]  ;;  %v2411_v19 = vld [vmem:[%s12486_s7 + $0xf8] sm:$0xff] }
 0x3e3   : > { %2304 = vmatmul.mubr.f32.vlgmr.msra.gmra.mrb[20].mxu0 %v10483_v33  ;;  %6572 = vmatmul.mubr.f32.vlgmr.msra.gmra.mrb[22].mxu1 %v10483_v33  ;;  %v2414_v25 = vld [vmem:[%s12486_s7 + $0x110] sm:$0xff] }
 0x3e4   : > { %7649 = vmatpush1.bf16.msra.mxu0 %v10476_v12  ;;  %7680 = vmatpush3.bf16.msra.mxu1 %v10478_v60  ;;  %12668 = vst [vmem:[#allocation28_spill] sm:$0xff] %v10546_v52  ;;  %12670 = vst [vmem:[#allocation30_spill] sm:$0xff] %v10567_v28 }
 0x3e5   : > { %7651 = vmatprep.subr.bf16.mxu0 %v10485_v56  ;;  %7681 = vmatprep.subr.bf16.mxu1 %v12613_v54 }
 0x3e6   : > { %2492 = vmatprep.mubr.f32.mxu0 %v12615_v30  ;;  %6606 = vmatprep.mubr.msk.f32.mxu1 %vm8853_vm0, %v12615_v30 }
 0x3e8   : > { %7653 = vmatpush1.bf16.msra.mxu0 %v10506_v61  ;;  %7683 = vmatpush3.bf16.msra.mxu1 %v10508_v49 }
 0x3e9   : > { %7655 = vmatprep.subr.bf16.mxu0 %v10515_v4  ;;  %7684 = vmatprep.subr.bf16.mxu1 %v12613_v54  ;;  %v10574_v4 = vpack.c.bf16 %v2408_v7, %v2405_v42  ;;  %v10595_v7 = vpack.c.bf16 %v2409_v59, %v2406_v14  ;;  %v2417_v14 = vld [vmem:[%s12486_s7 + $0x128] sm:$0xff]  ;;  %v2420_v59 = vld [vmem:[%s12486_s7 + $0x140] sm:$0xff] }
 0x3eb   : > { %12671 = vst [vmem:[#allocation31_spill] sm:$0xff] %v10574_v4  ;;  %12673 = vst [vmem:[#allocation33_spill] sm:$0xff] %v10595_v7 }
 0x3ec   : > { %7657 = vmatpush1.bf16.msra.mxu0 %v10537_v51  ;;  %7686 = vmatpush3.bf16.msra.mxu1 %v10539_v10  ;;  %v2407_v51 = vld [vmem:[%s12486_s7 + $0xd8] sm:$0xff]  ;;  %v10602_v10 = vpack.c.bf16 %v2414_v25, %v2411_v19 }
 0x3ed   : > { %7659 = vmatprep.subr.bf16.mxu0 %v10546_v52  ;;  %7687 = vmatprep.subr.bf16.mxu1 %v12613_v54  ;;  %v10593_v42 = vpack.c.bf16 %v2407_v51, %v2404_v55  ;;  %v2410_v52 = vld [vmem:[%s12486_s7 + $0xf0] sm:$0xff]  ;;  %v2412_v51 = vld [vmem:[%s12486_s7 + $0x100] sm:$0xff]  ;;  %v2415_v55 = vld [vmem:[%s12486_s7 + $0x118] sm:$0xff] }
 0x3ee   : > { %12674 = vst [vmem:[#allocation34_spill] sm:$0xff] %v10602_v10  ;;  %v10623_v25 = vpack.c.bf16 %v2415_v55, %v2412_v51  ;;  %v2423_v51 = vld [vmem:[%s12486_s7 + $0x158] sm:$0xff]  ;;  %v2426_v55 = vld [vmem:[%s12486_s7 + $0x170] sm:$0xff] }
 0x3ef   : > { %12672 = vst [vmem:[#allocation32_spill] sm:$0xff] %v10593_v42 }
 0x3f0   : > { %7661 = vmatpush1.bf16.msra.mxu0 %v10565_v32  ;;  %7689 = vmatpush3.bf16.msra.mxu1 %v10567_v28  ;;  %v2413_v32 = vld [vmem:[%s12486_s7 + $0x108] sm:$0xff]  ;;  %v10630_v28 = vpack.c.bf16 %v2420_v59, %v2417_v14 }
 0x3f1   : > { %7663 = vmatprep.subr.bf16.mxu0 %v10574_v4  ;;  %7690 = vmatprep.subr.bf16.mxu1 %v12613_v54  ;;  %v10621_v19 = vpack.c.bf16 %v2413_v32, %v2410_v52  ;;  %v2416_v4 = vld [vmem:[%s12486_s7 + $0x120] sm:$0xff]  ;;  %v2418_v52 = vld [vmem:[%s12486_s7 + $0x130] sm:$0xff]  ;;  %v2421_v32 = vld [vmem:[%s12486_s7 + $0x148] sm:$0xff] }
 0x3f2   : > { %v10651_v59 = vpack.c.bf16 %v2421_v32, %v2418_v52 }
 0x3f3   : > { %12675 = vst [vmem:[#allocation14_spill] sm:$0xff] %v10621_v19 }
 0x3f4   : > { %7665 = vmatpush1.bf16.msra.mxu0 %v10593_v42  ;;  %7692 = vmatpush3.bf16.msra.mxu1 %v10595_v7  ;;  %v2419_v42 = vld [vmem:[%s12486_s7 + $0x138] sm:$0xff]  ;;  %v10658_v7 = vpack.c.bf16 %v2426_v55, %v2423_v51 }
 0x3f5   : > { %7667 = vmatprep.subr.bf16.mxu0 %v10602_v10  ;;  %7693 = vmatprep.subr.bf16.mxu1 %v12613_v54  ;;  %v10649_v14 = vpack.c.bf16 %v2419_v42, %v2416_v4  ;;  %v2422_v10 = vld [vmem:[%s12486_s7 + $0x150] sm:$0xff]  ;;  %v2424_v4 = vld [vmem:[%s12486_s7 + $0x160] sm:$0xff]  ;;  %v2427_v42 = vld [vmem:[%s12486_s7 + $0x178] sm:$0xff] }
 0x3f6   : > { %v10673_v32 = vpack.c.bf16 %v2427_v42, %v2424_v4 }
 0x3f8   : > { %7669 = vmatpush1.bf16.msra.mxu0 %v10621_v19  ;;  %7695 = vmatpush3.bf16.msra.mxu1 %v10623_v25  ;;  %v2425_v19 = vld [vmem:[%s12486_s7 + $0x168] sm:$0xff] }
 0x3f9   : > { %7671 = vmatprep.subr.bf16.mxu0 %v10630_v28  ;;  %7696 = vmatprep.subr.bf16.mxu1 %v12613_v54  ;;  %v10671_v52 = vpack.c.bf16 %v2425_v19, %v2422_v10 }
 0x3fc   : > { %7673 = vmatpush1.bf16.msra.mxu0 %v10649_v14  ;;  %7698 = vmatpush3.bf16.msra.mxu1 %v10651_v59 }
 0x3fd   : > { %7675 = vmatprep.subr.bf16.mxu0 %v10658_v7  ;;  %7699 = vmatprep.subr.bf16.mxu1 %v12613_v54 }
 0x400   : > { %7677 = vmatpush1.bf16.msra.mxu0 %v10671_v52  ;;  %7701 = vmatpush3.bf16.msra.mxu1 %v10673_v32 }
 0x401   : > { %7703 = vmatprep.subr.bf16.mxu0 %v9983_v5  ;;  %7734 = vmatprep.subr.bf16.mxu1 %v12613_v54  ;;  %v12676_v5 = vld [vmem:[#allocation6_spill] sm:$0xff] }
 0x403   : > { %2493 = vmatmul.mubr.f32.vlgmr.msra.gmra.mrb[20].mxu0 %v10451_v39  ;;  %6607 = vmatmul.mubr.f32.vlgmr.msra.gmra.mrb[24].mxu1 %v10451_v39 }
 0x404   : > { %7705 = vmatpush1.bf16.msra.mxu0 %v10002_v38  ;;  %7736 = vmatpush3.bf16.msra.mxu1 %v10004_v48  ;;  %v12677_v38 = vld [vmem:[#allocation7_spill] sm:$0xff]  ;;  %v12678_v48 = vld [vmem:[#allocation8_spill] sm:$0xff] }
 0x405   : > { %7707 = vmatprep.subr.bf16.mxu0 %v10011_v1  ;;  %7737 = vmatprep.subr.bf16.mxu1 %v12613_v54  ;;  %v12679_v1 = vld [vmem:[#allocation9_spill] sm:$0xff] }
 0x406   : > { %2711 = vmatprep.mubr.f32.mxu0 %v12615_v30  ;;  %6641 = vmatprep.mubr.msk.f32.mxu1 %vm8853_vm0, %v12615_v30 }
 0x408   : > { %7709 = vmatpush1.bf16.msra.mxu0 %v10032_v23  ;;  %7739 = vmatpush3.bf16.msra.mxu1 %v10034_v37  ;;  %v12680_v23 = vld [vmem:[#allocation10_spill] sm:$0xff]  ;;  %v12681_v37 = vld [vmem:[#allocation11_spill] sm:$0xff] }
 0x409   : > { %7711 = vmatprep.subr.bf16.mxu0 %v10041_v29  ;;  %7740 = vmatprep.subr.bf16.mxu1 %v12613_v54  ;;  %v12682_v29 = vld [vmem:[#allocation17_spill] sm:$0xff] }
 0x40c   : > { %7713 = vmatpush1.bf16.msra.mxu0 %v10063_v35  ;;  %7742 = vmatpush3.bf16.msra.mxu1 %v10065_v36  ;;  %v12683_v35 = vld [vmem:[#allocation20_spill] sm:$0xff] }
 0x40d   : > { %7715 = vmatprep.subr.bf16.mxu0 %v10072_v46  ;;  %7743 = vmatprep.subr.bf16.mxu1 %v12613_v54  ;;  %v12684_v36 = vld [vmem:[#allocation12_spill] sm:$0xff]  ;;  %v12685_v46 = vld [vmem:[#allocation21_spill] sm:$0xff] }
 0x410   : > { %7717 = vmatpush1.bf16.msra.mxu0 %v10091_v62  ;;  %7745 = vmatpush3.bf16.msra.mxu1 %v10093_v2  ;;  %v12686_v62 = vld [vmem:[#allocation22_spill] sm:$0xff]  ;;  %v12687_v2 = vld [vmem:[#allocation23_spill] sm:$0xff] }
 0x411   : > { %7719 = vmatprep.subr.bf16.mxu0 %v10100_v21  ;;  %7746 = vmatprep.subr.bf16.mxu1 %v12613_v54  ;;  %v12688_v21 = vld [vmem:[#allocation24_spill] sm:$0xff] }
 0x414   : > { %7721 = vmatpush1.bf16.msra.mxu0 %v10119_v31  ;;  %7748 = vmatpush3.bf16.msra.mxu1 %v10121_v34 }
 0x415   : > { %7723 = vmatprep.subr.bf16.mxu0 %v10128_v45  ;;  %7749 = vmatprep.subr.bf16.mxu1 %v12613_v54 }
 0x418   : > { %7725 = vmatpush1.bf16.msra.mxu0 %v10147_v17  ;;  %7751 = vmatpush3.bf16.msra.mxu1 %v10149_v63 }
 0x419   : > { %7727 = vmatprep.subr.bf16.mxu0 %v10156_v40  ;;  %7752 = vmatprep.subr.bf16.mxu1 %v12613_v54 }
 0x41c   : > { %7729 = vmatpush1.bf16.msra.mxu0 %v10175_v41  ;;  %7754 = vmatpush3.bf16.msra.mxu1 %v10177_v13 }
 0x41d   : > { %7731 = vmatprep.subr.bf16.mxu0 %v10184_v15  ;;  %7755 = vmatprep.subr.bf16.mxu1 %v12613_v54 }
 0x420   : > { %7733 = vmatpush1.bf16.msra.mxu0 %v10197_v18  ;;  %7757 = vmatpush3.bf16.msra.mxu1 %v10199_v26 }
 0x421   : > { %7759 = vmatprep.subr.bf16.mxu0 %v10217_v47  ;;  %7790 = vmatprep.subr.bf16.mxu1 %v12613_v54 }
 0x423   : > { %2712 = vmatmul.mubr.f32.vlgmr.msra.gmra.mrb[6].mxu0 %v10483_v33  ;;  %6642 = vmatmul.mubr.f32.vlgmr.msra.gmra.mrb[26].mxu1 %v10483_v33 }
 0x424   : > { %7761 = vmatpush1.bf16.msra.mxu0 %v10228_v57  ;;  %7792 = vmatpush3.bf16.msra.mxu1 %v10234_v44 }
 0x425   : > { %7763 = vmatprep.subr.bf16.mxu0 %v10244_v8  ;;  %7793 = vmatprep.subr.bf16.mxu1 %v12613_v54  ;;  %v12689_v8 = vld [vmem:[#allocation5_spill] sm:$0xff] }
 0x426   : > { %2922 = vmatprep.mubr.f32.mxu0 %v12615_v30  ;;  %6676 = vmatprep.mubr.msk.f32.mxu1 %vm8853_vm0, %v12615_v30 }
 0x428   : > { %7765 = vmatpush1.bf16.msra.mxu0 %v10256_v53  ;;  %7795 = vmatpush3.bf16.msra.mxu1 %v10262_v9 }
 0x429   : > { %7767 = vmatprep.subr.bf16.mxu0 %v10272_v6  ;;  %7796 = vmatprep.subr.bf16.mxu1 %v12613_v54 }
 0x42c   : > { %7769 = vmatpush1.bf16.msra.mxu0 %v10284_v50  ;;  %7798 = vmatpush3.bf16.msra.mxu1 %v10290_v22 }
 0x42d   : > { %7771 = vmatprep.subr.bf16.mxu0 %v10300_v27  ;;  %7799 = vmatprep.subr.bf16.mxu1 %v12613_v54 }
 0x430   : > { %7773 = vmatpush1.bf16.msra.mxu0 %v10312_v0  ;;  %7801 = vmatpush3.bf16.msra.mxu1 %v10318_v24 }
 0x431   : > { %7775 = vmatprep.subr.bf16.mxu0 %v12676_v5  ;;  %7802 = vmatprep.subr.bf16.mxu1 %v12613_v54 }
 0x434   : > { %7777 = vmatpush1.bf16.msra.mxu0 %v12677_v38  ;;  %7804 = vmatpush3.bf16.msra.mxu1 %v12678_v48 }
 0x435   : > { %7779 = vmatprep.subr.bf16.mxu0 %v12679_v1  ;;  %7805 = vmatprep.subr.bf16.mxu1 %v12613_v54 }
 0x438   : > { %7781 = vmatpush1.bf16.msra.mxu0 %v12680_v23  ;;  %7807 = vmatpush3.bf16.msra.mxu1 %v12681_v37 }
 0x439   : > { %7783 = vmatprep.subr.bf16.mxu0 %v12682_v29  ;;  %7808 = vmatprep.subr.bf16.mxu1 %v12613_v54 }
 0x43c   : > { %7785 = vmatpush1.bf16.msra.mxu0 %v12683_v35  ;;  %7810 = vmatpush3.bf16.msra.mxu1 %v12684_v36 }
 0x43d   : > { %7787 = vmatprep.subr.bf16.mxu0 %v12685_v46  ;;  %7811 = vmatprep.subr.bf16.mxu1 %v12613_v54 }
 0x440   : > { %7789 = vmatpush1.bf16.msra.mxu0 %v12686_v62  ;;  %7813 = vmatpush3.bf16.msra.mxu1 %v12687_v2 }
 0x441   : > { %7815 = vmatprep.subr.bf16.mxu0 %v12688_v21  ;;  %7846 = vmatprep.subr.bf16.mxu1 %v12613_v54  ;;  %v12690_v21 = vld [vmem:[#allocation13_spill] sm:$0xff] }
 0x4b6   : > { %v2376_v31 = vpop.f32.mrb[22].mxu1 }
 0x4b7   : > { %v6573_v34 = vpop.f32.mrb[23].mxu1  ;;  %v2377_v6 = vadd.f32 %v2376_v31, %v9925_v3 }
 0x4d6   : > { %v2494_v45 = vpop.f32.mrb[20].mxu0  ;;  %v2565_v17 = vpop.f32.mrb[24].mxu1 }
 0x4d7   : > { %v8583_v63 = vadd.f32 %v9915_v11, %v2494_v45  ;;  %v2496_v40 = vpop.f32.mrb[21].mxu0  ;;  %v6608_v41 = vpop.f32.mrb[25].mxu1  ;;  %v2566_v53 = vadd.f32 %v2565_v17, %v12689_v8 }
 0x4d8   : > { %v8585_v15 = vadd.f32 %v9917_v16, %v2496_v40  ;;  %v12695_v41 = vld [vmem:[#allocation29_spill] sm:$0xff] }
 0x4d9   : > { %v5788_v13 = vmul.f32 -1.442695, %v8583_v63 }
 0x4da   : > { %v5789_v18 = vmul.f32 -1.442695, %v8585_v15  ;;  %v12697_v15 = vld [vmem:[#allocation31_spill] sm:$0xff] }
 0x4db   : > { %8716 = vpow2.f32 %v5788_v13  ;;  %v12696_v13 = vld [vmem:[#allocation30_spill] sm:$0xff] }
 0x4dc   : > { %8718 = vpow2.f32 %v5789_v18  ;;  %v12700_v18 = vld [vmem:[#allocation34_spill] sm:$0xff] }
 0x4e5   : > { %v8717_v26 = vpop.eup %8716 }
 0x4e6   : > { %v2573_v47 = vadd.f32 1.0, %v8717_v26  ;;  %v8719_v57 = vpop.eup %8718  ;;  %v12701_v26 = vld [vmem:[#allocation14_spill] sm:$0xff] }
 0x4e7   : > { %v2580_v44 = vadd.f32 1.0, %v8719_v57  ;;  %v3222_v57 = vld [vmem:[%s12482_s3 + $0x20] sm:$0xff] }
 0x4e8   : > { %8720 = vrcp.f32 %v2573_v47  ;;  %v3219_v47 = vld [vmem:[%s12482_s3 + $0x8] sm:$0xff] }
 0x4e9   : > { %8722 = vrcp.f32 %v2580_v44  ;;  %v3221_v44 = vld [vmem:[%s12482_s3 + $0x18] sm:$0xff] }
 0x4f2   : > { %v8721_v9 = vpop.eup %8720 }
 0x4f3   : > { %v2583_v50 = vmul.f32 %v8721_v9, %v2566_v53  ;;  %v8723_v4 = vpop.eup %8722  ;;  %v3228_v53 = vld [vmem:[%s12482_s3 + $0x50] sm:$0xff] }
 0x4f4   : > { %v2586_v5 = vsub.f32 1.0, %v8723_v4  ;;  %v2588_v1 = vmul.f32 %v8723_v4, %v10451_v39  ;;  %v3233_v4 = vld [vmem:[%s12482_s3 + $0x78] sm:$0xff] }
 0x4f5   : > { %v2584_v22 = vadd.f32 %v2583_v50, %v2377_v6  ;;  %v3224_v50 = vld [vmem:[%s12482_s3 + $0x30] sm:$0xff] }
 0x4f6   : > { %v2713_v27 = vpop.f32.mrb[6].mxu0  ;;  %v2784_v0 = vpop.f32.mrb[26].mxu1 }
 0x4f7   : > { %8724 = vtanh.f32 %v2584_v22  ;;  %v8555_v24 = vadd.f32 %v12635_v58, %v2713_v27  ;;  %v2715_v10 = vpop.f32.mrb[7].mxu0  ;;  %v6643_v19 = vpop.f32.mrb[27].mxu1  ;;  %v2785_v46 = vadd.f32 %v2784_v0, %v9602_v20  ;;  %v3229_v27 = vld [vmem:[%s12482_s3 + $0x58] sm:$0xff]  ;;  %v3231_v0 = vld [vmem:[%s12482_s3 + $0x68] sm:$0xff] }
 0x4f8   : > { %v8557_v55 = vadd.f32 %v9597_v43, %v2715_v10 }
 0x4f9   : > { %v5791_v51 = vmul.f32 -1.442695, %v8555_v24  ;;  %v3234_v24 = vld [vmem:[%s12482_s3 + $0x80] sm:$0xff] }
 0x4fa   : > { %v5792_v42 = vmul.f32 -1.442695, %v8557_v55  ;;  %v10871_v55 = vpack.c.bf16 %v3234_v24, %v3231_v0  ;;  %v3260_v0 = vld [vmem:[%s12482_s3 + $0x150] sm:$0xff] }
 0x4fb   : > { %8726 = vpow2.f32 %v5791_v51  ;;  %v3230_v51 = vld [vmem:[%s12482_s3 + $0x60] sm:$0xff] }
 0x4fc   : > { %8728 = vpow2.f32 %v5792_v42  ;;  %v3232_v42 = vld [vmem:[%s12482_s3 + $0x70] sm:$0xff] }
 0x501   : > { %v8725_v38 = vpop.eup %8724 }
 0x502   : > { %v2587_v48 = vmul.f32 %v8725_v38, %v2586_v5  ;;  %v3235_v5 = vld [vmem:[%s12482_s3 + $0x88] sm:$0xff]  ;;  %v3237_v38 = vld [vmem:[%s12482_s3 + $0x98] sm:$0xff] }
 0x504   : > { %v10762_v23 = vadd.f32 %v2588_v1, %v2587_v48  ;;  %v3240_v48 = vld [vmem:[%s12482_s3 + $0xb0] sm:$0xff]  ;;  %v10893_v1 = vpack.c.bf16 %v3233_v4, %v3230_v51  ;;  %v3263_v51 = vld [vmem:[%s12482_s3 + $0x168] sm:$0xff]  ;;  %v3262_v4 = vld [vmem:[%s12482_s3 + $0x160] sm:$0xff] }
 0x505   : > { %v8727_v37 = vpop.eup %8726 }
 0x506   : > { %5790 = vst [vmem:[%s8930_s20 + $0x10] sm:$0xff] %v10762_v23  ;;  %v2792_v29 = vadd.f32 1.0, %v8727_v37  ;;  %v8729_v35 = vpop.eup %8728  ;;  %v10895_v37 = vpack.c.bf16 %v3235_v5, %v3232_v42  ;;  %v3265_v42 = vld [vmem:[%s12482_s3 + $0x178] sm:$0xff]  ;;  %v11027_v5 = vpack.c.bf16 %v3263_v51, %v3260_v0  ;;  %v3446_v0 = vld [vmem:[%s12484_s5 + $0x88] sm:$0xff] }
 0x507   : > { %v2799_v36 = vadd.f32 1.0, %v8729_v35  ;;  %v10902_v35 = vpack.c.bf16 %v3240_v48, %v3237_v38  ;;  %v11029_v38 = vpack.c.bf16 %v3265_v42, %v3262_v4  ;;  %v3430_v48 = vld [vmem:[%s12484_s5 + $0x8] sm:$0xff]  ;;  %v3448_v4 = vld [vmem:[%s12484_s5 + $0x98] sm:$0xff]  ;;  %v3451_v42 = vld [vmem:[%s12484_s5 + $0xb0] sm:$0xff] }
 0x508   : > { %8730 = vrcp.f32 %v2792_v29  ;;  %v3236_v29 = vld [vmem:[%s12482_s3 + $0x90] sm:$0xff] }
 0x509   : > { %8732 = vrcp.f32 %v2799_v36  ;;  %v3239_v36 = vld [vmem:[%s12482_s3 + $0xa8] sm:$0xff] }
 0x512   : > { %v8731_v62 = vpop.eup %8730 }
 0x513   : > { %v2802_v2 = vmul.f32 %v8731_v62, %v2785_v46  ;;  %v8733_v34 = vpop.eup %8732  ;;  %v3238_v46 = vld [vmem:[%s12482_s3 + $0xa0] sm:$0xff]  ;;  %v3241_v62 = vld [vmem:[%s12482_s3 + $0xb8] sm:$0xff] }
 0x514   : > { %v2805_v39 = vsub.f32 1.0, %v8733_v34  ;;  %v2807_v63 = vmul.f32 %v8733_v34, %v10483_v33  ;;  %v12691_v33 = vld [vmem:[#allocation25_spill] sm:$0xff]  ;;  %v10923_v34 = vpack.c.bf16 %v3241_v62, %v3238_v46  ;;  %v3429_v46 = vld [vmem:[%s12484_s5] sm:$0xff]  ;;  %v3432_v62 = vld [vmem:[%s12484_s5 + $0x18] sm:$0xff] }
 0x515   : > { %v2803_v31 = vadd.f32 %v2802_v2, %v12690_v21  ;;  %v3243_v2 = vld [vmem:[%s12482_s3 + $0xc8] sm:$0xff]  ;;  %v3246_v21 = vld [vmem:[%s12482_s3 + $0xe0] sm:$0xff] }
 0x517   : > { %8734 = vtanh.f32 %v2803_v31  ;;  %v10921_v31 = vpack.c.bf16 %v3239_v36, %v3236_v29  ;;  %v3433_v29 = vld [vmem:[%s12484_s5 + $0x20] sm:$0xff] }
 0x518   : > { %v11047_v36 = vpack.c.bf16 %v3433_v29, %v3430_v48  ;;  %v11130_v48 = vpack.c.bf16 %v3451_v42, %v3448_v4  ;;  %v3447_v29 = vld [vmem:[%s12484_s5 + $0x90] sm:$0xff] }
 0x519   : > { %v3459_v42 = vld [vmem:[%s12484_s5 + $0xf0] sm:$0xff] }
 0x521   : > { %v8735_v45 = vpop.eup %8734 }
 0x522   : > { %v2806_v17 = vmul.f32 %v8735_v45, %v2805_v39  ;;  %v3242_v39 = vld [vmem:[%s12482_s3 + $0xc0] sm:$0xff]  ;;  %v10930_v45 = vpack.c.bf16 %v3246_v21, %v3243_v2  ;;  %v3431_v2 = vld [vmem:[%s12484_s5 + $0x10] sm:$0xff]  ;;  %v11058_v21 = vpack.c.bf16 %v3432_v62, %v3429_v46  ;;  %v3450_v46 = vld [vmem:[%s12484_s5 + $0xa8] sm:$0xff] }
 0x523   : > { %v3449_v62 = vld [vmem:[%s12484_s5 + $0xa0] sm:$0xff] }
 0x524   : > { %v10769_v40 = vadd.f32 %v2807_v63, %v2806_v17  ;;  %v3245_v17 = vld [vmem:[%s12482_s3 + $0xd8] sm:$0xff]  ;;  %v3244_v63 = vld [vmem:[%s12482_s3 + $0xd0] sm:$0xff] }
 0x526   : > { %2923 = vmatmul.mubr.f32.vlgmr.msra.gmra.mrb[22].mxu0 %v10769_v40  ;;  %6677 = vmatmul.mubr.f32.vlgmr.msra.gmra.mrb[28].mxu1 %v10769_v40 }
 0x527   : > { %7817 = vmatpush1.bf16.msra.mxu0 %v10476_v12  ;;  %7848 = vmatpush3.bf16.msra.mxu1 %v10478_v60  ;;  %v12692_v12 = vld [vmem:[#allocation26_spill] sm:$0xff]  ;;  %v12693_v60 = vld [vmem:[#allocation27_spill] sm:$0xff] }
 0x528   : > { %7819 = vmatprep.subr.bf16.mxu0 %v10485_v56  ;;  %7849 = vmatprep.subr.bf16.mxu1 %v12613_v54  ;;  %v12694_v56 = vld [vmem:[#allocation28_spill] sm:$0xff] }
 0x529   : > { %3111 = vmatprep.mubr.f32.mxu0 %v12615_v30  ;;  %6711 = vmatprep.mubr.msk.f32.mxu1 %vm8853_vm0, %v12615_v30 }
 0x52b   : > { %7821 = vmatpush1.bf16.msra.mxu0 %v10506_v61  ;;  %7851 = vmatpush3.bf16.msra.mxu1 %v10508_v49  ;;  %v12698_v61 = vld [vmem:[#allocation32_spill] sm:$0xff]  ;;  %v12699_v49 = vld [vmem:[#allocation33_spill] sm:$0xff] }
 0x52c   : > { %7823 = vmatprep.subr.bf16.mxu0 %v12691_v33  ;;  %7852 = vmatprep.subr.bf16.mxu1 %v12613_v54  ;;  %v3247_v33 = vld [vmem:[%s12482_s3 + $0xe8] sm:$0xff] }
 0x52f   : > { %7825 = vmatpush1.bf16.msra.mxu0 %v12692_v12  ;;  %7854 = vmatpush3.bf16.msra.mxu1 %v12693_v60  ;;  %v3249_v12 = vld [vmem:[%s12482_s3 + $0xf8] sm:$0xff]  ;;  %v3252_v60 = vld [vmem:[%s12482_s3 + $0x110] sm:$0xff] }
 0x530   : > { %7827 = vmatprep.subr.bf16.mxu0 %v12694_v56  ;;  %7855 = vmatprep.subr.bf16.mxu1 %v12613_v54  ;;  %v10949_v56 = vpack.c.bf16 %v3245_v17, %v3242_v39  ;;  %v3434_v39 = vld [vmem:[%s12484_s5 + $0x28] sm:$0xff] }
 0x531   : > { %v11064_v17 = vpack.c.bf16 %v3434_v39, %v3431_v2  ;;  %v11142_v2 = vpack.c.bf16 %v3450_v46, %v3447_v29  ;;  %v3452_v39 = vld [vmem:[%s12484_s5 + $0xb8] sm:$0xff]  ;;  %v3462_v29 = vld [vmem:[%s12484_s5 + $0x108] sm:$0xff]  ;;  %v3461_v46 = vld [vmem:[%s12484_s5 + $0x100] sm:$0xff] }
 0x533   : > { %7829 = vmatpush1.bf16.msra.mxu0 %v12695_v41  ;;  %7857 = vmatpush3.bf16.msra.mxu1 %v12696_v13  ;;  %v10951_v41 = vpack.c.bf16 %v3247_v33, %v3244_v63  ;;  %v3248_v13 = vld [vmem:[%s12482_s3 + $0xf0] sm:$0xff]  ;;  %v3436_v63 = vld [vmem:[%s12484_s5 + $0x38] sm:$0xff] }
 0x534   : > { %7831 = vmatprep.subr.bf16.mxu0 %v12697_v15  ;;  %7858 = vmatprep.subr.bf16.mxu1 %v12613_v54  ;;  %v10958_v15 = vpack.c.bf16 %v3252_v60, %v3249_v12  ;;  %v3439_v33 = vld [vmem:[%s12484_s5 + $0x50] sm:$0xff] }
 0x535   : > { %v11074_v12 = vpack.c.bf16 %v3439_v33, %v3436_v63  ;;  %v3435_v60 = vld [vmem:[%s12484_s5 + $0x30] sm:$0xff]  ;;  %v11148_v63 = vpack.c.bf16 %v3452_v39, %v3449_v62  ;;  %v3454_v33 = vld [vmem:[%s12484_s5 + $0xc8] sm:$0xff]  ;;  %v11198_v62 = vpack.c.bf16 %v3462_v29, %v3459_v42  ;;  %v3464_v39 = vld [vmem:[%s12484_s5 + $0x118] sm:$0xff] }
 0x536   : > { %v3470_v42 = vld [vmem:[%s12484_s5 + $0x148] sm:$0xff]  ;;  %v3472_v29 = vld [vmem:[%s12484_s5 + $0x158] sm:$0xff] }
 0x537   : > { %7833 = vmatpush1.bf16.msra.mxu0 %v12698_v61  ;;  %7860 = vmatpush3.bf16.msra.mxu1 %v12699_v49  ;;  %v3251_v61 = vld [vmem:[%s12482_s3 + $0x108] sm:$0xff]  ;;  %v3250_v49 = vld [vmem:[%s12482_s3 + $0x100] sm:$0xff]  ;;  %12706 = vst [vmem:[#allocation10_spill] sm:$0xff] %v11198_v62 }
 0x538   : > { %7835 = vmatprep.subr.bf16.mxu0 %v12700_v18  ;;  %7861 = vmatprep.subr.bf16.mxu1 %v12613_v54  ;;  %v3253_v18 = vld [vmem:[%s12482_s3 + $0x118] sm:$0xff] }
 0x53b   : > { %7837 = vmatpush1.bf16.msra.mxu0 %v12701_v26  ;;  %7863 = vmatpush3.bf16.msra.mxu1 %v10623_v25  ;;  %v3218_v25 = vld [vmem:[%s12482_s3] sm:$0xff]  ;;  %v3255_v26 = vld [vmem:[%s12482_s3 + $0x128] sm:$0xff] }
 0x53c   : > { %7839 = vmatprep.subr.bf16.mxu0 %v10630_v28  ;;  %7864 = vmatprep.subr.bf16.mxu1 %v12613_v54  ;;  %v10813_v28 = vpack.c.bf16 %v3222_v57, %v3219_v47  ;;  %v10832_v9 = vpack.c.bf16 %v3221_v44, %v3218_v25  ;;  %v3258_v47 = vld [vmem:[%s12482_s3 + $0x140] sm:$0xff]  ;;  %v10977_v57 = vpack.c.bf16 %v3251_v61, %v3248_v13  ;;  %v3438_v13 = vld [vmem:[%s12484_s5 + $0x48] sm:$0xff] }
 0x53d   : > { %v10979_v25 = vpack.c.bf16 %v3253_v18, %v3250_v49  ;;  %v3254_v44 = vld [vmem:[%s12482_s3 + $0x120] sm:$0xff]  ;;  %v11086_v49 = vpack.c.bf16 %v3438_v13, %v3435_v60  ;;  %v3440_v18 = vld [vmem:[%s12484_s5 + $0x58] sm:$0xff] }
 0x53e   : > { %v3437_v61 = vld [vmem:[%s12484_s5 + $0x40] sm:$0xff] }
 0x53f   : > { %7841 = vmatpush1.bf16.msra.mxu0 %v10649_v14  ;;  %7866 = vmatpush3.bf16.msra.mxu1 %v10651_v59  ;;  %v3220_v14 = vld [vmem:[%s12482_s3 + $0x10] sm:$0xff]  ;;  %v3223_v59 = vld [vmem:[%s12482_s3 + $0x28] sm:$0xff]  ;;  %v3457_v60 = vld [vmem:[%s12484_s5 + $0xe0] sm:$0xff] }
 0x540   : > { %7843 = vmatprep.subr.bf16.mxu0 %v10658_v7  ;;  %7867 = vmatprep.subr.bf16.mxu1 %v12613_v54  ;;  %v3225_v7 = vld [vmem:[%s12482_s3 + $0x38] sm:$0xff]  ;;  %v10834_v6 = vpack.c.bf16 %v3223_v59, %v3220_v14  ;;  %v10986_v14 = vpack.c.bf16 %v3258_v47, %v3255_v26  ;;  %v11092_v26 = vpack.c.bf16 %v3440_v18, %v3437_v61  ;;  %v3442_v47 = vld [vmem:[%s12484_s5 + $0x68] sm:$0xff]  ;;  %v3453_v61 = vld [vmem:[%s12484_s5 + $0xc0] sm:$0xff] }
 0x541   : > { %v10841_v22 = vpack.c.bf16 %v3228_v53, %v3225_v7  ;;  %v3257_v59 = vld [vmem:[%s12482_s3 + $0x138] sm:$0xff]  ;;  %v3256_v7 = vld [vmem:[%s12482_s3 + $0x130] sm:$0xff]  ;;  %v3259_v53 = vld [vmem:[%s12482_s3 + $0x148] sm:$0xff]  ;;  %v11158_v13 = vpack.c.bf16 %v3457_v60, %v3454_v33 }
 0x542   : > { %v3456_v18 = vld [vmem:[%s12484_s5 + $0xd8] sm:$0xff]  ;;  %v3466_v33 = vld [vmem:[%s12484_s5 + $0x128] sm:$0xff]  ;;  %v3469_v60 = vld [vmem:[%s12484_s5 + $0x140] sm:$0xff] }
 0x543   : > { %7845 = vmatpush1.bf16.msra.mxu0 %v10671_v52  ;;  %7869 = vmatpush3.bf16.msra.mxu1 %v10673_v32  ;;  %v3227_v52 = vld [vmem:[%s12482_s3 + $0x48] sm:$0xff]  ;;  %v3226_v32 = vld [vmem:[%s12482_s3 + $0x40] sm:$0xff]  ;;  %12702 = vst [vmem:[#allocation6_spill] sm:$0xff] %v11158_v13 }
 0x544   : > { %7871 = vmatprep.subr.bf16.mxu0 %v10813_v28  ;;  %7902 = vmatprep.subr.bf16.mxu1 %v12613_v54  ;;  %v10862_v10 = vpack.c.bf16 %v3227_v52, %v3224_v50  ;;  %v10864_v19 = vpack.c.bf16 %v3229_v27, %v3226_v32  ;;  %v3261_v50 = vld [vmem:[%s12482_s3 + $0x158] sm:$0xff]  ;;  %v3264_v52 = vld [vmem:[%s12482_s3 + $0x170] sm:$0xff]  ;;  %v11005_v32 = vpack.c.bf16 %v3257_v59, %v3254_v44  ;;  %v3445_v44 = vld [vmem:[%s12484_s5 + $0x80] sm:$0xff] }
 0x545   : > { %v11007_v27 = vpack.c.bf16 %v3259_v53, %v3256_v7  ;;  %v11014_v24 = vpack.c.bf16 %v3264_v52, %v3261_v50  ;;  %v11102_v59 = vpack.c.bf16 %v3445_v44, %v3442_v47  ;;  %v3441_v7 = vld [vmem:[%s12484_s5 + $0x60] sm:$0xff]  ;;  %v3444_v53 = vld [vmem:[%s12484_s5 + $0x78] sm:$0xff]  ;;  %v3443_v50 = vld [vmem:[%s12484_s5 + $0x70] sm:$0xff]  ;;  %v11170_v44 = vpack.c.bf16 %v3456_v18, %v3453_v61 }
 0x546   : > { %3112 = vmatmul.mubr.f32.vlgmr.msra.gmra.mrb[22].mxu0 %v10762_v23  ;;  %6712 = vmatmul.mubr.f32.vlgmr.msra.gmra.mrb[30].mxu1 %v10762_v23  ;;  %v11114_v52 = vpack.c.bf16 %v3444_v53, %v3441_v7  ;;  %v11120_v51 = vpack.c.bf16 %v3446_v0, %v3443_v50  ;;  %v3455_v47 = vld [vmem:[%s12484_s5 + $0xd0] sm:$0xff]  ;;  %v3458_v7 = vld [vmem:[%s12484_s5 + $0xe8] sm:$0xff]  ;;  %v3460_v50 = vld [vmem:[%s12484_s5 + $0xf8] sm:$0xff]  ;;  %v11210_v61 = vpack.c.bf16 %v3464_v39, %v3461_v46 }
 0x547   : > { %7873 = vmatpush1.bf16.msra.mxu0 %v10832_v9  ;;  %7904 = vmatpush3.bf16.msra.mxu1 %v10834_v6  ;;  %12703 = vst [vmem:[#allocation7_spill] sm:$0xff] %v11170_v44  ;;  %v11176_v53 = vpack.c.bf16 %v3458_v7, %v3455_v47  ;;  %v3463_v0 = vld [vmem:[%s12484_s5 + $0x110] sm:$0xff]  ;;  %v11212_v18 = vpack.c.bf16 %v3469_v60, %v3466_v33  ;;  %v3465_v47 = vld [vmem:[%s12484_s5 + $0x120] sm:$0xff]  ;;  %v3468_v7 = vld [vmem:[%s12484_s5 + $0x138] sm:$0xff] }
 0x548   : > { %7875 = vmatprep.subr.bf16.mxu0 %v10841_v22  ;;  %7905 = vmatprep.subr.bf16.mxu1 %v12613_v54  ;;  %v11186_v4 = vpack.c.bf16 %v3463_v0, %v3460_v50  ;;  %12707 = vst [vmem:[#allocation11_spill] sm:$0xff] %v11210_v61  ;;  %v3467_v50 = vld [vmem:[%s12484_s5 + $0x130] sm:$0xff]  ;;  %v11224_v0 = vpack.c.bf16 %v3468_v7, %v3465_v47  ;;  %v3474_v47 = vld [vmem:[%s12484_s5 + $0x168] sm:$0xff]  ;;  %v3473_v7 = vld [vmem:[%s12484_s5 + $0x160] sm:$0xff] }
 0x549   : > { %3330 = vmatprep.mubr.f32.mxu0 %v12615_v30  ;;  %6746 = vmatprep.mubr.msk.f32.mxu1 %vm8853_vm0, %v12615_v30  ;;  %12704 = vst [vmem:[#allocation8_spill] sm:$0xff] %v11176_v53  ;;  %12708 = vst [vmem:[#allocation17_spill] sm:$0xff] %v11212_v18  ;;  %v3475_v46 = vld [vmem:[%s12484_s5 + $0x170] sm:$0xff]  ;;  %v11237_v39 = vpack.c.bf16 %v3470_v42, %v3467_v50  ;;  %v3476_v50 = vld [vmem:[%s12484_s5 + $0x178] sm:$0xff] }
 0x54a   : > { %12705 = vst [vmem:[#allocation9_spill] sm:$0xff] %v11186_v4  ;;  %12709 = vst [vmem:[#allocation20_spill] sm:$0xff] %v11224_v0  ;;  %v11239_v33 = vpack.c.bf16 %v3475_v46, %v3472_v29  ;;  %v3471_v60 = vld [vmem:[%s12484_s5 + $0x150] sm:$0xff]  ;;  %v3619_v42 = vld [vmem:[%s12486_s7 + $0x8] sm:$0xff] }
 0x54b   : > { %7877 = vmatpush1.bf16.msra.mxu0 %v10862_v10  ;;  %7907 = vmatpush3.bf16.msra.mxu1 %v10864_v19  ;;  %12710 = vst [vmem:[#allocation12_spill] sm:$0xff] %v11237_v39  ;;  %v3622_v29 = vld [vmem:[%s12486_s7 + $0x20] sm:$0xff]  ;;  %v11261_v46 = vpack.c.bf16 %v3474_v47, %v3471_v60 }
 0x54c   : > { %7879 = vmatprep.subr.bf16.mxu0 %v10871_v55  ;;  %7908 = vmatprep.subr.bf16.mxu1 %v12613_v54  ;;  %12711 = vst [vmem:[#allocation21_spill] sm:$0xff] %v11239_v33 }
 0x54d   : > { %12712 = vst [vmem:[#allocation22_spill] sm:$0xff] %v11261_v46 }
 0x54f   : > { %7881 = vmatpush1.bf16.msra.mxu0 %v10893_v1  ;;  %7910 = vmatpush3.bf16.msra.mxu1 %v10895_v37 }
 0x550   : > { %7883 = vmatprep.subr.bf16.mxu0 %v10902_v35  ;;  %7911 = vmatprep.subr.bf16.mxu1 %v12613_v54 }
 0x553   : > { %7885 = vmatpush1.bf16.msra.mxu0 %v10921_v31  ;;  %7913 = vmatpush3.bf16.msra.mxu1 %v10923_v34 }
 0x554   : > { %7887 = vmatprep.subr.bf16.mxu0 %v10930_v45  ;;  %7914 = vmatprep.subr.bf16.mxu1 %v12613_v54 }
 0x557   : > { %7889 = vmatpush1.bf16.msra.mxu0 %v10949_v56  ;;  %7916 = vmatpush3.bf16.msra.mxu1 %v10951_v41 }
 0x558   : > { %7891 = vmatprep.subr.bf16.mxu0 %v10958_v15  ;;  %7917 = vmatprep.subr.bf16.mxu1 %v12613_v54 }
 0x55b   : > { %7893 = vmatpush1.bf16.msra.mxu0 %v10977_v57  ;;  %7919 = vmatpush3.bf16.msra.mxu1 %v10979_v25 }
 0x55c   : > { %7895 = vmatprep.subr.bf16.mxu0 %v10986_v14  ;;  %7920 = vmatprep.subr.bf16.mxu1 %v12613_v54 }
 0x55f   : > { %7897 = vmatpush1.bf16.msra.mxu0 %v11005_v32  ;;  %7922 = vmatpush3.bf16.msra.mxu1 %v11007_v27 }
 0x560   : > { %7899 = vmatprep.subr.bf16.mxu0 %v11014_v24  ;;  %7923 = vmatprep.subr.bf16.mxu1 %v12613_v54 }
 0x563   : > { %7901 = vmatpush1.bf16.msra.mxu0 %v11027_v5  ;;  %7925 = vmatpush3.bf16.msra.mxu1 %v11029_v38 }
 0x564   : > { %7958 = vmatprep.subr.bf16.mxu1 %v12613_v54  ;;  %7927 = vmatprep.subr.bf16.mxu0 %v11047_v36 }
 0x566   : > { %3331 = vmatmul.mubr.f32.vlgmr.msra.gmra.mrb[8].mxu0 %v10769_v40  ;;  %6747 = vmatmul.mubr.f32.vlgmr.msra.gmra.mrb[32].mxu1 %v10769_v40 }
 0x567   : > { %3541 = vmatprep.mubr.f32.mxu0 %v12615_v30  ;;  %6781 = vmatprep.mubr.msk.f32.mxu1 %vm8853_vm0, %v12615_v30 }
 0x568   : > { %7929 = vmatpush1.bf16.msra.mxu0 %v11058_v21  ;;  %7960 = vmatpush3.bf16.msra.mxu1 %v11064_v17 }
 0x569   : > { %7961 = vmatprep.subr.bf16.mxu1 %v12613_v54  ;;  %7931 = vmatprep.subr.bf16.mxu0 %v11074_v12 }
 0x56c   : > { %7933 = vmatpush1.bf16.msra.mxu0 %v11086_v49  ;;  %7963 = vmatpush3.bf16.msra.mxu1 %v11092_v26 }
 0x56d   : > { %7964 = vmatprep.subr.bf16.mxu1 %v12613_v54  ;;  %7935 = vmatprep.subr.bf16.mxu0 %v11102_v59 }
 0x570   : > { %7937 = vmatpush1.bf16.msra.mxu0 %v11114_v52  ;;  %7966 = vmatpush3.bf16.msra.mxu1 %v11120_v51 }
 0x571   : > { %7967 = vmatprep.subr.bf16.mxu1 %v12613_v54  ;;  %7939 = vmatprep.subr.bf16.mxu0 %v11130_v48 }
 0x574   : > { %7941 = vmatpush1.bf16.msra.mxu0 %v11142_v2  ;;  %7969 = vmatpush3.bf16.msra.mxu1 %v11148_v63 }
 0x575   : > { %7970 = vmatprep.subr.bf16.mxu1 %v12613_v54  ;;  %7943 = vmatprep.subr.bf16.mxu0 %v11158_v13 }
 0x578   : > { %7945 = vmatpush1.bf16.msra.mxu0 %v11170_v44  ;;  %7972 = vmatpush3.bf16.msra.mxu1 %v11176_v53 }
 0x579   : > { %7973 = vmatprep.subr.bf16.mxu1 %v12613_v54  ;;  %7947 = vmatprep.subr.bf16.mxu0 %v11186_v4 }
 0x57c   : > { %7949 = vmatpush1.bf16.msra.mxu0 %v11198_v62  ;;  %7975 = vmatpush3.bf16.msra.mxu1 %v11210_v61  ;;  %v11267_v61 = vpack.c.bf16 %v3622_v29, %v3619_v42 }
 0x57d   : > { %7951 = vmatprep.subr.bf16.mxu0 %v11212_v18  ;;  %7976 = vmatprep.subr.bf16.mxu1 %v12613_v54  ;;  %v11265_v18 = vpack.c.bf16 %v3476_v50, %v3473_v7 }
 0x57e   : > { %12714 = vst [vmem:[#allocation24_spill] sm:$0xff] %v11267_v61 }
 0x57f   : > { %12713 = vst [vmem:[#allocation23_spill] sm:$0xff] %v11265_v18 }
 0x580   : > { %7953 = vmatpush1.bf16.msra.mxu0 %v11224_v0  ;;  %7978 = vmatpush3.bf16.msra.mxu1 %v11237_v39 }
 0x581   : > { %7955 = vmatprep.subr.bf16.mxu0 %v11239_v33  ;;  %7979 = vmatprep.subr.bf16.mxu1 %v12613_v54 }
 0x584   : > { %7957 = vmatpush1.bf16.msra.mxu0 %v11261_v46  ;;  %7981 = vmatpush3.bf16.msra.mxu1 %v11265_v18 }
 0x585   : > { %7983 = vmatprep.subr.bf16.mxu0 %v11267_v61  ;;  %8014 = vmatprep.subr.bf16.mxu1 %v12613_v54 }
 0x5f9   : > { %v2995_v60 = vpop.f32.mrb[28].mxu1 }
 0x5fa   : > { %v6678_v47 = vpop.f32.mrb[29].mxu1  ;;  %v2996_v44 = vadd.f32 %v2995_v60, %v9925_v3 }
 0x619   : > { %v3113_v0 = vpop.f32.mrb[22].mxu0  ;;  %v3184_v39 = vpop.f32.mrb[30].mxu1 }
 0x61a   : > { %v8587_v33 = vadd.f32 %v9915_v11, %v3113_v0  ;;  %v3115_v7 = vpop.f32.mrb[23].mxu0  ;;  %v6713_v50 = vpop.f32.mrb[31].mxu1  ;;  %v3185_v53 = vadd.f32 %v3184_v39, %v12689_v8 }
 0x61b   : > { %v8589_v29 = vadd.f32 %v9917_v16, %v3115_v7 }
 0x61c   : > { %v5793_v42 = vmul.f32 -1.442695, %v8587_v33 }
 0x61d   : > { %v5794_v62 = vmul.f32 -1.442695, %v8589_v29 }
 0x61e   : > { %8736 = vpow2.f32 %v5793_v42 }
 0x61f   : > { %8738 = vpow2.f32 %v5794_v62 }
 0x628   : > { %v8737_v46 = vpop.eup %8736 }
 0x629   : > { %v3192_v18 = vadd.f32 1.0, %v8737_v46  ;;  %v8739_v61 = vpop.eup %8738 }
 0x62a   : > { %v3199_v4 = vadd.f32 1.0, %v8739_v61 }
 0x62b   : > { %8740 = vrcp.f32 %v3192_v18 }
 0x62c   : > { %8742 = vrcp.f32 %v3199_v4 }
 0x635   : > { %v8741_v47 = vpop.eup %8740 }
 0x636   : > { %v3202_v13 = vmul.f32 %v8741_v47, %v3185_v53  ;;  %v8743_v61 = vpop.eup %8742 }
 0x637   : > { %v3205_v29 = vsub.f32 1.0, %v8743_v61  ;;  %v3207_v53 = vmul.f32 %v8743_v61, %v10762_v23  ;;  %v3618_v23 = vld [vmem:[%s12486_s7] sm:$0xff]  ;;  %v3621_v61 = vld [vmem:[%s12486_s7 + $0x18] sm:$0xff] }
 0x638   : > { %v3203_v0 = vadd.f32 %v3202_v13, %v2996_v44 }
 0x639   : > { %v3332_v50 = vpop.f32.mrb[8].mxu0  ;;  %v3403_v33 = vpop.f32.mrb[32].mxu1 }
 0x63a   : > { %8744 = vtanh.f32 %v3203_v0  ;;  %v8559_v7 = vadd.f32 %v12635_v58, %v3332_v50  ;;  %v3334_v62 = vpop.f32.mrb[9].mxu0  ;;  %v6748_v42 = vpop.f32.mrb[33].mxu1  ;;  %v3404_v50 = vadd.f32 %v3403_v33, %v9602_v20  ;;  %v3620_v33 = vld [vmem:[%s12486_s7 + $0x10] sm:$0xff] }
 0x63b   : > { %v8561_v18 = vadd.f32 %v9597_v43, %v3334_v62  ;;  %v12715_v42 = vld [vmem:[#allocation16_spill] sm:$0xff] }
 0x63c   : > { %v5796_v46 = vmul.f32 -1.442695, %v8559_v7 }
 0x63d   : > { %v5797_v39 = vmul.f32 -1.442695, %v8561_v18 }
 0x63e   : > { %8746 = vpow2.f32 %v5796_v46 }
 0x63f   : > { %8748 = vpow2.f32 %v5797_v39  ;;  %v3623_v39 = vld [vmem:[%s12486_s7 + $0x28] sm:$0xff] }
 0x644   : > { %v8745_v8 = vpop.eup %8744 }
 0x645   : > { %v3206_v60 = vmul.f32 %v8745_v8, %v3205_v29 }
 0x647   : > { %v11281_v13 = vadd.f32 %v3207_v53, %v3206_v60  ;;  %v3625_v60 = vld [vmem:[%s12486_s7 + $0x38] sm:$0xff]  ;;  %v3628_v53 = vld [vmem:[%s12486_s7 + $0x50] sm:$0xff] }
 0x648   : > { %v8747_v44 = vpop.eup %8746 }
 0x649   : > { %5795 = vst [vmem:[%s8930_s20 + $0x18] sm:$0xff] %v11281_v13  ;;  %v3411_v4 = vadd.f32 1.0, %v8747_v44  ;;  %v8749_v47 = vpop.eup %8748 }
 0x64a   : > { %v3418_v0 = vadd.f32 1.0, %v8749_v47  ;;  %v11306_v47 = vpack.c.bf16 %v3621_v61, %v3618_v23  ;;  %v3634_v23 = vld [vmem:[%s12486_s7 + $0x80] sm:$0xff] }
 0x64b   : > { %8750 = vrcp.f32 %v3411_v4 }
 0x64c   : > { %8752 = vrcp.f32 %v3418_v0  ;;  %v11308_v0 = vpack.c.bf16 %v3623_v39, %v3620_v33  ;;  %v3630_v33 = vld [vmem:[%s12486_s7 + $0x60] sm:$0xff] }
 0x655   : > { %v8751_v7 = vpop.eup %8750 }
 0x656   : > { %v3421_v62 = vmul.f32 %v8751_v7, %v3404_v50  ;;  %v8753_v8 = vpop.eup %8752  ;;  %v3624_v50 = vld [vmem:[%s12486_s7 + $0x30] sm:$0xff] }
 0x657   : > { %v3424_v18 = vsub.f32 1.0, %v8753_v8  ;;  %v3426_v4 = vmul.f32 %v8753_v8, %v10769_v40  ;;  %v3626_v40 = vld [vmem:[%s12486_s7 + $0x40] sm:$0xff]  ;;  %v3631_v8 = vld [vmem:[%s12486_s7 + $0x68] sm:$0xff] }
 0x658   : > { %v3422_v46 = vadd.f32 %v3421_v62, %v12715_v42  ;;  %v11315_v62 = vpack.c.bf16 %v3628_v53, %v3625_v60  ;;  %v3627_v42 = vld [vmem:[%s12486_s7 + $0x48] sm:$0xff]  ;;  %v11345_v39 = vpack.c.bf16 %v3634_v23, %v3631_v8  ;;  %v3632_v60 = vld [vmem:[%s12486_s7 + $0x70] sm:$0xff]  ;;  %v3638_v23 = vld [vmem:[%s12486_s7 + $0xa0] sm:$0xff] }
 0x659   : > { %v3635_v53 = vld [vmem:[%s12486_s7 + $0x88] sm:$0xff] }
 0x65a   : > { %8754 = vtanh.f32 %v3422_v46  ;;  %v3629_v46 = vld [vmem:[%s12486_s7 + $0x58] sm:$0xff]  ;;  %12716 = vst [vmem:[#allocation13_spill] sm:$0xff] %v11345_v39  ;;  %v3639_v8 = vld [vmem:[%s12486_s7 + $0xa8] sm:$0xff] }
 0x65b   : > { %v11338_v61 = vpack.c.bf16 %v3629_v46, %v3626_v40  ;;  %v3636_v40 = vld [vmem:[%s12486_s7 + $0x90] sm:$0xff] }
 0x664   : > { %v8755_v29 = vpop.eup %8754 }
 0x665   : > { %v3425_v44 = vmul.f32 %v8755_v29, %v3424_v18  ;;  %v11336_v18 = vpack.c.bf16 %v3627_v42, %v3624_v50  ;;  %v3633_v29 = vld [vmem:[%s12486_s7 + $0x78] sm:$0xff]  ;;  %v11369_v42 = vpack.c.bf16 %v3635_v53, %v3632_v60  ;;  %v3646_v60 = vld [vmem:[%s12486_s7 + $0xe0] sm:$0xff]  ;;  %v11395_v53 = vpack.c.bf16 %v3639_v8, %v3636_v40  ;;  %v3644_v40 = vld [vmem:[%s12486_s7 + $0xd0] sm:$0xff] }
 0x666   : > { %v11367_v50 = vpack.c.bf16 %v3633_v29, %v3630_v33  ;;  %v3641_v33 = vld [vmem:[%s12486_s7 + $0xb8] sm:$0xff]  ;;  %v3643_v29 = vld [vmem:[%s12486_s7 + $0xc8] sm:$0xff] }
 0x667   : > { %v11313_v7 = vadd.f32 %v3426_v4, %v3425_v44  ;;  %v3637_v44 = vld [vmem:[%s12486_s7 + $0x98] sm:$0xff]  ;;  %v3640_v4 = vld [vmem:[%s12486_s7 + $0xb0] sm:$0xff]  ;;  %12718 = vst [vmem:[#allocation26_spill] sm:$0xff] %v11369_v42  ;;  %12720 = vst [vmem:[#allocation28_spill] sm:$0xff] %v11395_v53 }
 0x668   : > { %12717 = vst [vmem:[#allocation25_spill] sm:$0xff] %v11367_v50  ;;  %v11376_v46 = vpack.c.bf16 %v3640_v4, %v3637_v44  ;;  %v11397_v44 = vpack.c.bf16 %v3641_v33, %v3638_v23  ;;  %v3642_v4 = vld [vmem:[%s12486_s7 + $0xc0] sm:$0xff]  ;;  %v3647_v8 = vld [vmem:[%s12486_s7 + $0xe8] sm:$0xff]  ;;  %v3649_v23 = vld [vmem:[%s12486_s7 + $0xf8] sm:$0xff] }
 0x669   : > { %3542 = vmatmul.mubr.f32.vlgmr.msra.gmra.mrb[24].mxu0 %v11313_v7  ;;  %6782 = vmatmul.mubr.f32.vlgmr.msra.gmra.mrb[34].mxu1 %v11313_v7  ;;  %v3652_v33 = vld [vmem:[%s12486_s7 + $0x110] sm:$0xff] }
 0x66a   : > { %7985 = vmatpush1.bf16.msra.mxu0 %v11306_v47  ;;  %8016 = vmatpush3.bf16.msra.mxu1 %v11308_v0  ;;  %12719 = vst [vmem:[#allocation27_spill] sm:$0xff] %v11376_v46  ;;  %12721 = vst [vmem:[#allocation29_spill] sm:$0xff] %v11397_v44 }
 0x66b   : > { %7987 = vmatprep.subr.bf16.mxu0 %v11315_v62  ;;  %8017 = vmatprep.subr.bf16.mxu1 %v12613_v54 }
 0x66c   : > { %3730 = vmatprep.mubr.f32.mxu0 %v12615_v30  ;;  %6816 = vmatprep.mubr.msk.f32.mxu1 %vm8853_vm0, %v12615_v30 }
 0x66e   : > { %7989 = vmatpush1.bf16.msra.mxu0 %v11336_v18  ;;  %8019 = vmatpush3.bf16.msra.mxu1 %v11338_v61 }
 0x66f   : > { %7991 = vmatprep.subr.bf16.mxu0 %v11345_v39  ;;  %8020 = vmatprep.subr.bf16.mxu1 %v12613_v54  ;;  %v11404_v39 = vpack.c.bf16 %v3646_v60, %v3643_v29  ;;  %v11425_v60 = vpack.c.bf16 %v3647_v8, %v3644_v40  ;;  %v3655_v40 = vld [vmem:[%s12486_s7 + $0x128] sm:$0xff]  ;;  %v3658_v8 = vld [vmem:[%s12486_s7 + $0x140] sm:$0xff] }
 0x671   : > { %12722 = vst [vmem:[#allocation30_spill] sm:$0xff] %v11404_v39  ;;  %12724 = vst [vmem:[#allocation32_spill] sm:$0xff] %v11425_v60 }
 0x672   : > { %7993 = vmatpush1.bf16.msra.mxu0 %v11367_v50  ;;  %8022 = vmatpush3.bf16.msra.mxu1 %v11369_v42  ;;  %v3645_v50 = vld [vmem:[%s12486_s7 + $0xd8] sm:$0xff]  ;;  %v11432_v42 = vpack.c.bf16 %v3652_v33, %v3649_v23 }
 0x673   : > { %7995 = vmatprep.subr.bf16.mxu0 %v11376_v46  ;;  %8023 = vmatprep.subr.bf16.mxu1 %v12613_v54  ;;  %v11423_v29 = vpack.c.bf16 %v3645_v50, %v3642_v4  ;;  %v3648_v46 = vld [vmem:[%s12486_s7 + $0xf0] sm:$0xff]  ;;  %v3650_v50 = vld [vmem:[%s12486_s7 + $0x100] sm:$0xff]  ;;  %v3653_v4 = vld [vmem:[%s12486_s7 + $0x118] sm:$0xff] }
 0x674   : > { %12725 = vst [vmem:[#allocation33_spill] sm:$0xff] %v11432_v42  ;;  %v11453_v33 = vpack.c.bf16 %v3653_v4, %v3650_v50  ;;  %v3661_v50 = vld [vmem:[%s12486_s7 + $0x158] sm:$0xff]  ;;  %v3664_v4 = vld [vmem:[%s12486_s7 + $0x170] sm:$0xff] }
 0x675   : > { %12723 = vst [vmem:[#allocation31_spill] sm:$0xff] %v11423_v29 }
 0x676   : > { %7997 = vmatpush1.bf16.msra.mxu0 %v11395_v53  ;;  %8025 = vmatpush3.bf16.msra.mxu1 %v11397_v44  ;;  %v3651_v53 = vld [vmem:[%s12486_s7 + $0x108] sm:$0xff]  ;;  %v11460_v44 = vpack.c.bf16 %v3658_v8, %v3655_v40 }
 0x677   : > { %7999 = vmatprep.subr.bf16.mxu0 %v11404_v39  ;;  %8026 = vmatprep.subr.bf16.mxu1 %v12613_v54  ;;  %v11451_v23 = vpack.c.bf16 %v3651_v53, %v3648_v46  ;;  %v3654_v39 = vld [vmem:[%s12486_s7 + $0x120] sm:$0xff]  ;;  %v3656_v46 = vld [vmem:[%s12486_s7 + $0x130] sm:$0xff]  ;;  %v3659_v53 = vld [vmem:[%s12486_s7 + $0x148] sm:$0xff] }
 0x678   : > { %v11481_v8 = vpack.c.bf16 %v3659_v53, %v3656_v46 }
 0x679   : > { %12726 = vst [vmem:[#allocation34_spill] sm:$0xff] %v11451_v23 }
 0x67a   : > { %8001 = vmatpush1.bf16.msra.mxu0 %v11423_v29  ;;  %8028 = vmatpush3.bf16.msra.mxu1 %v11425_v60  ;;  %v3657_v29 = vld [vmem:[%s12486_s7 + $0x138] sm:$0xff]  ;;  %v11488_v60 = vpack.c.bf16 %v3664_v4, %v3661_v50 }
 0x67b   : > { %8003 = vmatprep.subr.bf16.mxu0 %v11432_v42  ;;  %8029 = vmatprep.subr.bf16.mxu1 %v12613_v54  ;;  %v11479_v40 = vpack.c.bf16 %v3657_v29, %v3654_v39  ;;  %v3660_v42 = vld [vmem:[%s12486_s7 + $0x150] sm:$0xff]  ;;  %v3662_v39 = vld [vmem:[%s12486_s7 + $0x160] sm:$0xff]  ;;  %v3665_v29 = vld [vmem:[%s12486_s7 + $0x178] sm:$0xff] }
 0x67c   : > { %v11503_v53 = vpack.c.bf16 %v3665_v29, %v3662_v39 }
 0x67e   : > { %8005 = vmatpush1.bf16.msra.mxu0 %v11451_v23  ;;  %8031 = vmatpush3.bf16.msra.mxu1 %v11453_v33  ;;  %v3663_v23 = vld [vmem:[%s12486_s7 + $0x168] sm:$0xff] }
 0x67f   : > { %8007 = vmatprep.subr.bf16.mxu0 %v11460_v44  ;;  %8032 = vmatprep.subr.bf16.mxu1 %v12613_v54  ;;  %v11501_v46 = vpack.c.bf16 %v3663_v23, %v3660_v42 }
 0x682   : > { %8009 = vmatpush1.bf16.msra.mxu0 %v11479_v40  ;;  %8034 = vmatpush3.bf16.msra.mxu1 %v11481_v8 }
 0x683   : > { %8011 = vmatprep.subr.bf16.mxu0 %v11488_v60  ;;  %8035 = vmatprep.subr.bf16.mxu1 %v12613_v54 }
 0x686   : > { %8013 = vmatpush1.bf16.msra.mxu0 %v11501_v46  ;;  %8037 = vmatpush3.bf16.msra.mxu1 %v11503_v53 }
 0x687   : > { %8039 = vmatprep.subr.bf16.mxu0 %v10813_v28  ;;  %8070 = vmatprep.subr.bf16.mxu1 %v12613_v54  ;;  %v12727_v28 = vld [vmem:[#allocation6_spill] sm:$0xff] }
 0x689   : > { %3731 = vmatmul.mubr.f32.vlgmr.msra.gmra.mrb[24].mxu0 %v11281_v13  ;;  %6817 = vmatmul.mubr.f32.vlgmr.msra.gmra.mrb[36].mxu1 %v11281_v13 }
 0x68a   : > { %8041 = vmatpush1.bf16.msra.mxu0 %v10832_v9  ;;  %8072 = vmatpush3.bf16.msra.mxu1 %v10834_v6  ;;  %v12728_v9 = vld [vmem:[#allocation7_spill] sm:$0xff]  ;;  %v12729_v6 = vld [vmem:[#allocation8_spill] sm:$0xff] }
 0x68b   : > { %8043 = vmatprep.subr.bf16.mxu0 %v10841_v22  ;;  %8073 = vmatprep.subr.bf16.mxu1 %v12613_v54  ;;  %v12730_v22 = vld [vmem:[#allocation9_spill] sm:$0xff] }
 0x68c   : > { %3949 = vmatprep.mubr.f32.mxu0 %v12615_v30  ;;  %6851 = vmatprep.mubr.msk.f32.mxu1 %vm8853_vm0, %v12615_v30 }
 0x68e   : > { %8045 = vmatpush1.bf16.msra.mxu0 %v10862_v10  ;;  %8075 = vmatpush3.bf16.msra.mxu1 %v10864_v19  ;;  %v12731_v10 = vld [vmem:[#allocation10_spill] sm:$0xff]  ;;  %v12732_v19 = vld [vmem:[#allocation11_spill] sm:$0xff] }
 0x68f   : > { %8047 = vmatprep.subr.bf16.mxu0 %v10871_v55  ;;  %8076 = vmatprep.subr.bf16.mxu1 %v12613_v54  ;;  %v12733_v55 = vld [vmem:[#allocation17_spill] sm:$0xff] }
 0x692   : > { %8049 = vmatpush1.bf16.msra.mxu0 %v10893_v1  ;;  %8078 = vmatpush3.bf16.msra.mxu1 %v10895_v37  ;;  %v12734_v1 = vld [vmem:[#allocation20_spill] sm:$0xff] }
 0x693   : > { %8051 = vmatprep.subr.bf16.mxu0 %v10902_v35  ;;  %8079 = vmatprep.subr.bf16.mxu1 %v12613_v54  ;;  %v12735_v37 = vld [vmem:[#allocation12_spill] sm:$0xff]  ;;  %v12736_v35 = vld [vmem:[#allocation21_spill] sm:$0xff] }
 0x696   : > { %8053 = vmatpush1.bf16.msra.mxu0 %v10921_v31  ;;  %8081 = vmatpush3.bf16.msra.mxu1 %v10923_v34  ;;  %v12737_v31 = vld [vmem:[#allocation22_spill] sm:$0xff]  ;;  %v12738_v34 = vld [vmem:[#allocation23_spill] sm:$0xff] }
 0x697   : > { %8055 = vmatprep.subr.bf16.mxu0 %v10930_v45  ;;  %8082 = vmatprep.subr.bf16.mxu1 %v12613_v54  ;;  %v12739_v45 = vld [vmem:[#allocation24_spill] sm:$0xff] }
 0x69a   : > { %8057 = vmatpush1.bf16.msra.mxu0 %v10949_v56  ;;  %8084 = vmatpush3.bf16.msra.mxu1 %v10951_v41 }
 0x69b   : > { %8059 = vmatprep.subr.bf16.mxu0 %v10958_v15  ;;  %8085 = vmatprep.subr.bf16.mxu1 %v12613_v54 }
 0x69e   : > { %8061 = vmatpush1.bf16.msra.mxu0 %v10977_v57  ;;  %8087 = vmatpush3.bf16.msra.mxu1 %v10979_v25 }
 0x69f   : > { %8063 = vmatprep.subr.bf16.mxu0 %v10986_v14  ;;  %8088 = vmatprep.subr.bf16.mxu1 %v12613_v54 }
 0x6a2   : > { %8065 = vmatpush1.bf16.msra.mxu0 %v11005_v32  ;;  %8090 = vmatpush3.bf16.msra.mxu1 %v11007_v27 }
 0x6a3   : > { %8067 = vmatprep.subr.bf16.mxu0 %v11014_v24  ;;  %8091 = vmatprep.subr.bf16.mxu1 %v12613_v54 }
 0x6a6   : > { %8069 = vmatpush1.bf16.msra.mxu0 %v11027_v5  ;;  %8093 = vmatpush3.bf16.msra.mxu1 %v11029_v38 }
 0x6a7   : > { %8095 = vmatprep.subr.bf16.mxu0 %v11047_v36  ;;  %8126 = vmatprep.subr.bf16.mxu1 %v12613_v54 }
 0x6a9   : > { %3950 = vmatmul.mubr.f32.vlgmr.msra.gmra.mrb[10].mxu0 %v11313_v7  ;;  %6852 = vmatmul.mubr.f32.vlgmr.msra.gmra.mrb[38].mxu1 %v11313_v7 }
 0x6aa   : > { %8097 = vmatpush1.bf16.msra.mxu0 %v11058_v21  ;;  %8128 = vmatpush3.bf16.msra.mxu1 %v11064_v17 }
 0x6ab   : > { %8099 = vmatprep.subr.bf16.mxu0 %v11074_v12  ;;  %8129 = vmatprep.subr.bf16.mxu1 %v12613_v54  ;;  %v12740_v12 = vld [vmem:[#allocation5_spill] sm:$0xff] }
 0x6ac   : > { %4160 = vmatprep.mubr.f32.mxu0 %v12615_v30  ;;  %6886 = vmatprep.mubr.msk.f32.mxu1 %vm8853_vm0, %v12615_v30 }
 0x6ae   : > { %8101 = vmatpush1.bf16.msra.mxu0 %v11086_v49  ;;  %8131 = vmatpush3.bf16.msra.mxu1 %v11092_v26 }
 0x6af   : > { %8103 = vmatprep.subr.bf16.mxu0 %v11102_v59  ;;  %8132 = vmatprep.subr.bf16.mxu1 %v12613_v54 }
 0x6b2   : > { %8105 = vmatpush1.bf16.msra.mxu0 %v11114_v52  ;;  %8134 = vmatpush3.bf16.msra.mxu1 %v11120_v51 }
 0x6b3   : > { %8107 = vmatprep.subr.bf16.mxu0 %v11130_v48  ;;  %8135 = vmatprep.subr.bf16.mxu1 %v12613_v54 }
 0x6b6   : > { %8109 = vmatpush1.bf16.msra.mxu0 %v11142_v2  ;;  %8137 = vmatpush3.bf16.msra.mxu1 %v11148_v63 }
 0x6b7   : > { %8111 = vmatprep.subr.bf16.mxu0 %v12727_v28  ;;  %8138 = vmatprep.subr.bf16.mxu1 %v12613_v54 }
 0x6ba   : > { %8113 = vmatpush1.bf16.msra.mxu0 %v12728_v9  ;;  %8140 = vmatpush3.bf16.msra.mxu1 %v12729_v6 }
 0x6bb   : > { %8115 = vmatprep.subr.bf16.mxu0 %v12730_v22  ;;  %8141 = vmatprep.subr.bf16.mxu1 %v12613_v54 }
 0x6be   : > { %8117 = vmatpush1.bf16.msra.mxu0 %v12731_v10  ;;  %8143 = vmatpush3.bf16.msra.mxu1 %v12732_v19 }
 0x6bf   : > { %8119 = vmatprep.subr.bf16.mxu0 %v12733_v55  ;;  %8144 = vmatprep.subr.bf16.mxu1 %v12613_v54 }
 0x6c2   : > { %8121 = vmatpush1.bf16.msra.mxu0 %v12734_v1  ;;  %8146 = vmatpush3.bf16.msra.mxu1 %v12735_v37 }
 0x6c3   : > { %8123 = vmatprep.subr.bf16.mxu0 %v12736_v35  ;;  %8147 = vmatprep.subr.bf16.mxu1 %v12613_v54 }
 0x6c6   : > { %8125 = vmatpush1.bf16.msra.mxu0 %v12737_v31  ;;  %8149 = vmatpush3.bf16.msra.mxu1 %v12738_v34 }
 0x6c7   : > { %8151 = vmatprep.subr.bf16.mxu0 %v12739_v45  ;;  %8182 = vmatprep.subr.bf16.mxu1 %v12613_v54  ;;  %v12741_v45 = vld [vmem:[#allocation15_spill] sm:$0xff] }
 0x73c   : > { %v3614_v56 = vpop.f32.mrb[34].mxu1 }
 0x73d   : > { %v6783_v41 = vpop.f32.mrb[35].mxu1  ;;  %v3615_v59 = vadd.f32 %v3614_v56, %v9925_v3 }
 0x75c   : > { %v3732_v15 = vpop.f32.mrb[24].mxu0  ;;  %v3803_v57 = vpop.f32.mrb[36].mxu1 }
 0x75d   : > { %v8591_v25 = vadd.f32 %v9915_v11, %v3732_v15  ;;  %v3734_v14 = vpop.f32.mrb[25].mxu0  ;;  %v6818_v32 = vpop.f32.mrb[37].mxu1  ;;  %v3804_v49 = vadd.f32 %v3803_v57, %v12740_v12 }
 0x75e   : > { %v8593_v24 = vadd.f32 %v9917_v16, %v3734_v14  ;;  %v12746_v32 = vld [vmem:[#allocation28_spill] sm:$0xff] }
 0x75f   : > { %v5798_v27 = vmul.f32 -1.442695, %v8591_v25 }
 0x760   : > { %v5799_v5 = vmul.f32 -1.442695, %v8593_v24  ;;  %v12748_v24 = vld [vmem:[#allocation30_spill] sm:$0xff] }
 0x761   : > { %8756 = vpow2.f32 %v5798_v27  ;;  %v12747_v27 = vld [vmem:[#allocation29_spill] sm:$0xff] }
 0x762   : > { %8758 = vpow2.f32 %v5799_v5  ;;  %v12751_v5 = vld [vmem:[#allocation33_spill] sm:$0xff] }
 0x76b   : > { %v8757_v38 = vpop.eup %8756 }
 0x76c   : > { %v3811_v36 = vadd.f32 1.0, %v8757_v38  ;;  %v8759_v21 = vpop.eup %8758  ;;  %v12752_v38 = vld [vmem:[#allocation34_spill] sm:$0xff] }
 0x76d   : > { %v3818_v17 = vadd.f32 1.0, %v8759_v21  ;;  %v4460_v21 = vld [vmem:[%s12482_s3 + $0x20] sm:$0xff] }
 0x76e   : > { %8760 = vrcp.f32 %v3811_v36  ;;  %v4457_v36 = vld [vmem:[%s12482_s3 + $0x8] sm:$0xff] }
 0x76f   : > { %8762 = vrcp.f32 %v3818_v17  ;;  %v4459_v17 = vld [vmem:[%s12482_s3 + $0x18] sm:$0xff] }
 0x778   : > { %v8761_v26 = vpop.eup %8760 }
 0x779   : > { %v3821_v52 = vmul.f32 %v8761_v26, %v3804_v49  ;;  %v8763_v39 = vpop.eup %8762  ;;  %v4466_v49 = vld [vmem:[%s12482_s3 + $0x50] sm:$0xff] }
 0x77a   : > { %v3824_v28 = vsub.f32 1.0, %v8763_v39  ;;  %v3826_v22 = vmul.f32 %v8763_v39, %v11281_v13  ;;  %v4471_v39 = vld [vmem:[%s12482_s3 + $0x78] sm:$0xff] }
 0x77b   : > { %v3822_v51 = vadd.f32 %v3821_v52, %v3615_v59  ;;  %v4462_v52 = vld [vmem:[%s12482_s3 + $0x30] sm:$0xff] }
 0x77c   : > { %v3951_v48 = vpop.f32.mrb[10].mxu0  ;;  %v4022_v2 = vpop.f32.mrb[38].mxu1 }
 0x77d   : > { %8764 = vtanh.f32 %v3822_v51  ;;  %v8563_v63 = vadd.f32 %v12635_v58, %v3951_v48  ;;  %v3953_v42 = vpop.f32.mrb[11].mxu0  ;;  %v6853_v23 = vpop.f32.mrb[39].mxu1  ;;  %v4023_v35 = vadd.f32 %v4022_v2, %v9602_v20  ;;  %v4467_v48 = vld [vmem:[%s12482_s3 + $0x58] sm:$0xff]  ;;  %v4469_v2 = vld [vmem:[%s12482_s3 + $0x68] sm:$0xff] }
 0x77e   : > { %v8565_v4 = vadd.f32 %v9597_v43, %v3953_v42 }
 0x77f   : > { %v5801_v50 = vmul.f32 -1.442695, %v8563_v63  ;;  %v4472_v63 = vld [vmem:[%s12482_s3 + $0x80] sm:$0xff] }
 0x780   : > { %v5802_v29 = vmul.f32 -1.442695, %v8565_v4  ;;  %v11701_v4 = vpack.c.bf16 %v4472_v63, %v4469_v2  ;;  %v4498_v2 = vld [vmem:[%s12482_s3 + $0x150] sm:$0xff] }
 0x781   : > { %8766 = vpow2.f32 %v5801_v50  ;;  %v4468_v50 = vld [vmem:[%s12482_s3 + $0x60] sm:$0xff] }
 0x782   : > { %8768 = vpow2.f32 %v5802_v29  ;;  %v4470_v29 = vld [vmem:[%s12482_s3 + $0x70] sm:$0xff] }
 0x787   : > { %v8765_v9 = vpop.eup %8764 }
 0x788   : > { %v3825_v6 = vmul.f32 %v8765_v9, %v3824_v28  ;;  %v4473_v28 = vld [vmem:[%s12482_s3 + $0x88] sm:$0xff]  ;;  %v4475_v9 = vld [vmem:[%s12482_s3 + $0x98] sm:$0xff] }
 0x78a   : > { %v11592_v10 = vadd.f32 %v3826_v22, %v3825_v6  ;;  %v4478_v6 = vld [vmem:[%s12482_s3 + $0xb0] sm:$0xff]  ;;  %v11723_v22 = vpack.c.bf16 %v4471_v39, %v4468_v50  ;;  %v4501_v50 = vld [vmem:[%s12482_s3 + $0x168] sm:$0xff]  ;;  %v4500_v39 = vld [vmem:[%s12482_s3 + $0x160] sm:$0xff] }
 0x78b   : > { %v8767_v19 = vpop.eup %8766 }
 0x78c   : > { %5800 = vst [vmem:[%s8930_s20 + $0x20] sm:$0xff] %v11592_v10  ;;  %v4030_v55 = vadd.f32 1.0, %v8767_v19  ;;  %v8769_v1 = vpop.eup %8768  ;;  %v11725_v19 = vpack.c.bf16 %v4473_v28, %v4470_v29  ;;  %v4503_v29 = vld [vmem:[%s12482_s3 + $0x178] sm:$0xff]  ;;  %v11857_v28 = vpack.c.bf16 %v4501_v50, %v4498_v2  ;;  %v4684_v2 = vld [vmem:[%s12484_s5 + $0x88] sm:$0xff] }
 0x78d   : > { %v4037_v37 = vadd.f32 1.0, %v8769_v1  ;;  %v11732_v1 = vpack.c.bf16 %v4478_v6, %v4475_v9  ;;  %v11859_v9 = vpack.c.bf16 %v4503_v29, %v4500_v39  ;;  %v4668_v6 = vld [vmem:[%s12484_s5 + $0x8] sm:$0xff]  ;;  %v4686_v39 = vld [vmem:[%s12484_s5 + $0x98] sm:$0xff]  ;;  %v4689_v29 = vld [vmem:[%s12484_s5 + $0xb0] sm:$0xff] }
 0x78e   : > { %8770 = vrcp.f32 %v4030_v55  ;;  %v4474_v55 = vld [vmem:[%s12482_s3 + $0x90] sm:$0xff] }
 0x78f   : > { %8772 = vrcp.f32 %v4037_v37  ;;  %v4477_v37 = vld [vmem:[%s12482_s3 + $0xa8] sm:$0xff] }
 0x798   : > { %v8771_v31 = vpop.eup %8770 }
 0x799   : > { %v4040_v34 = vmul.f32 %v8771_v31, %v4023_v35  ;;  %v8773_v41 = vpop.eup %8772  ;;  %v4476_v35 = vld [vmem:[%s12482_s3 + $0xa0] sm:$0xff]  ;;  %v4479_v31 = vld [vmem:[%s12482_s3 + $0xb8] sm:$0xff] }
 0x79a   : > { %v4043_v13 = vsub.f32 1.0, %v8773_v41  ;;  %v4045_v25 = vmul.f32 %v8773_v41, %v11313_v7  ;;  %v12742_v7 = vld [vmem:[#allocation13_spill] sm:$0xff]  ;;  %v11753_v41 = vpack.c.bf16 %v4479_v31, %v4476_v35  ;;  %v4667_v35 = vld [vmem:[%s12484_s5] sm:$0xff]  ;;  %v4670_v31 = vld [vmem:[%s12484_s5 + $0x18] sm:$0xff] }
 0x79b   : > { %v4041_v56 = vadd.f32 %v4040_v34, %v12741_v45  ;;  %v4481_v34 = vld [vmem:[%s12482_s3 + $0xc8] sm:$0xff]  ;;  %v4484_v45 = vld [vmem:[%s12482_s3 + $0xe0] sm:$0xff] }
 0x79d   : > { %8774 = vtanh.f32 %v4041_v56  ;;  %v11751_v56 = vpack.c.bf16 %v4477_v37, %v4474_v55  ;;  %v4671_v55 = vld [vmem:[%s12484_s5 + $0x20] sm:$0xff] }
 0x79e   : > { %v11877_v37 = vpack.c.bf16 %v4671_v55, %v4668_v6  ;;  %v11960_v6 = vpack.c.bf16 %v4689_v29, %v4686_v39  ;;  %v4685_v55 = vld [vmem:[%s12484_s5 + $0x90] sm:$0xff] }
 0x79f   : > { %v4697_v29 = vld [vmem:[%s12484_s5 + $0xf0] sm:$0xff] }
 0x7a7   : > { %v8775_v15 = vpop.eup %8774 }
 0x7a8   : > { %v4044_v57 = vmul.f32 %v8775_v15, %v4043_v13  ;;  %v4480_v13 = vld [vmem:[%s12482_s3 + $0xc0] sm:$0xff]  ;;  %v11760_v15 = vpack.c.bf16 %v4484_v45, %v4481_v34  ;;  %v4669_v34 = vld [vmem:[%s12484_s5 + $0x10] sm:$0xff]  ;;  %v11888_v45 = vpack.c.bf16 %v4670_v31, %v4667_v35  ;;  %v4688_v35 = vld [vmem:[%s12484_s5 + $0xa8] sm:$0xff] }
 0x7a9   : > { %v4687_v31 = vld [vmem:[%s12484_s5 + $0xa0] sm:$0xff] }
 0x7aa   : > { %v11599_v14 = vadd.f32 %v4045_v25, %v4044_v57  ;;  %v4483_v57 = vld [vmem:[%s12482_s3 + $0xd8] sm:$0xff]  ;;  %v4482_v25 = vld [vmem:[%s12482_s3 + $0xd0] sm:$0xff] }
 0x7ac   : > { %4161 = vmatmul.mubr.f32.vlgmr.msra.gmra.mrb[26].mxu0 %v11599_v14  ;;  %6887 = vmatmul.mubr.f32.vlgmr.msra.gmra.mrb[40].mxu1 %v11599_v14 }
 0x7ad   : > { %8153 = vmatpush1.bf16.msra.mxu0 %v11306_v47  ;;  %8184 = vmatpush3.bf16.msra.mxu1 %v11308_v0  ;;  %v12743_v47 = vld [vmem:[#allocation25_spill] sm:$0xff]  ;;  %v12744_v0 = vld [vmem:[#allocation26_spill] sm:$0xff] }
 0x7ae   : > { %8155 = vmatprep.subr.bf16.mxu0 %v11315_v62  ;;  %8185 = vmatprep.subr.bf16.mxu1 %v12613_v54  ;;  %v12745_v62 = vld [vmem:[#allocation27_spill] sm:$0xff] }
 0x7af   : > { %4349 = vmatprep.mubr.f32.mxu0 %v12615_v30  ;;  %6921 = vmatprep.mubr.msk.f32.mxu1 %vm8853_vm0, %v12615_v30 }
 0x7b1   : > { %8157 = vmatpush1.bf16.msra.mxu0 %v11336_v18  ;;  %8187 = vmatpush3.bf16.msra.mxu1 %v11338_v61  ;;  %v12749_v18 = vld [vmem:[#allocation31_spill] sm:$0xff]  ;;  %v12750_v61 = vld [vmem:[#allocation32_spill] sm:$0xff] }
 0x7b2   : > { %8159 = vmatprep.subr.bf16.mxu0 %v12742_v7  ;;  %8188 = vmatprep.subr.bf16.mxu1 %v12613_v54  ;;  %v4485_v7 = vld [vmem:[%s12482_s3 + $0xe8] sm:$0xff] }
 0x7b5   : > { %8161 = vmatpush1.bf16.msra.mxu0 %v12743_v47  ;;  %8190 = vmatpush3.bf16.msra.mxu1 %v12744_v0  ;;  %v4487_v47 = vld [vmem:[%s12482_s3 + $0xf8] sm:$0xff]  ;;  %v4490_v0 = vld [vmem:[%s12482_s3 + $0x110] sm:$0xff] }
 0x7b6   : > { %8163 = vmatprep.subr.bf16.mxu0 %v12745_v62  ;;  %8191 = vmatprep.subr.bf16.mxu1 %v12613_v54  ;;  %v11779_v62 = vpack.c.bf16 %v4483_v57, %v4480_v13  ;;  %v4672_v13 = vld [vmem:[%s12484_s5 + $0x28] sm:$0xff] }
 0x7b7   : > { %v11894_v57 = vpack.c.bf16 %v4672_v13, %v4669_v34  ;;  %v11972_v34 = vpack.c.bf16 %v4688_v35, %v4685_v55  ;;  %v4690_v13 = vld [vmem:[%s12484_s5 + $0xb8] sm:$0xff]  ;;  %v4700_v55 = vld [vmem:[%s12484_s5 + $0x108] sm:$0xff]  ;;  %v4699_v35 = vld [vmem:[%s12484_s5 + $0x100] sm:$0xff] }
 0x7b9   : > { %8165 = vmatpush1.bf16.msra.mxu0 %v12746_v32  ;;  %8193 = vmatpush3.bf16.msra.mxu1 %v12747_v27  ;;  %v11781_v32 = vpack.c.bf16 %v4485_v7, %v4482_v25  ;;  %v4486_v27 = vld [vmem:[%s12482_s3 + $0xf0] sm:$0xff]  ;;  %v4674_v25 = vld [vmem:[%s12484_s5 + $0x38] sm:$0xff] }
 0x7ba   : > { %8167 = vmatprep.subr.bf16.mxu0 %v12748_v24  ;;  %8194 = vmatprep.subr.bf16.mxu1 %v12613_v54  ;;  %v11788_v24 = vpack.c.bf16 %v4490_v0, %v4487_v47  ;;  %v4677_v7 = vld [vmem:[%s12484_s5 + $0x50] sm:$0xff] }
 0x7bb   : > { %v11904_v47 = vpack.c.bf16 %v4677_v7, %v4674_v25  ;;  %v4673_v0 = vld [vmem:[%s12484_s5 + $0x30] sm:$0xff]  ;;  %v11978_v25 = vpack.c.bf16 %v4690_v13, %v4687_v31  ;;  %v4692_v7 = vld [vmem:[%s12484_s5 + $0xc8] sm:$0xff]  ;;  %v12028_v31 = vpack.c.bf16 %v4700_v55, %v4697_v29  ;;  %v4702_v13 = vld [vmem:[%s12484_s5 + $0x118] sm:$0xff] }
 0x7bc   : > { %v4708_v29 = vld [vmem:[%s12484_s5 + $0x148] sm:$0xff]  ;;  %v4710_v55 = vld [vmem:[%s12484_s5 + $0x158] sm:$0xff] }
 0x7bd   : > { %8169 = vmatpush1.bf16.msra.mxu0 %v12749_v18  ;;  %8196 = vmatpush3.bf16.msra.mxu1 %v12750_v61  ;;  %v4489_v18 = vld [vmem:[%s12482_s3 + $0x108] sm:$0xff]  ;;  %v4488_v61 = vld [vmem:[%s12482_s3 + $0x100] sm:$0xff]  ;;  %12757 = vst [vmem:[#allocation8_spill] sm:$0xff] %v12028_v31 }
 0x7be   : > { %8171 = vmatprep.subr.bf16.mxu0 %v12751_v5  ;;  %8197 = vmatprep.subr.bf16.mxu1 %v12613_v54  ;;  %v4491_v5 = vld [vmem:[%s12482_s3 + $0x118] sm:$0xff] }
 0x7c1   : > { %8173 = vmatpush1.bf16.msra.mxu0 %v12752_v38  ;;  %8199 = vmatpush3.bf16.msra.mxu1 %v11453_v33  ;;  %v4456_v33 = vld [vmem:[%s12482_s3] sm:$0xff]  ;;  %v4493_v38 = vld [vmem:[%s12482_s3 + $0x128] sm:$0xff] }
 0x7c2   : > { %8175 = vmatprep.subr.bf16.mxu0 %v11460_v44  ;;  %8200 = vmatprep.subr.bf16.mxu1 %v12613_v54  ;;  %v11643_v44 = vpack.c.bf16 %v4460_v21, %v4457_v36  ;;  %v11662_v26 = vpack.c.bf16 %v4459_v17, %v4456_v33  ;;  %v4496_v36 = vld [vmem:[%s12482_s3 + $0x140] sm:$0xff]  ;;  %v11807_v21 = vpack.c.bf16 %v4489_v18, %v4486_v27  ;;  %v4676_v27 = vld [vmem:[%s12484_s5 + $0x48] sm:$0xff] }
 0x7c3   : > { %v11809_v33 = vpack.c.bf16 %v4491_v5, %v4488_v61  ;;  %v4492_v17 = vld [vmem:[%s12482_s3 + $0x120] sm:$0xff]  ;;  %v11916_v61 = vpack.c.bf16 %v4676_v27, %v4673_v0  ;;  %v4678_v5 = vld [vmem:[%s12484_s5 + $0x58] sm:$0xff] }
 0x7c4   : > { %v4675_v18 = vld [vmem:[%s12484_s5 + $0x40] sm:$0xff] }
 0x7c5   : > { %8177 = vmatpush1.bf16.msra.mxu0 %v11479_v40  ;;  %8202 = vmatpush3.bf16.msra.mxu1 %v11481_v8  ;;  %v4458_v40 = vld [vmem:[%s12482_s3 + $0x10] sm:$0xff]  ;;  %v4461_v8 = vld [vmem:[%s12482_s3 + $0x28] sm:$0xff]  ;;  %v4695_v0 = vld [vmem:[%s12484_s5 + $0xe0] sm:$0xff] }
 0x7c6   : > { %8179 = vmatprep.subr.bf16.mxu0 %v11488_v60  ;;  %8203 = vmatprep.subr.bf16.mxu1 %v12613_v54  ;;  %v4463_v60 = vld [vmem:[%s12482_s3 + $0x38] sm:$0xff]  ;;  %v11664_v59 = vpack.c.bf16 %v4461_v8, %v4458_v40  ;;  %v11816_v40 = vpack.c.bf16 %v4496_v36, %v4493_v38  ;;  %v11922_v38 = vpack.c.bf16 %v4678_v5, %v4675_v18  ;;  %v4680_v36 = vld [vmem:[%s12484_s5 + $0x68] sm:$0xff]  ;;  %v4691_v18 = vld [vmem:[%s12484_s5 + $0xc0] sm:$0xff] }
 0x7c7   : > { %v11671_v51 = vpack.c.bf16 %v4466_v49, %v4463_v60  ;;  %v4495_v8 = vld [vmem:[%s12482_s3 + $0x138] sm:$0xff]  ;;  %v4494_v60 = vld [vmem:[%s12482_s3 + $0x130] sm:$0xff]  ;;  %v4497_v49 = vld [vmem:[%s12482_s3 + $0x148] sm:$0xff]  ;;  %v11988_v27 = vpack.c.bf16 %v4695_v0, %v4692_v7 }
 0x7c8   : > { %v4694_v5 = vld [vmem:[%s12484_s5 + $0xd8] sm:$0xff]  ;;  %v4704_v7 = vld [vmem:[%s12484_s5 + $0x128] sm:$0xff]  ;;  %v4707_v0 = vld [vmem:[%s12484_s5 + $0x140] sm:$0xff] }
 0x7c9   : > { %8181 = vmatpush1.bf16.msra.mxu0 %v11501_v46  ;;  %8205 = vmatpush3.bf16.msra.mxu1 %v11503_v53  ;;  %v4465_v46 = vld [vmem:[%s12482_s3 + $0x48] sm:$0xff]  ;;  %v4464_v53 = vld [vmem:[%s12482_s3 + $0x40] sm:$0xff]  ;;  %12753 = vst [vmem:[#allocation14_spill] sm:$0xff] %v11988_v27 }
 0x7ca   : > { %8207 = vmatprep.subr.bf16.mxu0 %v11643_v44  ;;  %8238 = vmatprep.subr.bf16.mxu1 %v12613_v54  ;;  %v11692_v42 = vpack.c.bf16 %v4465_v46, %v4462_v52  ;;  %v11694_v23 = vpack.c.bf16 %v4467_v48, %v4464_v53  ;;  %v4499_v52 = vld [vmem:[%s12482_s3 + $0x158] sm:$0xff]  ;;  %v4502_v46 = vld [vmem:[%s12482_s3 + $0x170] sm:$0xff]  ;;  %v11835_v53 = vpack.c.bf16 %v4495_v8, %v4492_v17  ;;  %v4683_v17 = vld [vmem:[%s12484_s5 + $0x80] sm:$0xff] }
 0x7cb   : > { %v11837_v48 = vpack.c.bf16 %v4497_v49, %v4494_v60  ;;  %v11844_v63 = vpack.c.bf16 %v4502_v46, %v4499_v52  ;;  %v11932_v8 = vpack.c.bf16 %v4683_v17, %v4680_v36  ;;  %v4679_v60 = vld [vmem:[%s12484_s5 + $0x60] sm:$0xff]  ;;  %v4682_v49 = vld [vmem:[%s12484_s5 + $0x78] sm:$0xff]  ;;  %v4681_v52 = vld [vmem:[%s12484_s5 + $0x70] sm:$0xff]  ;;  %v12000_v17 = vpack.c.bf16 %v4694_v5, %v4691_v18 }
 0x7cc   : > { %4350 = vmatmul.mubr.f32.vlgmr.msra.gmra.mrb[26].mxu0 %v11592_v10  ;;  %6922 = vmatmul.mubr.f32.vlgmr.msra.gmra.mrb[42].mxu1 %v11592_v10  ;;  %v11944_v46 = vpack.c.bf16 %v4682_v49, %v4679_v60  ;;  %v11950_v50 = vpack.c.bf16 %v4684_v2, %v4681_v52  ;;  %v4693_v36 = vld [vmem:[%s12484_s5 + $0xd0] sm:$0xff]  ;;  %v4696_v60 = vld [vmem:[%s12484_s5 + $0xe8] sm:$0xff]  ;;  %v4698_v52 = vld [vmem:[%s12484_s5 + $0xf8] sm:$0xff]  ;;  %v12040_v18 = vpack.c.bf16 %v4702_v13, %v4699_v35 }
 0x7cd   : > { %8209 = vmatpush1.bf16.msra.mxu0 %v11662_v26  ;;  %8240 = vmatpush3.bf16.msra.mxu1 %v11664_v59  ;;  %12754 = vst [vmem:[#allocation16_spill] sm:$0xff] %v12000_v17  ;;  %v12006_v49 = vpack.c.bf16 %v4696_v60, %v4693_v36  ;;  %v4701_v2 = vld [vmem:[%s12484_s5 + $0x110] sm:$0xff]  ;;  %v12042_v5 = vpack.c.bf16 %v4707_v0, %v4704_v7  ;;  %v4703_v36 = vld [vmem:[%s12484_s5 + $0x120] sm:$0xff]  ;;  %v4706_v60 = vld [vmem:[%s12484_s5 + $0x138] sm:$0xff] }
 0x7ce   : > { %8211 = vmatprep.subr.bf16.mxu0 %v11671_v51  ;;  %8241 = vmatprep.subr.bf16.mxu1 %v12613_v54  ;;  %v12016_v39 = vpack.c.bf16 %v4701_v2, %v4698_v52  ;;  %12758 = vst [vmem:[#allocation9_spill] sm:$0xff] %v12040_v18  ;;  %v4705_v52 = vld [vmem:[%s12484_s5 + $0x130] sm:$0xff]  ;;  %v12054_v2 = vpack.c.bf16 %v4706_v60, %v4703_v36  ;;  %v4712_v36 = vld [vmem:[%s12484_s5 + $0x168] sm:$0xff]  ;;  %v4711_v60 = vld [vmem:[%s12484_s5 + $0x160] sm:$0xff] }
 0x7cf   : > { %4568 = vmatprep.mubr.f32.mxu0 %v12615_v30  ;;  %6956 = vmatprep.mubr.msk.f32.mxu1 %vm8853_vm0, %v12615_v30  ;;  %12755 = vst [vmem:[#allocation6_spill] sm:$0xff] %v12006_v49  ;;  %12759 = vst [vmem:[#allocation10_spill] sm:$0xff] %v12042_v5  ;;  %v4713_v35 = vld [vmem:[%s12484_s5 + $0x170] sm:$0xff]  ;;  %v12067_v13 = vpack.c.bf16 %v4708_v29, %v4705_v52  ;;  %v4714_v52 = vld [vmem:[%s12484_s5 + $0x178] sm:$0xff] }
 0x7d0   : > { %12756 = vst [vmem:[#allocation7_spill] sm:$0xff] %v12016_v39  ;;  %12760 = vst [vmem:[#allocation11_spill] sm:$0xff] %v12054_v2  ;;  %v12069_v7 = vpack.c.bf16 %v4713_v35, %v4710_v55  ;;  %v4709_v0 = vld [vmem:[%s12484_s5 + $0x150] sm:$0xff]  ;;  %v4857_v29 = vld [vmem:[%s12486_s7 + $0x8] sm:$0xff] }
 0x7d1   : > { %8213 = vmatpush1.bf16.msra.mxu0 %v11692_v42  ;;  %8243 = vmatpush3.bf16.msra.mxu1 %v11694_v23  ;;  %12761 = vst [vmem:[#allocation17_spill] sm:$0xff] %v12067_v13  ;;  %v4860_v55 = vld [vmem:[%s12486_s7 + $0x20] sm:$0xff]  ;;  %v12091_v35 = vpack.c.bf16 %v4712_v36, %v4709_v0 }
 0x7d2   : > { %8215 = vmatprep.subr.bf16.mxu0 %v11701_v4  ;;  %8244 = vmatprep.subr.bf16.mxu1 %v12613_v54  ;;  %12762 = vst [vmem:[#allocation20_spill] sm:$0xff] %v12069_v7 }
 0x7d3   : > { %12763 = vst [vmem:[#allocation12_spill] sm:$0xff] %v12091_v35 }
 0x7d5   : > { %8217 = vmatpush1.bf16.msra.mxu0 %v11723_v22  ;;  %8246 = vmatpush3.bf16.msra.mxu1 %v11725_v19 }
 0x7d6   : > { %8219 = vmatprep.subr.bf16.mxu0 %v11732_v1  ;;  %8247 = vmatprep.subr.bf16.mxu1 %v12613_v54 }
 0x7d9   : > { %8221 = vmatpush1.bf16.msra.mxu0 %v11751_v56  ;;  %8249 = vmatpush3.bf16.msra.mxu1 %v11753_v41 }
 0x7da   : > { %8223 = vmatprep.subr.bf16.mxu0 %v11760_v15  ;;  %8250 = vmatprep.subr.bf16.mxu1 %v12613_v54 }
 0x7dd   : > { %8225 = vmatpush1.bf16.msra.mxu0 %v11779_v62  ;;  %8252 = vmatpush3.bf16.msra.mxu1 %v11781_v32 }
 0x7de   : > { %8227 = vmatprep.subr.bf16.mxu0 %v11788_v24  ;;  %8253 = vmatprep.subr.bf16.mxu1 %v12613_v54 }
 0x7e1   : > { %8229 = vmatpush1.bf16.msra.mxu0 %v11807_v21  ;;  %8255 = vmatpush3.bf16.msra.mxu1 %v11809_v33 }
 0x7e2   : > { %8231 = vmatprep.subr.bf16.mxu0 %v11816_v40  ;;  %8256 = vmatprep.subr.bf16.mxu1 %v12613_v54 }
 0x7e5   : > { %8233 = vmatpush1.bf16.msra.mxu0 %v11835_v53  ;;  %8258 = vmatpush3.bf16.msra.mxu1 %v11837_v48 }
 0x7e6   : > { %8235 = vmatprep.subr.bf16.mxu0 %v11844_v63  ;;  %8259 = vmatprep.subr.bf16.mxu1 %v12613_v54 }
 0x7e9   : > { %8237 = vmatpush1.bf16.msra.mxu0 %v11857_v28  ;;  %8261 = vmatpush3.bf16.msra.mxu1 %v11859_v9 }
 0x7ea   : > { %8294 = vmatprep.subr.bf16.mxu1 %v12613_v54  ;;  %8263 = vmatprep.subr.bf16.mxu0 %v11877_v37 }
 0x7ec   : > { %4569 = vmatmul.mubr.f32.vlgmr.msra.gmra.mrb[12].mxu0 %v11599_v14  ;;  %6957 = vmatmul.mubr.f32.vlgmr.msra.gmra.mrb[44].mxu1 %v11599_v14 }
 0x7ed   : > { %4779 = vmatprep.mubr.f32.mxu0 %v12615_v30  ;;  %6991 = vmatprep.mubr.msk.f32.mxu1 %vm8853_vm0, %v12615_v30 }
 0x7ee   : > { %8265 = vmatpush1.bf16.msra.mxu0 %v11888_v45  ;;  %8296 = vmatpush3.bf16.msra.mxu1 %v11894_v57 }
 0x7ef   : > { %8297 = vmatprep.subr.bf16.mxu1 %v12613_v54  ;;  %8267 = vmatprep.subr.bf16.mxu0 %v11904_v47 }
 0x7f2   : > { %8269 = vmatpush1.bf16.msra.mxu0 %v11916_v61  ;;  %8299 = vmatpush3.bf16.msra.mxu1 %v11922_v38 }
 0x7f3   : > { %8300 = vmatprep.subr.bf16.mxu1 %v12613_v54  ;;  %8271 = vmatprep.subr.bf16.mxu0 %v11932_v8 }
 0x7f6   : > { %8273 = vmatpush1.bf16.msra.mxu0 %v11944_v46  ;;  %8302 = vmatpush3.bf16.msra.mxu1 %v11950_v50 }
 0x7f7   : > { %8303 = vmatprep.subr.bf16.mxu1 %v12613_v54  ;;  %8275 = vmatprep.subr.bf16.mxu0 %v11960_v6 }
 0x7fa   : > { %8277 = vmatpush1.bf16.msra.mxu0 %v11972_v34  ;;  %8305 = vmatpush3.bf16.msra.mxu1 %v11978_v25 }
 0x7fb   : > { %8306 = vmatprep.subr.bf16.mxu1 %v12613_v54  ;;  %8279 = vmatprep.subr.bf16.mxu0 %v11988_v27 }
 0x7fe   : > { %8281 = vmatpush1.bf16.msra.mxu0 %v12000_v17  ;;  %8308 = vmatpush3.bf16.msra.mxu1 %v12006_v49 }
 0x7ff   : > { %8309 = vmatprep.subr.bf16.mxu1 %v12613_v54  ;;  %8283 = vmatprep.subr.bf16.mxu0 %v12016_v39 }
 0x802   : > { %8285 = vmatpush1.bf16.msra.mxu0 %v12028_v31  ;;  %8311 = vmatpush3.bf16.msra.mxu1 %v12040_v18  ;;  %v12097_v18 = vpack.c.bf16 %v4860_v55, %v4857_v29 }
 0x803   : > { %8287 = vmatprep.subr.bf16.mxu0 %v12042_v5  ;;  %8312 = vmatprep.subr.bf16.mxu1 %v12613_v54  ;;  %v12095_v5 = vpack.c.bf16 %v4714_v52, %v4711_v60 }
 0x804   : > { %12765 = vst [vmem:[#allocation22_spill] sm:$0xff] %v12097_v18 }
 0x805   : > { %12764 = vst [vmem:[#allocation21_spill] sm:$0xff] %v12095_v5 }
 0x806   : > { %8289 = vmatpush1.bf16.msra.mxu0 %v12054_v2  ;;  %8314 = vmatpush3.bf16.msra.mxu1 %v12067_v13 }
 0x807   : > { %8291 = vmatprep.subr.bf16.mxu0 %v12069_v7  ;;  %8315 = vmatprep.subr.bf16.mxu1 %v12613_v54 }
 0x80a   : > { %8293 = vmatpush1.bf16.msra.mxu0 %v12091_v35  ;;  %8317 = vmatpush3.bf16.msra.mxu1 %v12095_v5 }
 0x80b   : > { %8319 = vmatprep.subr.bf16.mxu0 %v12097_v18  ;;  %8350 = vmatprep.subr.bf16.mxu1 %v12613_v54 }
 0x87f   : > { %v4233_v0 = vpop.f32.mrb[40].mxu1 }
 0x880   : > { %v6888_v36 = vpop.f32.mrb[41].mxu1  ;;  %v4234_v17 = vadd.f32 %v4233_v0, %v9925_v3 }
 0x89f   : > { %v4351_v2 = vpop.f32.mrb[26].mxu0  ;;  %v4422_v13 = vpop.f32.mrb[42].mxu1 }
 0x8a0   : > { %v8595_v7 = vadd.f32 %v9915_v11, %v4351_v2  ;;  %v4353_v60 = vpop.f32.mrb[27].mxu0  ;;  %v6923_v52 = vpop.f32.mrb[43].mxu1  ;;  %v4423_v49 = vadd.f32 %v4422_v13, %v12740_v12 }
 0x8a1   : > { %v8597_v55 = vadd.f32 %v9917_v16, %v4353_v60 }
 0x8a2   : > { %v5803_v29 = vmul.f32 -1.442695, %v8595_v7 }
 0x8a3   : > { %v5804_v31 = vmul.f32 -1.442695, %v8597_v55 }
 0x8a4   : > { %8776 = vpow2.f32 %v5803_v29 }
 0x8a5   : > { %8778 = vpow2.f32 %v5804_v31 }
 0x8ae   : > { %v8777_v35 = vpop.eup %8776 }
 0x8af   : > { %v4430_v5 = vadd.f32 1.0, %v8777_v35  ;;  %v8779_v18 = vpop.eup %8778 }
 0x8b0   : > { %v4437_v39 = vadd.f32 1.0, %v8779_v18 }
 0x8b1   : > { %8780 = vrcp.f32 %v4430_v5 }
 0x8b2   : > { %8782 = vrcp.f32 %v4437_v39 }
 0x8bb   : > { %v8781_v36 = vpop.eup %8780 }
 0x8bc   : > { %v4440_v27 = vmul.f32 %v8781_v36, %v4423_v49  ;;  %v8783_v18 = vpop.eup %8782 }
 0x8bd   : > { %v4443_v55 = vsub.f32 1.0, %v8783_v18  ;;  %v4445_v49 = vmul.f32 %v8783_v18, %v11592_v10  ;;  %v4856_v10 = vld [vmem:[%s12486_s7] sm:$0xff]  ;;  %v4859_v18 = vld [vmem:[%s12486_s7 + $0x18] sm:$0xff] }
 0x8be   : > { %v4441_v2 = vadd.f32 %v4440_v27, %v4234_v17 }
 0x8bf   : > { %v4570_v52 = vpop.f32.mrb[12].mxu0  ;;  %v4641_v7 = vpop.f32.mrb[44].mxu1 }
 0x8c0   : > { %8784 = vtanh.f32 %v4441_v2  ;;  %v8567_v60 = vadd.f32 %v12635_v58, %v4570_v52  ;;  %v4572_v31 = vpop.f32.mrb[13].mxu0  ;;  %v6958_v29 = vpop.f32.mrb[45].mxu1  ;;  %v4642_v52 = vadd.f32 %v4641_v7, %v9602_v20  ;;  %v4858_v7 = vld [vmem:[%s12486_s7 + $0x10] sm:$0xff] }
 0x8c1   : > { %v8569_v5 = vadd.f32 %v9597_v43, %v4572_v31  ;;  %v12766_v29 = vld [vmem:[#allocation19_spill] sm:$0xff] }
 0x8c2   : > { %v5806_v35 = vmul.f32 -1.442695, %v8567_v60 }
 0x8c3   : > { %v5807_v13 = vmul.f32 -1.442695, %v8569_v5 }
 0x8c4   : > { %8786 = vpow2.f32 %v5806_v35 }
 0x8c5   : > { %8788 = vpow2.f32 %v5807_v13  ;;  %v4861_v13 = vld [vmem:[%s12486_s7 + $0x28] sm:$0xff] }
 0x8ca   : > { %v8785_v12 = vpop.eup %8784 }
 0x8cb   : > { %v4444_v0 = vmul.f32 %v8785_v12, %v4443_v55 }
 0x8cd   : > { %v12111_v27 = vadd.f32 %v4445_v49, %v4444_v0  ;;  %v4863_v0 = vld [vmem:[%s12486_s7 + $0x38] sm:$0xff]  ;;  %v4866_v49 = vld [vmem:[%s12486_s7 + $0x50] sm:$0xff] }
 0x8ce   : > { %v8787_v17 = vpop.eup %8786 }
 0x8cf   : > { %5805 = vst [vmem:[%s8930_s20 + $0x28] sm:$0xff] %v12111_v27  ;;  %v4649_v39 = vadd.f32 1.0, %v8787_v17  ;;  %v8789_v36 = vpop.eup %8788 }
 0x8d0   : > { %v4656_v2 = vadd.f32 1.0, %v8789_v36  ;;  %v12136_v36 = vpack.c.bf16 %v4859_v18, %v4856_v10  ;;  %v4872_v10 = vld [vmem:[%s12486_s7 + $0x80] sm:$0xff] }
 0x8d1   : > { %8790 = vrcp.f32 %v4649_v39 }
 0x8d2   : > { %8792 = vrcp.f32 %v4656_v2  ;;  %v12138_v2 = vpack.c.bf16 %v4861_v13, %v4858_v7  ;;  %v4868_v7 = vld [vmem:[%s12486_s7 + $0x60] sm:$0xff] }
 0x8db   : > { %v8791_v60 = vpop.eup %8790 }
 0x8dc   : > { %v4659_v31 = vmul.f32 %v8791_v60, %v4642_v52  ;;  %v8793_v12 = vpop.eup %8792  ;;  %v4862_v52 = vld [vmem:[%s12486_s7 + $0x30] sm:$0xff] }
 0x8dd   : > { %v4662_v5 = vsub.f32 1.0, %v8793_v12  ;;  %v4664_v39 = vmul.f32 %v8793_v12, %v11599_v14  ;;  %v4864_v14 = vld [vmem:[%s12486_s7 + $0x40] sm:$0xff]  ;;  %v4869_v12 = vld [vmem:[%s12486_s7 + $0x68] sm:$0xff] }
 0x8de   : > { %v4660_v35 = vadd.f32 %v4659_v31, %v12766_v29  ;;  %v12145_v31 = vpack.c.bf16 %v4866_v49, %v4863_v0  ;;  %v4865_v29 = vld [vmem:[%s12486_s7 + $0x48] sm:$0xff]  ;;  %v12175_v13 = vpack.c.bf16 %v4872_v10, %v4869_v12  ;;  %v4870_v0 = vld [vmem:[%s12486_s7 + $0x70] sm:$0xff]  ;;  %v4876_v10 = vld [vmem:[%s12486_s7 + $0xa0] sm:$0xff] }
 0x8df   : > { %v4873_v49 = vld [vmem:[%s12486_s7 + $0x88] sm:$0xff] }
 0x8e0   : > { %8794 = vtanh.f32 %v4660_v35  ;;  %v4867_v35 = vld [vmem:[%s12486_s7 + $0x58] sm:$0xff]  ;;  %12767 = vst [vmem:[#allocation23_spill] sm:$0xff] %v12175_v13  ;;  %v4877_v12 = vld [vmem:[%s12486_s7 + $0xa8] sm:$0xff] }
 0x8e1   : > { %v12168_v18 = vpack.c.bf16 %v4867_v35, %v4864_v14  ;;  %v4874_v14 = vld [vmem:[%s12486_s7 + $0x90] sm:$0xff] }
 0x8ea   : > { %v8795_v55 = vpop.eup %8794 }
 0x8eb   : > { %v4663_v17 = vmul.f32 %v8795_v55, %v4662_v5  ;;  %v12166_v5 = vpack.c.bf16 %v4865_v29, %v4862_v52  ;;  %v4871_v55 = vld [vmem:[%s12486_s7 + $0x78] sm:$0xff]  ;;  %v12199_v29 = vpack.c.bf16 %v4873_v49, %v4870_v0  ;;  %v4884_v0 = vld [vmem:[%s12486_s7 + $0xe0] sm:$0xff]  ;;  %v12225_v49 = vpack.c.bf16 %v4877_v12, %v4874_v14  ;;  %v4882_v14 = vld [vmem:[%s12486_s7 + $0xd0] sm:$0xff] }
 0x8ec   : > { %v12197_v52 = vpack.c.bf16 %v4871_v55, %v4868_v7  ;;  %v4879_v7 = vld [vmem:[%s12486_s7 + $0xb8] sm:$0xff]  ;;  %v4881_v55 = vld [vmem:[%s12486_s7 + $0xc8] sm:$0xff] }
 0x8ed   : > { %v12143_v60 = vadd.f32 %v4664_v39, %v4663_v17  ;;  %v4875_v17 = vld [vmem:[%s12486_s7 + $0x98] sm:$0xff]  ;;  %v4878_v39 = vld [vmem:[%s12486_s7 + $0xb0] sm:$0xff]  ;;  %12769 = vst [vmem:[#allocation15_spill] sm:$0xff] %v12199_v29  ;;  %12771 = vst [vmem:[#allocation25_spill] sm:$0xff] %v12225_v49 }
 0x8ee   : > { %12768 = vst [vmem:[#allocation24_spill] sm:$0xff] %v12197_v52  ;;  %v12206_v35 = vpack.c.bf16 %v4878_v39, %v4875_v17  ;;  %v12227_v17 = vpack.c.bf16 %v4879_v7, %v4876_v10  ;;  %v4880_v39 = vld [vmem:[%s12486_s7 + $0xc0] sm:$0xff]  ;;  %v4885_v12 = vld [vmem:[%s12486_s7 + $0xe8] sm:$0xff]  ;;  %v4887_v10 = vld [vmem:[%s12486_s7 + $0xf8] sm:$0xff] }
 0x8ef   : > { %4780 = vmatmul.mubr.f32.vlgmr.msra.gmra.mrb[28].mxu0 %v12143_v60  ;;  %6992 = vmatmul.mubr.f32.vlgmr.msra.gmra.mrb[46].mxu1 %v12143_v60  ;;  %v4890_v7 = vld [vmem:[%s12486_s7 + $0x110] sm:$0xff] }
 0x8f0   : > { %8321 = vmatpush1.bf16.msra.mxu0 %v12136_v36  ;;  %8352 = vmatpush3.bf16.msra.mxu1 %v12138_v2  ;;  %12770 = vst [vmem:[#allocation13_spill] sm:$0xff] %v12206_v35  ;;  %12772 = vst [vmem:[#allocation26_spill] sm:$0xff] %v12227_v17 }
 0x8f1   : > { %8323 = vmatprep.subr.bf16.mxu0 %v12145_v31  ;;  %8353 = vmatprep.subr.bf16.mxu1 %v12613_v54 }
 0x8f2   : > { %4968 = vmatprep.mubr.f32.mxu0 %v12615_v30  ;;  %7026 = vmatprep.mubr.msk.f32.mxu1 %vm8853_vm0, %v12615_v30 }
 0x8f4   : > { %8325 = vmatpush1.bf16.msra.mxu0 %v12166_v5  ;;  %8355 = vmatpush3.bf16.msra.mxu1 %v12168_v18 }
 0x8f5   : > { %8327 = vmatprep.subr.bf16.mxu0 %v12175_v13  ;;  %8356 = vmatprep.subr.bf16.mxu1 %v12613_v54  ;;  %v12234_v13 = vpack.c.bf16 %v4884_v0, %v4881_v55  ;;  %v12255_v0 = vpack.c.bf16 %v4885_v12, %v4882_v14  ;;  %v4893_v14 = vld [vmem:[%s12486_s7 + $0x128] sm:$0xff]  ;;  %v4896_v12 = vld [vmem:[%s12486_s7 + $0x140] sm:$0xff] }
 0x8f7   : > { %12773 = vst [vmem:[#allocation27_spill] sm:$0xff] %v12234_v13  ;;  %12775 = vst [vmem:[#allocation29_spill] sm:$0xff] %v12255_v0 }
 0x8f8   : > { %8329 = vmatpush1.bf16.msra.mxu0 %v12197_v52  ;;  %8358 = vmatpush3.bf16.msra.mxu1 %v12199_v29  ;;  %v4883_v52 = vld [vmem:[%s12486_s7 + $0xd8] sm:$0xff]  ;;  %v12262_v29 = vpack.c.bf16 %v4890_v7, %v4887_v10 }
 0x8f9   : > { %8331 = vmatprep.subr.bf16.mxu0 %v12206_v35  ;;  %8359 = vmatprep.subr.bf16.mxu1 %v12613_v54  ;;  %v12253_v55 = vpack.c.bf16 %v4883_v52, %v4880_v39  ;;  %v4886_v35 = vld [vmem:[%s12486_s7 + $0xf0] sm:$0xff]  ;;  %v4888_v52 = vld [vmem:[%s12486_s7 + $0x100] sm:$0xff]  ;;  %v4891_v39 = vld [vmem:[%s12486_s7 + $0x118] sm:$0xff] }
 0x8fa   : > { %12776 = vst [vmem:[#allocation30_spill] sm:$0xff] %v12262_v29  ;;  %v12283_v7 = vpack.c.bf16 %v4891_v39, %v4888_v52  ;;  %v4899_v52 = vld [vmem:[%s12486_s7 + $0x158] sm:$0xff]  ;;  %v4902_v39 = vld [vmem:[%s12486_s7 + $0x170] sm:$0xff] }
 0x8fb   : > { %12774 = vst [vmem:[#allocation28_spill] sm:$0xff] %v12253_v55 }
 0x8fc   : > { %8333 = vmatpush1.bf16.msra.mxu0 %v12225_v49  ;;  %8361 = vmatpush3.bf16.msra.mxu1 %v12227_v17  ;;  %v4889_v49 = vld [vmem:[%s12486_s7 + $0x108] sm:$0xff]  ;;  %v12290_v17 = vpack.c.bf16 %v4896_v12, %v4893_v14 }
 0x8fd   : > { %8335 = vmatprep.subr.bf16.mxu0 %v12234_v13  ;;  %8362 = vmatprep.subr.bf16.mxu1 %v12613_v54  ;;  %v12281_v10 = vpack.c.bf16 %v4889_v49, %v4886_v35  ;;  %v4892_v13 = vld [vmem:[%s12486_s7 + $0x120] sm:$0xff]  ;;  %v4894_v35 = vld [vmem:[%s12486_s7 + $0x130] sm:$0xff]  ;;  %v4897_v49 = vld [vmem:[%s12486_s7 + $0x148] sm:$0xff] }
 0x8fe   : > { %v12311_v12 = vpack.c.bf16 %v4897_v49, %v4894_v35 }
 0x8ff   : > { %12777 = vst [vmem:[#allocation31_spill] sm:$0xff] %v12281_v10 }
 0x900   : > { %8337 = vmatpush1.bf16.msra.mxu0 %v12253_v55  ;;  %8364 = vmatpush3.bf16.msra.mxu1 %v12255_v0  ;;  %v4895_v55 = vld [vmem:[%s12486_s7 + $0x138] sm:$0xff]  ;;  %v12318_v0 = vpack.c.bf16 %v4902_v39, %v4899_v52 }
 0x901   : > { %8339 = vmatprep.subr.bf16.mxu0 %v12262_v29  ;;  %8365 = vmatprep.subr.bf16.mxu1 %v12613_v54  ;;  %v12309_v14 = vpack.c.bf16 %v4895_v55, %v4892_v13  ;;  %v4898_v29 = vld [vmem:[%s12486_s7 + $0x150] sm:$0xff]  ;;  %v4900_v13 = vld [vmem:[%s12486_s7 + $0x160] sm:$0xff]  ;;  %v4903_v55 = vld [vmem:[%s12486_s7 + $0x178] sm:$0xff] }
 0x902   : > { %v12333_v49 = vpack.c.bf16 %v4903_v55, %v4900_v13 }
 0x904   : > { %8341 = vmatpush1.bf16.msra.mxu0 %v12281_v10  ;;  %8367 = vmatpush3.bf16.msra.mxu1 %v12283_v7  ;;  %v4901_v10 = vld [vmem:[%s12486_s7 + $0x168] sm:$0xff] }
 0x905   : > { %8343 = vmatprep.subr.bf16.mxu0 %v12290_v17  ;;  %8368 = vmatprep.subr.bf16.mxu1 %v12613_v54  ;;  %v12331_v35 = vpack.c.bf16 %v4901_v10, %v4898_v29 }
 0x908   : > { %8345 = vmatpush1.bf16.msra.mxu0 %v12309_v14  ;;  %8370 = vmatpush3.bf16.msra.mxu1 %v12311_v12 }
 0x909   : > { %8347 = vmatprep.subr.bf16.mxu0 %v12318_v0  ;;  %8371 = vmatprep.subr.bf16.mxu1 %v12613_v54 }
 0x90c   : > { %8349 = vmatpush1.bf16.msra.mxu0 %v12331_v35  ;;  %8373 = vmatpush3.bf16.msra.mxu1 %v12333_v49 }
 0x90d   : > { %8375 = vmatprep.subr.bf16.mxu0 %v11643_v44  ;;  %8406 = vmatprep.subr.bf16.mxu1 %v12613_v54  ;;  %v12778_v44 = vld [vmem:[#allocation14_spill] sm:$0xff] }
 0x90f   : > { %4969 = vmatmul.mubr.f32.vlgmr.msra.gmra.mrb[28].mxu0 %v12111_v27  ;;  %7027 = vmatmul.mubr.f32.vlgmr.msra.gmra.mrb[48].mxu1 %v12111_v27 }
 0x910   : > { %8377 = vmatpush1.bf16.msra.mxu0 %v11662_v26  ;;  %8408 = vmatpush3.bf16.msra.mxu1 %v11664_v59  ;;  %v12779_v26 = vld [vmem:[#allocation16_spill] sm:$0xff]  ;;  %v12780_v59 = vld [vmem:[#allocation6_spill] sm:$0xff] }
 0x911   : > { %8379 = vmatprep.subr.bf16.mxu0 %v11671_v51  ;;  %8409 = vmatprep.subr.bf16.mxu1 %v12613_v54  ;;  %v12781_v51 = vld [vmem:[#allocation7_spill] sm:$0xff] }
 0x912   : > { %5187 = vmatprep.mubr.f32.mxu0 %v12615_v30  ;;  %7061 = vmatprep.mubr.msk.f32.mxu1 %vm8853_vm0, %v12615_v30 }
 0x914   : > { %8381 = vmatpush1.bf16.msra.mxu0 %v11692_v42  ;;  %8411 = vmatpush3.bf16.msra.mxu1 %v11694_v23  ;;  %v12782_v42 = vld [vmem:[#allocation8_spill] sm:$0xff]  ;;  %v12783_v23 = vld [vmem:[#allocation9_spill] sm:$0xff] }
 0x915   : > { %8383 = vmatprep.subr.bf16.mxu0 %v11701_v4  ;;  %8412 = vmatprep.subr.bf16.mxu1 %v12613_v54  ;;  %v12784_v4 = vld [vmem:[#allocation10_spill] sm:$0xff] }
 0x918   : > { %8385 = vmatpush1.bf16.msra.mxu0 %v11723_v22  ;;  %8414 = vmatpush3.bf16.msra.mxu1 %v11725_v19  ;;  %v12785_v22 = vld [vmem:[#allocation11_spill] sm:$0xff]  ;;  %v12786_v19 = vld [vmem:[#allocation17_spill] sm:$0xff] }
 0x919   : > { %8387 = vmatprep.subr.bf16.mxu0 %v11732_v1  ;;  %8415 = vmatprep.subr.bf16.mxu1 %v12613_v54  ;;  %v12787_v1 = vld [vmem:[#allocation20_spill] sm:$0xff] }
 0x91c   : > { %8389 = vmatpush1.bf16.msra.mxu0 %v11751_v56  ;;  %8417 = vmatpush3.bf16.msra.mxu1 %v11753_v41  ;;  %v12788_v56 = vld [vmem:[#allocation12_spill] sm:$0xff]  ;;  %v12789_v41 = vld [vmem:[#allocation21_spill] sm:$0xff] }
 0x91d   : > { %8391 = vmatprep.subr.bf16.mxu0 %v11760_v15  ;;  %8418 = vmatprep.subr.bf16.mxu1 %v12613_v54  ;;  %v12790_v15 = vld [vmem:[#allocation22_spill] sm:$0xff] }
 0x920   : > { %8393 = vmatpush1.bf16.msra.mxu0 %v11779_v62  ;;  %8420 = vmatpush3.bf16.msra.mxu1 %v11781_v32 }
 0x921   : > { %8395 = vmatprep.subr.bf16.mxu0 %v11788_v24  ;;  %8421 = vmatprep.subr.bf16.mxu1 %v12613_v54 }
 0x924   : > { %8397 = vmatpush1.bf16.msra.mxu0 %v11807_v21  ;;  %8423 = vmatpush3.bf16.msra.mxu1 %v11809_v33 }
 0x925   : > { %8399 = vmatprep.subr.bf16.mxu0 %v11816_v40  ;;  %8424 = vmatprep.subr.bf16.mxu1 %v12613_v54 }
 0x928   : > { %8401 = vmatpush1.bf16.msra.mxu0 %v11835_v53  ;;  %8426 = vmatpush3.bf16.msra.mxu1 %v11837_v48 }
 0x929   : > { %8403 = vmatprep.subr.bf16.mxu0 %v11844_v63  ;;  %8427 = vmatprep.subr.bf16.mxu1 %v12613_v54 }
 0x92c   : > { %8405 = vmatpush1.bf16.msra.mxu0 %v11857_v28  ;;  %8429 = vmatpush3.bf16.msra.mxu1 %v11859_v9 }
 0x92d   : > { %8431 = vmatprep.subr.bf16.mxu0 %v11877_v37  ;;  %8462 = vmatprep.subr.bf16.mxu1 %v12613_v54 }
 0x92f   : > { %5188 = vmatmul.mubr.f32.vlgmr.msra.gmra.mrb[14].mxu0 %v12143_v60  ;;  %7062 = vmatmul.mubr.f32.vlgmr.msra.gmra.mrb[50].mxu1 %v12143_v60 }
 0x930   : > { %8433 = vmatpush1.bf16.msra.mxu0 %v11888_v45  ;;  %8464 = vmatpush3.bf16.msra.mxu1 %v11894_v57 }
 0x931   : > { %8435 = vmatprep.subr.bf16.mxu0 %v11904_v47  ;;  %8465 = vmatprep.subr.bf16.mxu1 %v12613_v54  ;;  %v12791_v47 = vld [vmem:[#allocation5_spill] sm:$0xff] }
 0x932   : > { %5398 = vmatprep.mubr.f32.mxu0 %v12615_v30  ;;  %7096 = vmatprep.mubr.msk.f32.mxu1 %vm8853_vm0, %v12615_v30 }
 0x934   : > { %8437 = vmatpush1.bf16.msra.mxu0 %v11916_v61  ;;  %8467 = vmatpush3.bf16.msra.mxu1 %v11922_v38 }
 0x935   : > { %8439 = vmatprep.subr.bf16.mxu0 %v11932_v8  ;;  %8468 = vmatprep.subr.bf16.mxu1 %v12613_v54 }
 0x938   : > { %8441 = vmatpush1.bf16.msra.mxu0 %v11944_v46  ;;  %8470 = vmatpush3.bf16.msra.mxu1 %v11950_v50 }
 0x939   : > { %8443 = vmatprep.subr.bf16.mxu0 %v11960_v6  ;;  %8471 = vmatprep.subr.bf16.mxu1 %v12613_v54 }
 0x93c   : > { %8445 = vmatpush1.bf16.msra.mxu0 %v11972_v34  ;;  %8473 = vmatpush3.bf16.msra.mxu1 %v11978_v25 }
 0x93d   : > { %8447 = vmatprep.subr.bf16.mxu0 %v12778_v44  ;;  %8474 = vmatprep.subr.bf16.mxu1 %v12613_v54 }
 0x940   : > { %8449 = vmatpush1.bf16.msra.mxu0 %v12779_v26  ;;  %8476 = vmatpush3.bf16.msra.mxu1 %v12780_v59 }
 0x941   : > { %8451 = vmatprep.subr.bf16.mxu0 %v12781_v51  ;;  %8477 = vmatprep.subr.bf16.mxu1 %v12613_v54 }
 0x944   : > { %8453 = vmatpush1.bf16.msra.mxu0 %v12782_v42  ;;  %8479 = vmatpush3.bf16.msra.mxu1 %v12783_v23 }
 0x945   : > { %8455 = vmatprep.subr.bf16.mxu0 %v12784_v4  ;;  %8480 = vmatprep.subr.bf16.mxu1 %v12613_v54 }
 0x948   : > { %8457 = vmatpush1.bf16.msra.mxu0 %v12785_v22  ;;  %8482 = vmatpush3.bf16.msra.mxu1 %v12786_v19 }
 0x949   : > { %8459 = vmatprep.subr.bf16.mxu0 %v12787_v1  ;;  %8483 = vmatprep.subr.bf16.mxu1 %v12613_v54 }
 0x94c   : > { %8461 = vmatpush1.bf16.msra.mxu0 %v12788_v56  ;;  %8485 = vmatpush3.bf16.msra.mxu1 %v12789_v41  ;;  %v12792_v56 = vld [vmem:[#allocation18_spill] sm:$0xff] }
 0x94d   : > { %8487 = vmatprep.subr.bf16.mxu0 %v12790_v15  ;;  %8518 = vmatprep.subr.bf16.mxu1 %v12613_v54 }
 0x9c2   : > { %v4852_v62 = vpop.f32.mrb[46].mxu1 }
 0x9c3   : > { %v6993_v32 = vpop.f32.mrb[47].mxu1  ;;  %v4853_v8 = vadd.f32 %v4852_v62, %v9925_v3 }
 0x9e2   : > { %v4970_v24 = vpop.f32.mrb[28].mxu0  ;;  %v5041_v21 = vpop.f32.mrb[48].mxu1 }
 0x9e3   : > { %v8599_v33 = vadd.f32 %v9915_v11, %v4970_v24  ;;  %v4972_v40 = vpop.f32.mrb[29].mxu0  ;;  %v7028_v53 = vpop.f32.mrb[49].mxu1  ;;  %v5042_v61 = vadd.f32 %v5041_v21, %v12791_v47 }
 0x9e4   : > { %v8601_v63 = vadd.f32 %v9917_v16, %v4972_v40  ;;  %v12802_v40 = vld [vmem:[#allocation30_spill] sm:$0xff]  ;;  %v12803_v53 = vld [vmem:[#allocation31_spill] sm:$0xff] }
 0x9e5   : > { %v5808_v48 = vmul.f32 -1.442695, %v8599_v33  ;;  %v12798_v33 = vld [vmem:[#allocation26_spill] sm:$0xff] }
 0x9e6   : > { %v5809_v28 = vmul.f32 -1.442695, %v8601_v63 }
 0x9e7   : > { %8796 = vpow2.f32 %v5808_v48 }
 0x9e8   : > { %8798 = vpow2.f32 %v5809_v28 }
 0x9f1   : > { %v8797_v9 = vpop.eup %8796 }
 0x9f2   : > { %v5049_v37 = vadd.f32 1.0, %v8797_v9  ;;  %v8799_v45 = vpop.eup %8798 }
 0x9f3   : > { %v5056_v57 = vadd.f32 1.0, %v8799_v45 }
 0x9f4   : > { %8800 = vrcp.f32 %v5049_v37 }
 0x9f5   : > { %8802 = vrcp.f32 %v5056_v57 }
 0x9fe   : > { %v8801_v38 = vpop.eup %8800 }
 0x9ff   : > { %v5059_v46 = vmul.f32 %v8801_v38, %v5042_v61  ;;  %v8803_v13 = vpop.eup %8802 }
 0xa00   : > { %v5062_v44 = vsub.f32 1.0, %v8803_v13  ;;  %v5064_v51 = vmul.f32 %v8803_v13, %v12111_v27 }
 0xa01   : > { %v5060_v50 = vadd.f32 %v5059_v46, %v4853_v8 }
 0xa02   : > { %v5189_v6 = vpop.f32.mrb[14].mxu0  ;;  %v5260_v34 = vpop.f32.mrb[50].mxu1 }
 0xa03   : > { %8804 = vtanh.f32 %v5060_v50  ;;  %v8571_v25 = vadd.f32 %v12635_v58, %v5189_v6  ;;  %v5191_v29 = vpop.f32.mrb[15].mxu0  ;;  %v7063_v10 = vpop.f32.mrb[51].mxu1 }
 0xa04   : > { %v8573_v39 = vadd.f32 %v9597_v43, %v5191_v29  ;;  %v5261_v43 = vadd.f32 %v5260_v34, %v9602_v20  ;;  %v12793_v20 = vld [vmem:[#allocation23_spill] sm:$0xff] }
 0xa05   : > { %v5811_v52 = vmul.f32 -1.442695, %v8571_v25 }
 0xa06   : > { %v5812_v55 = vmul.f32 -1.442695, %v8573_v39 }
 0xa07   : > { %8806 = vpow2.f32 %v5811_v52 }
 0xa08   : > { %8808 = vpow2.f32 %v5812_v55 }
 0xa0d   : > { %v8805_v26 = vpop.eup %8804 }
 0xa0e   : > { %v5063_v59 = vmul.f32 %v8805_v26, %v5062_v44 }
 0xa10   : > { %v12422_v42 = vadd.f32 %v5064_v51, %v5063_v59 }
 0xa11   : > { %v8807_v23 = vpop.eup %8806 }
 0xa12   : > { %5810 = vst [vmem:[%s8930_s20 + $0x30] sm:$0xff] %v12422_v42  ;;  %v5268_v58 = vadd.f32 1.0, %v8807_v23  ;;  %v8809_v4 = vpop.eup %8808 }
 0xa13   : > { %v5275_v22 = vadd.f32 1.0, %v8809_v4 }
 0xa14   : > { %8810 = vrcp.f32 %v5268_v58 }
 0xa15   : > { %8812 = vrcp.f32 %v5275_v22 }
 0xa1e   : > { %v8811_v19 = vpop.eup %8810 }
 0xa1f   : > { %v5278_v1 = vmul.f32 %v8811_v19, %v5261_v43  ;;  %v8813_v15 = vpop.eup %8812 }
 0xa20   : > { %v5281_v27 = vsub.f32 1.0, %v8813_v15  ;;  %v5283_v24 = vmul.f32 %v8813_v15, %v12143_v60  ;;  %v12796_v60 = vld [vmem:[#allocation13_spill] sm:$0xff] }
 0xa21   : > { %v5279_v41 = vadd.f32 %v5278_v1, %v12792_v56 }
 0xa23   : > { %8814 = vtanh.f32 %v5279_v41 }
 0xa2d   : > { %v8815_v62 = vpop.eup %8814 }
 0xa2e   : > { %v5282_v32 = vmul.f32 %v8815_v62, %v5281_v27 }
 0xa30   : > { %v5284_v21 = vadd.f32 %v5283_v24, %v5282_v32 }
 0xa32   : > { %5399 = vmatmul.mubr.f32.vlgmr.msra.gmra.mrb[30].mxu0 %v5284_v21  ;;  %5685 = vst [vmem:[#allocation3] sm:$0xff] %v5284_v21  ;;  %7097 = vmatmul.mubr.f32.vlgmr.msra.gmra.mrb[52].mxu1 %v5284_v21 }
 0xa33   : > { %8489 = vmatpush1.bf16.msra.mxu0 %v12136_v36  ;;  %8520 = vmatpush3.bf16.msra.mxu1 %v12138_v2  ;;  %v12794_v36 = vld [vmem:[#allocation24_spill] sm:$0xff]  ;;  %v12795_v2 = vld [vmem:[#allocation15_spill] sm:$0xff] }
 0xa34   : > { %8491 = vmatprep.subr.bf16.mxu0 %v12145_v31  ;;  %8521 = vmatprep.subr.bf16.mxu1 %v12613_v54  ;;  %v12797_v31 = vld [vmem:[#allocation25_spill] sm:$0xff] }
 0xa35   : > { %5587 = vmatprep.mubr.f32.mxu0 %v12615_v30  ;;  %7131 = vmatprep.mubr.msk.f32.mxu1 %vm8853_vm0, %v12615_v30  ;;  %v12799_v30 = vld [vmem:[#allocation27_spill] sm:$0xff] }
 0xa37   : > { %8493 = vmatpush1.bf16.msra.mxu0 %v12166_v5  ;;  %8523 = vmatpush3.bf16.msra.mxu1 %v12168_v18  ;;  %v12800_v5 = vld [vmem:[#allocation28_spill] sm:$0xff]  ;;  %v12801_v18 = vld [vmem:[#allocation29_spill] sm:$0xff] }
 0xa38   : > { %8495 = vmatprep.subr.bf16.mxu0 %v12793_v20  ;;  %8524 = vmatprep.subr.bf16.mxu1 %v12613_v54 }
 0xa3b   : > { %8497 = vmatpush1.bf16.msra.mxu0 %v12794_v36  ;;  %8526 = vmatpush3.bf16.msra.mxu1 %v12795_v2 }
 0xa3c   : > { %8499 = vmatprep.subr.bf16.mxu0 %v12796_v60  ;;  %8527 = vmatprep.subr.bf16.mxu1 %v12613_v54 }
 0xa3f   : > { %8501 = vmatpush1.bf16.msra.mxu0 %v12797_v31  ;;  %8529 = vmatpush3.bf16.msra.mxu1 %v12798_v33 }
 0xa40   : > { %8503 = vmatprep.subr.bf16.mxu0 %v12799_v30  ;;  %8530 = vmatprep.subr.bf16.mxu1 %v12613_v54 }
 0xa43   : > { %8505 = vmatpush1.bf16.msra.mxu0 %v12800_v5  ;;  %8532 = vmatpush3.bf16.msra.mxu1 %v12801_v18 }
 0xa44   : > { %8507 = vmatprep.subr.bf16.mxu0 %v12802_v40  ;;  %8533 = vmatprep.subr.bf16.mxu1 %v12613_v54 }
 0xa47   : > { %8509 = vmatpush1.bf16.msra.mxu0 %v12803_v53  ;;  %8535 = vmatpush3.bf16.msra.mxu1 %v12283_v7 }
 0xa48   : > { %8511 = vmatprep.subr.bf16.mxu0 %v12290_v17  ;;  %8536 = vmatprep.subr.bf16.mxu1 %v12613_v54 }
 0xa4b   : > { %8513 = vmatpush1.bf16.msra.mxu0 %v12309_v14  ;;  %8538 = vmatpush3.bf16.msra.mxu1 %v12311_v12 }
 0xa4c   : > { %8515 = vmatprep.subr.bf16.mxu0 %v12318_v0  ;;  %8539 = vmatprep.subr.bf16.mxu1 %v12613_v54 }
 0xa4f   : > { %8517 = vmatpush1.bf16.msra.mxu0 %v12331_v35  ;;  %8541 = vmatpush3.bf16.msra.mxu1 %v12333_v49 }
 0xa52   : > { %5588 = vmatmul.mubr.f32.vlgmr.msra.gmra.mrb[30].mxu0 %v12422_v42  ;;  %7132 = vmatmul.mubr.f32.vlgmr.msra.gmra.mrb[54].mxu1 %v12422_v42 }
 0xb05   : > { %v5471_v7 = vpop.f32.mrb[52].mxu1 }
 0xb06   : > { %v7098_v17 = vpop.f32.mrb[53].mxu1  ;;  %v5472_v38 = vadd.f32 %v5471_v7, %v9925_v3 }
 0xb25   : > { %v5589_v48 = vpop.f32.mrb[30].mxu0  ;;  %v5660_v63 = vpop.f32.mrb[54].mxu1 }
 0xb26   : > { %v8603_v14 = vadd.f32 %v9915_v11, %v5589_v48  ;;  %v5591_v28 = vpop.f32.mrb[31].mxu0  ;;  %v7133_v12 = vpop.f32.mrb[55].mxu1  ;;  %v5661_v57 = vadd.f32 %v5660_v63, %v12791_v47 }
 0xb27   : > { %v8605_v0 = vadd.f32 %v9917_v16, %v5591_v28 }
 0xb28   : > { %v5813_v9 = vmul.f32 -1.442695, %v8603_v14 }
 0xb29   : > { %v5814_v54 = vmul.f32 -1.442695, %v8605_v0 }
 0xb2a   : > { %8816 = vpow2.f32 %v5813_v9 }
 0xb2b   : > { %8818 = vpow2.f32 %v5814_v54 }
 0xb34   : > { %v8817_v35 = vpop.eup %8816 }
 0xb35   : > { %v5668_v49 = vadd.f32 1.0, %v8817_v35  ;;  %v8819_v37 = vpop.eup %8818 }
 0xb36   : > { %v5675_v45 = vadd.f32 1.0, %v8819_v37 }
 0xb37   : > { %8820 = vrcp.f32 %v5668_v49 }
 0xb38   : > { %8822 = vrcp.f32 %v5675_v45 }
 0xb41   : > { %v8821_v61 = vpop.eup %8820 }
 0xb42   : > { %v5678_v11 = vmul.f32 %v8821_v61, %v5661_v57  ;;  %v8823_v46 = vpop.eup %8822 }
 0xb43   : > { %v5681_v16 = vsub.f32 1.0, %v8823_v46  ;;  %v5683_v34 = vmul.f32 %v8823_v46, %v12422_v42 }
 0xb44   : > { %v5679_v8 = vadd.f32 %v5678_v11, %v5472_v38 }
 0xb46   : > { %8824 = vtanh.f32 %v5679_v8 }
 0xb50   : > { %v8825_v50 = vpop.eup %8824 }
 0xb51   : > { %v5682_v6 = vmul.f32 %v8825_v50, %v5681_v16 }
 0xb53   : > { %v5684_v25 = vadd.f32 %v5683_v34, %v5682_v6 }
 0xb55   : > { %5686 = vst [vmem:[#allocation4] sm:$0xff] %v5684_v25  ;;  %5815 = vst [vmem:[%s8930_s20 + $0x38] sm:$0xff] %v5684_v25 }
 0xb56 PF: > { %s19_s11 = sadd.s32 1, %s8848_s11   ;;  %s12804_s30 = smov %s8844_s10 }
 0xb57   : > { %p16_p6 = scmp.ge.s32.totalorder %s19_s11, 4   ;;  %s12805_s10 = smov %s12807_s12 }
 0xb59   :  { %18 = sbr.rel (!%p16_p6) target bundleno = 2 (0x2), region = 104 }

</bundles_post_ra>
